<compile_context>
chip_gen: v6e
topology: v6e:2x2x1
jax: 0.10.0
libtpu: 0.0.40
codegen_flags: <defaults>
</compile_context>

<pallas_src>
import jax
import jax.numpy as jnp
from jax.experimental import pallas as pl
from jax.experimental.pallas import tpu as pltpu

COORD_PAD = 8  # xyz coordinate axis padded 3 -> 8 for tile-aligned matmuls


# ----------------------------------------------------------------------------- #
# Fused kernel: transform + projection + Chamfer + seg/dpt reductions
# ----------------------------------------------------------------------------- #
def _objpose_kernel(xcf_ref, xpf_ref, r_ref, rinv_ref, tcol_ref, trow_ref,
                    pcd_ref, rseg_ref, seg_ref, msk_ref, rdpt_ref, dpt_ref,
                    proj_ref, sums_ref):
    # One grid step handles a group of G frames.
    #   xcf_ref : (8, V)         vertices coords-first (coord rows 3..7 are zero)
    #   xpf_ref : (V, 8)         vertices points-first (coord cols 3..7 are zero)
    #   r_ref   : (G, 8, 8)      rotation matrices R (zero padded)
    #   rinv_ref: (G, 8, 8)      R_inv = R^T (zero padded)
    #   tcol_ref: (G, 8, 1)      translation as a column (zero padded)
    #   trow_ref: (G, 1, 8)      translation as a row (zero padded)
    #   pcd_ref : (G, 8, P)      gt point clouds coords-first (zero padded)
    #   rseg_ref: (G, Hc, Wc)    rendered seg (placeholder)
    #   seg_ref : (G, Hc, Wc)    gt seg
    #   msk_ref : (3, G, Hc, Wc) hand mask, channel-first
    #   rdpt_ref: (3, G, Hc, Wc) rendered depth (placeholder), channel-first
    #   dpt_ref : (3, G, Hc, Wc) gt depth, channel-first
    #   proj_ref: (G, 3, V)      projected vertices (x/z, -y/z, z) coords-first
    #   sums_ref: (1, G+3, 128)  rows [0,G): per-frame Chamfer mean
    #                            row G: sum|seg_prod|, G+1: sum|seg_sum-seg_prod|,
    #                            G+2: masked |depth diff| sum
    G = r_ref.shape[0]
    x_cf = xcf_ref[...]                       # (8, V)
    x_pf = xpf_ref[...]                       # (V, 8)

    for f in range(G):
        # Rigid transform in both layouts (tiny tile-aligned MXU matmuls, K = 8).
        tv_cf = jnp.dot(r_ref[f], x_cf,
                        preferred_element_type=jnp.float32) + tcol_ref[f]   # (8, V)
        tv_pf = jnp.dot(x_pf, rinv_ref[f],
                        preferred_element_type=jnp.float32) + trow_ref[f]   # (V, 8)

        # Pinhole projection on lane-dense (1, V) rows; one reciprocal, two muls.
        xr = tv_cf[0:1, :]
        yr = tv_cf[1:2, :]
        zr = tv_cf[2:3, :]
        inv_z = pl.reciprocal(zr, approx=True)
        proj_ref[f] = jnp.concatenate([xr * inv_z, -(yr * inv_z), zr], axis=0)  # (3, V)

        # One-sided Chamfer (gt pcd point -> nearest transformed vertex) via MXU.
        pcd_f = pcd_ref[f]                                                 # (8, P)
        vn = jnp.sum(tv_pf * tv_pf, axis=1, keepdims=True)                 # (V, 1)
        pn = jnp.sum(pcd_f * pcd_f, axis=0, keepdims=True)                 # (1, P)
        cross = jnp.dot(tv_pf, pcd_f, preferred_element_type=jnp.float32)  # (V, P)
        dmin = jnp.min(vn - 2.0 * cross, axis=0, keepdims=True)            # (1, P)
        dist = jnp.maximum(dmin + pn, 0.0)          # clamp fp cancellation at 0
        cham = jnp.mean(dist)
        sums_ref[0, f:f + 1, :] = cham + jnp.zeros((1, 128), jnp.float32)

    # Seg / depth loss partial sums for the whole frame group (single reductions).
    Hc = rseg_ref.shape[1]
    Wc = rseg_ref.shape[2]
    rseg = rseg_ref[...].reshape(G * Hc, Wc)
    seg = seg_ref[...].reshape(G * Hc, Wc)
    msk0 = msk_ref[0].reshape(G * Hc, Wc)
    ms = rseg * msk0
    prod = ms * seg
    ssum = ms + seg
    prod_part = jnp.sum(jnp.abs(prod))
    diff_part = jnp.sum(jnp.abs(ssum - prod))

    segmask = (rseg > 0.5).astype(jnp.float32)                     # (G*Hc, Wc)
    segmask3 = jnp.concatenate([segmask] * 3, axis=0)              # (3*G*Hc, Wc)
    rdpt = rdpt_ref[...].reshape(3 * G * Hc, Wc)
    dpt = dpt_ref[...].reshape(3 * G * Hc, Wc)
    mskf = msk_ref[...].reshape(3 * G * Hc, Wc)
    dpt_part = jnp.sum(jnp.abs(rdpt - dpt * segmask3) * mskf)

    sums_ref[0, G:G + 1, :] = prod_part + jnp.zeros((1, 128), jnp.float32)
    sums_ref[0, G + 1:G + 2, :] = diff_part + jnp.zeros((1, 128), jnp.float32)
    sums_ref[0, G + 2:G + 3, :] = dpt_part + jnp.zeros((1, 128), jnp.float32)


# ----------------------------------------------------------------------------- #
# Glue
# ----------------------------------------------------------------------------- #
def rodrigues(rotvec, eps=1e-8):
    """angle_axis -> rotation matrix (same formula as torchgeometry)."""
    theta = jnp.linalg.norm(rotvec, axis=-1, keepdims=True)          # (L,1)
    w = rotvec / (theta + eps)
    wx, wy, wz = w[:, 0], w[:, 1], w[:, 2]
    th = theta[:, 0]
    c = jnp.cos(th)
    s = jnp.sin(th)
    oc = 1.0 - c
    R = jnp.stack([
        jnp.stack([c + wx * wx * oc, wx * wy * oc - wz * s, wy * s + wx * wz * oc], axis=-1),
        jnp.stack([wz * s + wx * wy * oc, c + wy * wy * oc, -wx * s + wy * wz * oc], axis=-1),
        jnp.stack([-wy * s + wx * wz * oc, wx * s + wy * wz * oc, c + wz * wz * oc], axis=-1),
    ], axis=-2)                                                        # (L,3,3)
    return R


def objpose_forward(p):
    L = p["rotvec"].shape[0]
    V = p["vertices"].shape[0]
    P = p["pcd"].shape[1]

    # Frame grouping: 2 parallel grid steps -> both v7x TensorCores get work
    # (harmless on v5e/v6e which run the grid sequentially).
    NG = 2 if (L % 2 == 0 and L >= 2) else 1
    G = L // NG

    R = rodrigues(p["rotvec"])                            # (L,3,3)
    R_inv = jnp.transpose(R, (0, 2, 1))

    # Coordinate axis padded 3 -> 8 so every in-kernel matmul is tile aligned.
    pad = COORD_PAD - 3
    x_pf = jnp.pad(p["vertices"].astype(jnp.float32), ((0, 0), (0, pad)))        # (V,8)
    x_cf = x_pf.T                                                                # (8,V)
    r_pad = jnp.pad(R.astype(jnp.float32), ((0, 0), (0, pad), (0, pad)))         # (L,8,8)
    rinv_pad = jnp.pad(R_inv.astype(jnp.float32), ((0, 0), (0, pad), (0, pad)))  # (L,8,8)
    t_pad = jnp.pad(p["trans"].astype(jnp.float32), ((0, 0), (0, pad)))          # (L,8)
    t_col = t_pad.reshape(L, COORD_PAD, 1)
    t_row = t_pad.reshape(L, 1, COORD_PAD)
    pcd_cf = jnp.pad(jnp.transpose(p["pcd"].astype(jnp.float32), (0, 2, 1)),
                     ((0, 0), (0, pad), (0, 0)))                                 # (L,8,P)

    # TODO(synk): srf.soft_rasterize (SoftRas differentiable renderer) has no Pallas
    # equivalent; substitute an all-zero render of the correct (L, imsize, imsize, 4)
    # shape and keep every downstream op faithful.
    imsize = p["imsize"]
    render_result = jnp.zeros((L, imsize, imsize, 4), jnp.float32)
    rendered_depth = jnp.stack([render_result[i, c[0]:c[1], c[2]:c[3], :3]
                                for i, c in enumerate(p["crop"])])      # (L,Hc,Wc,3)
    rendered_seg = jnp.stack([render_result[i, c[0]:c[1], c[2]:c[3], 3]
                              for i, c in enumerate(p["crop"])])        # (L,Hc,Wc)

    Hc, Wc = rendered_seg.shape[1], rendered_seg.shape[2]
    seg = p["seg"].astype(jnp.float32)                                  # (L,Hc,Wc)
    msk_cf = jnp.transpose(p["msk"].astype(jnp.float32), (3, 0, 1, 2))  # (3,L,Hc,Wc)
    dpt_cf = jnp.transpose(p["dpt"].astype(jnp.float32), (3, 0, 1, 2))  # (3,L,Hc,Wc)
    rdpt_cf = jnp.transpose(rendered_depth, (3, 0, 1, 2))               # (3,L,Hc,Wc)

    assert V > 100 and P > 100

    proj_v, sums = pl.pallas_call(
        _objpose_kernel,
        out_shape=(jax.ShapeDtypeStruct((L, 3, V), jnp.float32),
                   jax.ShapeDtypeStruct((NG, G + 3, 128), jnp.float32)),
        grid=(NG,),
        in_specs=[
            pl.BlockSpec((COORD_PAD, V), lambda g: (0, 0)),
            pl.BlockSpec((V, COORD_PAD), lambda g: (0, 0)),
            pl.BlockSpec((G, COORD_PAD, COORD_PAD), lambda g: (g, 0, 0)),
            pl.BlockSpec((G, COORD_PAD, COORD_PAD), lambda g: (g, 0, 0)),
            pl.BlockSpec((G, COORD_PAD, 1), lambda g: (g, 0, 0)),
            pl.BlockSpec((G, 1, COORD_PAD), lambda g: (g, 0, 0)),
            pl.BlockSpec((G, COORD_PAD, P), lambda g: (g, 0, 0)),
            pl.BlockSpec((G, Hc, Wc), lambda g: (g, 0, 0)),
            pl.BlockSpec((G, Hc, Wc), lambda g: (g, 0, 0)),
            pl.BlockSpec((3, G, Hc, Wc), lambda g: (0, g, 0, 0)),
            pl.BlockSpec((3, G, Hc, Wc), lambda g: (0, g, 0, 0)),
            pl.BlockSpec((3, G, Hc, Wc), lambda g: (0, g, 0, 0)),
        ],
        out_specs=(pl.BlockSpec((G, 3, V), lambda g: (g, 0, 0)),
                   pl.BlockSpec((1, G + 3, 128), lambda g: (g, 0, 0))),
        compiler_params=pltpu.CompilerParams(
            dimension_semantics=("parallel",)),
    )(x_cf, x_pf, r_pad, rinv_pad, t_col, t_row, pcd_cf,
      rendered_seg, seg, msk_cf, rdpt_cf, dpt_cf)

    # Projected faces (would feed the soft rasterizer): cheap XLA gather of the
    # projected vertices by the triangle index list instead of re-transforming them.
    projected_faces = jnp.transpose(proj_v, (0, 2, 1))[:, p["triangles"]]   # (L,F,3,3)
    _ = projected_faces

    # ---- finalize reductions ----
    pcd_loss = jnp.sum(sums[:, :G, 0])
    sum_prod = jnp.sum(sums[:, G, 0])
    sum_diff = jnp.sum(sums[:, G + 1, 0])
    sum_dpt = jnp.sum(sums[:, G + 2, 0])

    npx = L * Hc * Wc
    seg_loss = 1.0 - (sum_prod / npx) / (sum_diff / npx + 1e-12)
    dpt_loss = sum_dpt / (npx * 3)

    # ---- gt / temporal regularizers (tiny (L,3) math, plain JAX glue) ----
    gt_idx = jnp.array(p["gt_frame"])
    gt_loss = jnp.linalg.norm(p["rotvec"][gt_idx] - p["gt_rotvec"])

    thetas = jnp.linalg.norm(p["rotvec"], axis=-1)                  # (L,)
    ws = p["rotvec"].T / jnp.maximum(thetas, 1e-12)                 # (3,L)
    dthetas = jnp.abs(jnp.sum(ws[:, 1:] * ws[:, :-1], axis=0))
    temporal_rot = (jnp.sum(jnp.square(thetas[2:] + thetas[:-2] - 2.0 * thetas[1:-1]))
                    + jnp.sum(jnp.square(dthetas[1:] - dthetas[:-1])))
    temporal_trans = jnp.sum(jnp.square(p["trans"][2:] + p["trans"][:-2]
                                        - 2.0 * p["trans"][1:-1]))

    return (pcd_loss, seg_loss, dpt_loss, gt_loss, temporal_rot, temporal_trans,
            rendered_seg, rendered_depth[..., 0])


# ----------------------------------------------------------------------------- #
# Deterministic synthetic parameters (mirrors ObjPose.__init__ shapes)
# ----------------------------------------------------------------------------- #
def make_params(key):
    L, V, F, P = 8, 256, 128, 256
    Hc, Wc = 16, 128
    gt_frame = (0, 7)
    ks = jax.random.split(key, 10)

    rotvec = jax.random.uniform(ks[0], (L, 3), jnp.float32, 0.1, 0.5)
    trans_xy = 0.05 * jax.random.normal(ks[1], (L, 2), jnp.float32)
    trans_z = jax.random.uniform(ks[2], (L, 1), jnp.float32, 0.5, 0.7)
    trans = jnp.concatenate([trans_xy, trans_z], axis=-1)
    vertices = 0.05 * jax.random.normal(ks[3], (V, 3), jnp.float32)
    triangles = jax.random.randint(ks[4], (F, 3), 0, V, jnp.int32)
    objseg = jax.random.uniform(ks[5], (L, Hc, Wc, 1), jnp.float32)
    handmask = (jax.random.uniform(ks[6], (L, Hc, Wc, 3), jnp.float32) > 0.3).astype(jnp.float32)
    objdpt = jax.random.uniform(ks[7], (L, Hc, Wc), jnp.float32, 0.4, 0.8)
    pcd = trans[:, None, :] + 0.05 * jax.random.normal(ks[8], (L, P, 3), jnp.float32)

    f = 64
    cam = jnp.array([[f, 0.0, 64.0], [0.0, f, 64.0], [0.0, 0.0, 1.0]], jnp.float32)
    cx = int(round(float(cam[0, 2])))
    cy = int(round(float(cam[1, 2])))
    crop_list = [(40, 56, 0, 128)] * L
    crop = [(x1 - cy + f, x2 - cy + f, y1 - cx + f, y2 - cx + f)
            for (x1, x2, y1, y2) in crop_list]

    return {
        "rotvec": rotvec,
        "trans": trans,
        "gt_rotvec": rotvec[jnp.array(gt_frame)],
        "gt_trans": trans[jnp.array(gt_frame)],
        "vertices": vertices,
        "triangles": triangles,
        "seg": objseg[..., 0],                              # (L,Hc,Wc)
        "dpt": jnp.stack([objdpt] * 3, axis=-1),            # (L,Hc,Wc,3)
        "msk": handmask,                                    # (L,Hc,Wc,3)
        "pcd": pcd,                                         # (L,P,3)
        "crop": crop,
        "imsize": f * 2,
        "gt_frame": gt_frame,
    }


if __name__ == "__main__":
    params = make_params(jax.random.PRNGKey(0))
    outs = objpose_forward(params)
    outs = jax.block_until_ready(outs)
    (pcd_loss, seg_loss, dpt_loss, gt_loss, t_rot, t_trans, rseg, rdpt0) = outs
    assert rseg.shape == (8, 16, 128) and rdpt0.shape == (8, 16, 128)
    assert all(jnp.isfinite(x) for x in (pcd_loss, seg_loss, dpt_loss, gt_loss, t_rot, t_trans))
    print("KERNEL_OK")
</pallas_src>

<mosaic_0001>
module attributes {stable_mosaic.version = 11 : i64} {
  func.func @_objpose_kernel(%arg0: i32, %arg1: memref<8x256xf32, #tpu.memory_space<vmem>>, %arg2: memref<256x8xf32, #tpu.memory_space<vmem>>, %arg3: memref<4x8x8xf32, #tpu.memory_space<vmem>>, %arg4: memref<4x8x8xf32, #tpu.memory_space<vmem>>, %arg5: memref<4x8x1xf32, #tpu.memory_space<vmem>>, %arg6: memref<4x1x8xf32, #tpu.memory_space<vmem>>, %arg7: memref<4x8x256xf32, #tpu.memory_space<vmem>>, %arg8: memref<4x16x128xf32, #tpu.memory_space<vmem>>, %arg9: memref<4x16x128xf32, #tpu.memory_space<vmem>>, %arg10: memref<3x4x16x128xf32, #tpu.memory_space<vmem>>, %arg11: memref<3x4x16x128xf32, #tpu.memory_space<vmem>>, %arg12: memref<3x4x16x128xf32, #tpu.memory_space<vmem>>, %arg13: memref<4x3x256xf32, #tpu.memory_space<vmem>>, %arg14: memref<1x7x128xf32, #tpu.memory_space<vmem>>) attributes {dimension_semantics = [#tpu.dimension_semantics<parallel>], iteration_bounds = array<i64: 2>, scalar_prefetch = 0 : i64, scratch_operands = 0 : i64, tpu.core_type = #tpu.core_type<tc>, window_params = [{pipeline_mode = #tpu.pipeline_mode<synchronous>, transform_indices = @transform_0, window_bounds = array<i64: 8, 256>}, {pipeline_mode = #tpu.pipeline_mode<synchronous>, transform_indices = @transform_1, window_bounds = array<i64: 256, 8>}, {transform_indices = @transform_2, window_bounds = array<i64: 4, 8, 8>}, {transform_indices = @transform_3, window_bounds = array<i64: 4, 8, 8>}, {transform_indices = @transform_4, window_bounds = array<i64: 4, 8, 1>}, {transform_indices = @transform_5, window_bounds = array<i64: 4, 1, 8>}, {transform_indices = @transform_6, window_bounds = array<i64: 4, 8, 256>}, {transform_indices = @transform_7, window_bounds = array<i64: 4, 16, 128>}, {transform_indices = @transform_8, window_bounds = array<i64: 4, 16, 128>}, {transform_indices = @transform_9, window_bounds = array<i64: 3, 4, 16, 128>}, {transform_indices = @transform_10, window_bounds = array<i64: 3, 4, 16, 128>}, {transform_indices = @transform_11, window_bounds = array<i64: 3, 4, 16, 128>}, {transform_indices = @transform_12, window_bounds = array<i64: 4, 3, 256>}, {transform_indices = @transform_13, window_bounds = array<i64: 1, 7, 128>}]} {
    %c0 = arith.constant 0 : index
    %c0_0 = arith.constant 0 : index
    %0 = vector.load %arg1[%c0, %c0_0] : memref<8x256xf32, #tpu.memory_space<vmem>>, vector<8x256xf32>
    %c0_1 = arith.constant 0 : index
    %c0_2 = arith.constant 0 : index
    %1 = vector.load %arg2[%c0_1, %c0_2] : memref<256x8xf32, #tpu.memory_space<vmem>>, vector<256x8xf32>
    %c0_3 = arith.constant 0 : index
    %c0_4 = arith.constant 0 : index
    %c0_5 = arith.constant 0 : index
    %2 = vector.load %arg3[%c0_3, %c0_4, %c0_5] : memref<4x8x8xf32, #tpu.memory_space<vmem>>, vector<1x8x8xf32>
    %3 = vector.shape_cast %2 : vector<1x8x8xf32> to vector<8x8xf32>
    %cst = arith.constant dense<0.000000e+00> : vector<8x256xf32>
    %4 = tpu.matmul %3, %0, %cst {dimension_numbers = #tpu.dot_dimension_numbers<[1], [0], [0], [1], [0, 0, 1, 1], [], []>} : vector<8x8xf32>, vector<8x256xf32>, vector<8x256xf32> -> vector<8x256xf32>
    %c0_6 = arith.constant 0 : index
    %c0_7 = arith.constant 0 : index
    %c0_8 = arith.constant 0 : index
    %5 = vector.load %arg5[%c0_6, %c0_7, %c0_8] : memref<4x8x1xf32, #tpu.memory_space<vmem>>, vector<1x8x1xf32>
    %6 = vector.shape_cast %5 : vector<1x8x1xf32> to vector<8x1xf32>
    %7 = vector.broadcast %6 : vector<8x1xf32> to vector<8x256xf32>
    %8 = arith.addf %4, %7 : vector<8x256xf32>
    %c0_9 = arith.constant 0 : index
    %c0_10 = arith.constant 0 : index
    %c0_11 = arith.constant 0 : index
    %9 = vector.load %arg4[%c0_9, %c0_10, %c0_11] : memref<4x8x8xf32, #tpu.memory_space<vmem>>, vector<1x8x8xf32>
    %10 = vector.shape_cast %9 : vector<1x8x8xf32> to vector<8x8xf32>
    %cst_12 = arith.constant dense<0.000000e+00> : vector<256x8xf32>
    %11 = tpu.matmul %1, %10, %cst_12 {dimension_numbers = #tpu.dot_dimension_numbers<[1], [0], [0], [1], [0, 0, 1, 1], [], []>} : vector<256x8xf32>, vector<8x8xf32>, vector<256x8xf32> -> vector<256x8xf32>
    %c0_13 = arith.constant 0 : index
    %c0_14 = arith.constant 0 : index
    %c0_15 = arith.constant 0 : index
    %12 = vector.load %arg6[%c0_13, %c0_14, %c0_15] : memref<4x1x8xf32, #tpu.memory_space<vmem>>, vector<1x1x8xf32>
    %13 = vector.shape_cast %12 : vector<1x1x8xf32> to vector<1x8xf32>
    %14 = vector.broadcast %13 : vector<1x8xf32> to vector<256x8xf32>
    %15 = arith.addf %11, %14 : vector<256x8xf32>
    %16 = vector.extract_strided_slice %8 {offsets = [0, 0], sizes = [1, 256], strides = [1, 1]} : vector<8x256xf32> to vector<1x256xf32>
    %17 = vector.extract_strided_slice %8 {offsets = [1, 0], sizes = [1, 256], strides = [1, 1]} : vector<8x256xf32> to vector<1x256xf32>
    %18 = vector.extract_strided_slice %8 {offsets = [2, 0], sizes = [1, 256], strides = [1, 1]} : vector<8x256xf32> to vector<1x256xf32>
    %19 = tpu.reciprocal %18 {approx = true} : vector<1x256xf32> -> vector<1x256xf32>
    %20 = arith.mulf %16, %19 : vector<1x256xf32>
    %21 = arith.mulf %17, %19 : vector<1x256xf32>
    %cst_16 = arith.constant 0.000000e+00 : f32
    %22 = vector.broadcast %cst_16 : f32 to vector<1x256xf32>
    %23 = arith.subf %22, %21 : vector<1x256xf32>
    %24 = tpu.concatenate %20, %23, %18 in 0 : vector<1x256xf32>, vector<1x256xf32>, vector<1x256xf32> -> vector<3x256xf32>
    %c0_17 = arith.constant 0 : index
    %c0_18 = arith.constant 0 : index
    %c0_19 = arith.constant 0 : index
    %25 = vector.load %arg13[%c0_17, %c0_18, %c0_19] : memref<4x3x256xf32, #tpu.memory_space<vmem>>, vector<1x3x256xf32>
    %26 = vector.shape_cast %25 : vector<1x3x256xf32> to vector<3x256xf32>
    %27 = vector.shape_cast %24 : vector<3x256xf32> to vector<1x3x256xf32>
    tpu.vector_store %arg13[%c0_17, %c0_18, %c0_19], %27 {strides = array<i32>} : memref<4x3x256xf32, #tpu.memory_space<vmem>>, vector<1x3x256xf32>,
    %c0_20 = arith.constant 0 : index
    %c0_21 = arith.constant 0 : index
    %c0_22 = arith.constant 0 : index
    %28 = vector.load %arg7[%c0_20, %c0_21, %c0_22] : memref<4x8x256xf32, #tpu.memory_space<vmem>>, vector<1x8x256xf32>
    %29 = vector.shape_cast %28 : vector<1x8x256xf32> to vector<8x256xf32>
    %30 = arith.mulf %15, %15 : vector<256x8xf32>
    %cst_23 = arith.constant dense<0.000000e+00> : vector<256xf32>
    %31 = vector.multi_reduction <add>, %30, %cst_23 [1] : vector<256x8xf32> to vector<256xf32>
    %32 = vector.shape_cast %31 : vector<256xf32> to vector<256x1xf32>
    %33 = arith.mulf %29, %29 : vector<8x256xf32>
    %cst_24 = arith.constant dense<0.000000e+00> : vector<256xf32>
    %34 = vector.multi_reduction <add>, %33, %cst_24 [0] : vector<8x256xf32> to vector<256xf32>
    %35 = vector.shape_cast %34 : vector<256xf32> to vector<1x256xf32>
    %cst_25 = arith.constant dense<0.000000e+00> : vector<256x256xf32>
    %36 = tpu.matmul %15, %29, %cst_25 {dimension_numbers = #tpu.dot_dimension_numbers<[1], [0], [0], [1], [0, 0, 1, 1], [], []>} : vector<256x8xf32>, vector<8x256xf32>, vector<256x256xf32> -> vector<256x256xf32>
    %cst_26 = arith.constant 2.000000e+00 : f32
    %37 = vector.broadcast %cst_26 : f32 to vector<256x256xf32>
    %38 = arith.mulf %37, %36 : vector<256x256xf32>
    %39 = vector.broadcast %32 : vector<256x1xf32> to vector<256x256xf32>
    %40 = arith.subf %39, %38 : vector<256x256xf32>
    %cst_27 = arith.constant dense<0x7F800000> : vector<256xf32>
    %41 = vector.multi_reduction <minimumf>, %40, %cst_27 [0] : vector<256x256xf32> to vector<256xf32>
    %42 = vector.shape_cast %41 : vector<256xf32> to vector<1x256xf32>
    %43 = arith.addf %42, %35 : vector<1x256xf32>
    %cst_28 = arith.constant 0.000000e+00 : f32
    %44 = vector.broadcast %cst_28 : f32 to vector<1x256xf32>
    %45 = arith.maximumf %43, %44 : vector<1x256xf32>
    %46 = vector.shape_cast %45 : vector<1x256xf32> to vector<1x1x256xf32>
    %cst_29 = arith.constant dense<0.000000e+00> : vector<1xf32>
    %47 = vector.multi_reduction <add>, %46, %cst_29 [1, 2] : vector<1x1x256xf32> to vector<1xf32>
    %48 = vector.shape_cast %47 : vector<1xf32> to vector<1x1x1xf32>
    %49 = vector.extract %48[0, 0, 0] : f32 from vector<1x1x1xf32>
    %cst_30 = arith.constant 2.560000e+02 : f32
    %50 = arith.divf %49, %cst_30 : f32
    %cst_31 = arith.constant 0.000000e+00 : f32
    %51 = vector.broadcast %cst_31 : f32 to vector<1x128xf32>
    %52 = vector.broadcast %50 : f32 to vector<1x128xf32>
    %53 = arith.addf %52, %51 : vector<1x128xf32>
    %c0_32 = arith.constant 0 : index
    %c0_33 = arith.constant 0 : index
    %c0_34 = arith.constant 0 : index
    %54 = vector.load %arg14[%c0_32, %c0_33, %c0_34] : memref<1x7x128xf32, #tpu.memory_space<vmem>>, vector<1x1x128xf32>
    %55 = vector.shape_cast %54 : vector<1x1x128xf32> to vector<1x128xf32>
    %56 = vector.shape_cast %53 : vector<1x128xf32> to vector<1x1x128xf32>
    tpu.vector_store %arg14[%c0_32, %c0_33, %c0_34], %56 {strides = array<i32>} : memref<1x7x128xf32, #tpu.memory_space<vmem>>, vector<1x1x128xf32>,
    %c1 = arith.constant 1 : index
    %c0_35 = arith.constant 0 : index
    %c0_36 = arith.constant 0 : index
    %57 = vector.load %arg3[%c1, %c0_35, %c0_36] : memref<4x8x8xf32, #tpu.memory_space<vmem>>, vector<1x8x8xf32>
    %58 = vector.shape_cast %57 : vector<1x8x8xf32> to vector<8x8xf32>
    %cst_37 = arith.constant dense<0.000000e+00> : vector<8x256xf32>
    %59 = tpu.matmul %58, %0, %cst_37 {dimension_numbers = #tpu.dot_dimension_numbers<[1], [0], [0], [1], [0, 0, 1, 1], [], []>} : vector<8x8xf32>, vector<8x256xf32>, vector<8x256xf32> -> vector<8x256xf32>
    %c1_38 = arith.constant 1 : index
    %c0_39 = arith.constant 0 : index
    %c0_40 = arith.constant 0 : index
    %60 = vector.load %arg5[%c1_38, %c0_39, %c0_40] : memref<4x8x1xf32, #tpu.memory_space<vmem>>, vector<1x8x1xf32>
    %61 = vector.shape_cast %60 : vector<1x8x1xf32> to vector<8x1xf32>
    %62 = vector.broadcast %61 : vector<8x1xf32> to vector<8x256xf32>
    %63 = arith.addf %59, %62 : vector<8x256xf32>
    %c1_41 = arith.constant 1 : index
    %c0_42 = arith.constant 0 : index
    %c0_43 = arith.constant 0 : index
    %64 = vector.load %arg4[%c1_41, %c0_42, %c0_43] : memref<4x8x8xf32, #tpu.memory_space<vmem>>, vector<1x8x8xf32>
    %65 = vector.shape_cast %64 : vector<1x8x8xf32> to vector<8x8xf32>
    %cst_44 = arith.constant dense<0.000000e+00> : vector<256x8xf32>
    %66 = tpu.matmul %1, %65, %cst_44 {dimension_numbers = #tpu.dot_dimension_numbers<[1], [0], [0], [1], [0, 0, 1, 1], [], []>} : vector<256x8xf32>, vector<8x8xf32>, vector<256x8xf32> -> vector<256x8xf32>
    %c1_45 = arith.constant 1 : index
    %c0_46 = arith.constant 0 : index
    %c0_47 = arith.constant 0 : index
    %67 = vector.load %arg6[%c1_45, %c0_46, %c0_47] : memref<4x1x8xf32, #tpu.memory_space<vmem>>, vector<1x1x8xf32>
    %68 = vector.shape_cast %67 : vector<1x1x8xf32> to vector<1x8xf32>
    %69 = vector.broadcast %68 : vector<1x8xf32> to vector<256x8xf32>
    %70 = arith.addf %66, %69 : vector<256x8xf32>
    %71 = vector.extract_strided_slice %63 {offsets = [0, 0], sizes = [1, 256], strides = [1, 1]} : vector<8x256xf32> to vector<1x256xf32>
    %72 = vector.extract_strided_slice %63 {offsets = [1, 0], sizes = [1, 256], strides = [1, 1]} : vector<8x256xf32> to vector<1x256xf32>
    %73 = vector.extract_strided_slice %63 {offsets = [2, 0], sizes = [1, 256], strides = [1, 1]} : vector<8x256xf32> to vector<1x256xf32>
    %74 = tpu.reciprocal %73 {approx = true} : vector<1x256xf32> -> vector<1x256xf32>
    %75 = arith.mulf %71, %74 : vector<1x256xf32>
    %76 = arith.mulf %72, %74 : vector<1x256xf32>
    %cst_48 = arith.constant 0.000000e+00 : f32
    %77 = vector.broadcast %cst_48 : f32 to vector<1x256xf32>
    %78 = arith.subf %77, %76 : vector<1x256xf32>
    %79 = tpu.concatenate %75, %78, %73 in 0 : vector<1x256xf32>, vector<1x256xf32>, vector<1x256xf32> -> vector<3x256xf32>
    %c1_49 = arith.constant 1 : index
    %c0_50 = arith.constant 0 : index
    %c0_51 = arith.constant 0 : index
    %80 = vector.load %arg13[%c1_49, %c0_50, %c0_51] : memref<4x3x256xf32, #tpu.memory_space<vmem>>, vector<1x3x256xf32>
    %81 = vector.shape_cast %80 : vector<1x3x256xf32> to vector<3x256xf32>
    %82 = vector.shape_cast %79 : vector<3x256xf32> to vector<1x3x256xf32>
    tpu.vector_store %arg13[%c1_49, %c0_50, %c0_51], %82 {strides = array<i32>} : memref<4x3x256xf32, #tpu.memory_space<vmem>>, vector<1x3x256xf32>,
    %c1_52 = arith.constant 1 : index
    %c0_53 = arith.constant 0 : index
    %c0_54 = arith.constant 0 : index
    %83 = vector.load %arg7[%c1_52, %c0_53, %c0_54] : memref<4x8x256xf32, #tpu.memory_space<vmem>>, vector<1x8x256xf32>
    %84 = vector.shape_cast %83 : vector<1x8x256xf32> to vector<8x256xf32>
    %85 = arith.mulf %70, %70 : vector<256x8xf32>
    %cst_55 = arith.constant dense<0.000000e+00> : vector<256xf32>
    %86 = vector.multi_reduction <add>, %85, %cst_55 [1] : vector<256x8xf32> to vector<256xf32>
    %87 = vector.shape_cast %86 : vector<256xf32> to vector<256x1xf32>
    %88 = arith.mulf %84, %84 : vector<8x256xf32>
    %cst_56 = arith.constant dense<0.000000e+00> : vector<256xf32>
    %89 = vector.multi_reduction <add>, %88, %cst_56 [0] : vector<8x256xf32> to vector<256xf32>
    %90 = vector.shape_cast %89 : vector<256xf32> to vector<1x256xf32>
    %cst_57 = arith.constant dense<0.000000e+00> : vector<256x256xf32>
    %91 = tpu.matmul %70, %84, %cst_57 {dimension_numbers = #tpu.dot_dimension_numbers<[1], [0], [0], [1], [0, 0, 1, 1], [], []>} : vector<256x8xf32>, vector<8x256xf32>, vector<256x256xf32> -> vector<256x256xf32>
    %cst_58 = arith.constant 2.000000e+00 : f32
    %92 = vector.broadcast %cst_58 : f32 to vector<256x256xf32>
    %93 = arith.mulf %92, %91 : vector<256x256xf32>
    %94 = vector.broadcast %87 : vector<256x1xf32> to vector<256x256xf32>
    %95 = arith.subf %94, %93 : vector<256x256xf32>
    %cst_59 = arith.constant dense<0x7F800000> : vector<256xf32>
    %96 = vector.multi_reduction <minimumf>, %95, %cst_59 [0] : vector<256x256xf32> to vector<256xf32>
    %97 = vector.shape_cast %96 : vector<256xf32> to vector<1x256xf32>
    %98 = arith.addf %97, %90 : vector<1x256xf32>
    %cst_60 = arith.constant 0.000000e+00 : f32
    %99 = vector.broadcast %cst_60 : f32 to vector<1x256xf32>
    %100 = arith.maximumf %98, %99 : vector<1x256xf32>
    %101 = vector.shape_cast %100 : vector<1x256xf32> to vector<1x1x256xf32>
    %cst_61 = arith.constant dense<0.000000e+00> : vector<1xf32>
    %102 = vector.multi_reduction <add>, %101, %cst_61 [1, 2] : vector<1x1x256xf32> to vector<1xf32>
    %103 = vector.shape_cast %102 : vector<1xf32> to vector<1x1x1xf32>
    %104 = vector.extract %103[0, 0, 0] : f32 from vector<1x1x1xf32>
    %cst_62 = arith.constant 2.560000e+02 : f32
    %105 = arith.divf %104, %cst_62 : f32
    %cst_63 = arith.constant 0.000000e+00 : f32
    %106 = vector.broadcast %cst_63 : f32 to vector<1x128xf32>
    %107 = vector.broadcast %105 : f32 to vector<1x128xf32>
    %108 = arith.addf %107, %106 : vector<1x128xf32>
    %c0_64 = arith.constant 0 : index
    %c1_65 = arith.constant 1 : index
    %c0_66 = arith.constant 0 : index
    %109 = vector.load %arg14[%c0_64, %c1_65, %c0_66] : memref<1x7x128xf32, #tpu.memory_space<vmem>>, vector<1x1x128xf32>
    %110 = vector.shape_cast %109 : vector<1x1x128xf32> to vector<1x128xf32>
    %111 = vector.shape_cast %108 : vector<1x128xf32> to vector<1x1x128xf32>
    tpu.vector_store %arg14[%c0_64, %c1_65, %c0_66], %111 {strides = array<i32>} : memref<1x7x128xf32, #tpu.memory_space<vmem>>, vector<1x1x128xf32>,
    %c2 = arith.constant 2 : index
    %c0_67 = arith.constant 0 : index
    %c0_68 = arith.constant 0 : index
    %112 = vector.load %arg3[%c2, %c0_67, %c0_68] : memref<4x8x8xf32, #tpu.memory_space<vmem>>, vector<1x8x8xf32>
    %113 = vector.shape_cast %112 : vector<1x8x8xf32> to vector<8x8xf32>
    %cst_69 = arith.constant dense<0.000000e+00> : vector<8x256xf32>
    %114 = tpu.matmul %113, %0, %cst_69 {dimension_numbers = #tpu.dot_dimension_numbers<[1], [0], [0], [1], [0, 0, 1, 1], [], []>} : vector<8x8xf32>, vector<8x256xf32>, vector<8x256xf32> -> vector<8x256xf32>
    %c2_70 = arith.constant 2 : index
    %c0_71 = arith.constant 0 : index
    %c0_72 = arith.constant 0 : index
    %115 = vector.load %arg5[%c2_70, %c0_71, %c0_72] : memref<4x8x1xf32, #tpu.memory_space<vmem>>, vector<1x8x1xf32>
    %116 = vector.shape_cast %115 : vector<1x8x1xf32> to vector<8x1xf32>
    %117 = vector.broadcast %116 : vector<8x1xf32> to vector<8x256xf32>
    %118 = arith.addf %114, %117 : vector<8x256xf32>
    %c2_73 = arith.constant 2 : index
    %c0_74 = arith.constant 0 : index
    %c0_75 = arith.constant 0 : index
    %119 = vector.load %arg4[%c2_73, %c0_74, %c0_75] : memref<4x8x8xf32, #tpu.memory_space<vmem>>, vector<1x8x8xf32>
    %120 = vector.shape_cast %119 : vector<1x8x8xf32> to vector<8x8xf32>
    %cst_76 = arith.constant dense<0.000000e+00> : vector<256x8xf32>
    %121 = tpu.matmul %1, %120, %cst_76 {dimension_numbers = #tpu.dot_dimension_numbers<[1], [0], [0], [1], [0, 0, 1, 1], [], []>} : vector<256x8xf32>, vector<8x8xf32>, vector<256x8xf32> -> vector<256x8xf32>
    %c2_77 = arith.constant 2 : index
    %c0_78 = arith.constant 0 : index
    %c0_79 = arith.constant 0 : index
    %122 = vector.load %arg6[%c2_77, %c0_78, %c0_79] : memref<4x1x8xf32, #tpu.memory_space<vmem>>, vector<1x1x8xf32>
    %123 = vector.shape_cast %122 : vector<1x1x8xf32> to vector<1x8xf32>
    %124 = vector.broadcast %123 : vector<1x8xf32> to vector<256x8xf32>
    %125 = arith.addf %121, %124 : vector<256x8xf32>
    %126 = vector.extract_strided_slice %118 {offsets = [0, 0], sizes = [1, 256], strides = [1, 1]} : vector<8x256xf32> to vector<1x256xf32>
    %127 = vector.extract_strided_slice %118 {offsets = [1, 0], sizes = [1, 256], strides = [1, 1]} : vector<8x256xf32> to vector<1x256xf32>
    %128 = vector.extract_strided_slice %118 {offsets = [2, 0], sizes = [1, 256], strides = [1, 1]} : vector<8x256xf32> to vector<1x256xf32>
    %129 = tpu.reciprocal %128 {approx = true} : vector<1x256xf32> -> vector<1x256xf32>
    %130 = arith.mulf %126, %129 : vector<1x256xf32>
    %131 = arith.mulf %127, %129 : vector<1x256xf32>
    %cst_80 = arith.constant 0.000000e+00 : f32
    %132 = vector.broadcast %cst_80 : f32 to vector<1x256xf32>
    %133 = arith.subf %132, %131 : vector<1x256xf32>
    %134 = tpu.concatenate %130, %133, %128 in 0 : vector<1x256xf32>, vector<1x256xf32>, vector<1x256xf32> -> vector<3x256xf32>
    %c2_81 = arith.constant 2 : index
    %c0_82 = arith.constant 0 : index
    %c0_83 = arith.constant 0 : index
    %135 = vector.load %arg13[%c2_81, %c0_82, %c0_83] : memref<4x3x256xf32, #tpu.memory_space<vmem>>, vector<1x3x256xf32>
    %136 = vector.shape_cast %135 : vector<1x3x256xf32> to vector<3x256xf32>
    %137 = vector.shape_cast %134 : vector<3x256xf32> to vector<1x3x256xf32>
    tpu.vector_store %arg13[%c2_81, %c0_82, %c0_83], %137 {strides = array<i32>} : memref<4x3x256xf32, #tpu.memory_space<vmem>>, vector<1x3x256xf32>,
    %c2_84 = arith.constant 2 : index
    %c0_85 = arith.constant 0 : index
    %c0_86 = arith.constant 0 : index
    %138 = vector.load %arg7[%c2_84, %c0_85, %c0_86] : memref<4x8x256xf32, #tpu.memory_space<vmem>>, vector<1x8x256xf32>
    %139 = vector.shape_cast %138 : vector<1x8x256xf32> to vector<8x256xf32>
    %140 = arith.mulf %125, %125 : vector<256x8xf32>
    %cst_87 = arith.constant dense<0.000000e+00> : vector<256xf32>
    %141 = vector.multi_reduction <add>, %140, %cst_87 [1] : vector<256x8xf32> to vector<256xf32>
    %142 = vector.shape_cast %141 : vector<256xf32> to vector<256x1xf32>
    %143 = arith.mulf %139, %139 : vector<8x256xf32>
    %cst_88 = arith.constant dense<0.000000e+00> : vector<256xf32>
    %144 = vector.multi_reduction <add>, %143, %cst_88 [0] : vector<8x256xf32> to vector<256xf32>
    %145 = vector.shape_cast %144 : vector<256xf32> to vector<1x256xf32>
    %cst_89 = arith.constant dense<0.000000e+00> : vector<256x256xf32>
    %146 = tpu.matmul %125, %139, %cst_89 {dimension_numbers = #tpu.dot_dimension_numbers<[1], [0], [0], [1], [0, 0, 1, 1], [], []>} : vector<256x8xf32>, vector<8x256xf32>, vector<256x256xf32> -> vector<256x256xf32>
    %cst_90 = arith.constant 2.000000e+00 : f32
    %147 = vector.broadcast %cst_90 : f32 to vector<256x256xf32>
    %148 = arith.mulf %147, %146 : vector<256x256xf32>
    %149 = vector.broadcast %142 : vector<256x1xf32> to vector<256x256xf32>
    %150 = arith.subf %149, %148 : vector<256x256xf32>
    %cst_91 = arith.constant dense<0x7F800000> : vector<256xf32>
    %151 = vector.multi_reduction <minimumf>, %150, %cst_91 [0] : vector<256x256xf32> to vector<256xf32>
    %152 = vector.shape_cast %151 : vector<256xf32> to vector<1x256xf32>
    %153 = arith.addf %152, %145 : vector<1x256xf32>
    %cst_92 = arith.constant 0.000000e+00 : f32
    %154 = vector.broadcast %cst_92 : f32 to vector<1x256xf32>
    %155 = arith.maximumf %153, %154 : vector<1x256xf32>
    %156 = vector.shape_cast %155 : vector<1x256xf32> to vector<1x1x256xf32>
    %cst_93 = arith.constant dense<0.000000e+00> : vector<1xf32>
    %157 = vector.multi_reduction <add>, %156, %cst_93 [1, 2] : vector<1x1x256xf32> to vector<1xf32>
    %158 = vector.shape_cast %157 : vector<1xf32> to vector<1x1x1xf32>
    %159 = vector.extract %158[0, 0, 0] : f32 from vector<1x1x1xf32>
    %cst_94 = arith.constant 2.560000e+02 : f32
    %160 = arith.divf %159, %cst_94 : f32
    %cst_95 = arith.constant 0.000000e+00 : f32
    %161 = vector.broadcast %cst_95 : f32 to vector<1x128xf32>
    %162 = vector.broadcast %160 : f32 to vector<1x128xf32>
    %163 = arith.addf %162, %161 : vector<1x128xf32>
    %c0_96 = arith.constant 0 : index
    %c2_97 = arith.constant 2 : index
    %c0_98 = arith.constant 0 : index
    %164 = vector.load %arg14[%c0_96, %c2_97, %c0_98] : memref<1x7x128xf32, #tpu.memory_space<vmem>>, vector<1x1x128xf32>
    %165 = vector.shape_cast %164 : vector<1x1x128xf32> to vector<1x128xf32>
    %166 = vector.shape_cast %163 : vector<1x128xf32> to vector<1x1x128xf32>
    tpu.vector_store %arg14[%c0_96, %c2_97, %c0_98], %166 {strides = array<i32>} : memref<1x7x128xf32, #tpu.memory_space<vmem>>, vector<1x1x128xf32>,
    %c3 = arith.constant 3 : index
    %c0_99 = arith.constant 0 : index
    %c0_100 = arith.constant 0 : index
    %167 = vector.load %arg3[%c3, %c0_99, %c0_100] : memref<4x8x8xf32, #tpu.memory_space<vmem>>, vector<1x8x8xf32>
    %168 = vector.shape_cast %167 : vector<1x8x8xf32> to vector<8x8xf32>
    %cst_101 = arith.constant dense<0.000000e+00> : vector<8x256xf32>
    %169 = tpu.matmul %168, %0, %cst_101 {dimension_numbers = #tpu.dot_dimension_numbers<[1], [0], [0], [1], [0, 0, 1, 1], [], []>} : vector<8x8xf32>, vector<8x256xf32>, vector<8x256xf32> -> vector<8x256xf32>
    %c3_102 = arith.constant 3 : index
    %c0_103 = arith.constant 0 : index
    %c0_104 = arith.constant 0 : index
    %170 = vector.load %arg5[%c3_102, %c0_103, %c0_104] : memref<4x8x1xf32, #tpu.memory_space<vmem>>, vector<1x8x1xf32>
    %171 = vector.shape_cast %170 : vector<1x8x1xf32> to vector<8x1xf32>
    %172 = vector.broadcast %171 : vector<8x1xf32> to vector<8x256xf32>
    %173 = arith.addf %169, %172 : vector<8x256xf32>
    %c3_105 = arith.constant 3 : index
    %c0_106 = arith.constant 0 : index
    %c0_107 = arith.constant 0 : index
    %174 = vector.load %arg4[%c3_105, %c0_106, %c0_107] : memref<4x8x8xf32, #tpu.memory_space<vmem>>, vector<1x8x8xf32>
    %175 = vector.shape_cast %174 : vector<1x8x8xf32> to vector<8x8xf32>
    %cst_108 = arith.constant dense<0.000000e+00> : vector<256x8xf32>
    %176 = tpu.matmul %1, %175, %cst_108 {dimension_numbers = #tpu.dot_dimension_numbers<[1], [0], [0], [1], [0, 0, 1, 1], [], []>} : vector<256x8xf32>, vector<8x8xf32>, vector<256x8xf32> -> vector<256x8xf32>
    %c3_109 = arith.constant 3 : index
    %c0_110 = arith.constant 0 : index
    %c0_111 = arith.constant 0 : index
    %177 = vector.load %arg6[%c3_109, %c0_110, %c0_111] : memref<4x1x8xf32, #tpu.memory_space<vmem>>, vector<1x1x8xf32>
    %178 = vector.shape_cast %177 : vector<1x1x8xf32> to vector<1x8xf32>
    %179 = vector.broadcast %178 : vector<1x8xf32> to vector<256x8xf32>
    %180 = arith.addf %176, %179 : vector<256x8xf32>
    %181 = vector.extract_strided_slice %173 {offsets = [0, 0], sizes = [1, 256], strides = [1, 1]} : vector<8x256xf32> to vector<1x256xf32>
    %182 = vector.extract_strided_slice %173 {offsets = [1, 0], sizes = [1, 256], strides = [1, 1]} : vector<8x256xf32> to vector<1x256xf32>
    %183 = vector.extract_strided_slice %173 {offsets = [2, 0], sizes = [1, 256], strides = [1, 1]} : vector<8x256xf32> to vector<1x256xf32>
    %184 = tpu.reciprocal %183 {approx = true} : vector<1x256xf32> -> vector<1x256xf32>
    %185 = arith.mulf %181, %184 : vector<1x256xf32>
    %186 = arith.mulf %182, %184 : vector<1x256xf32>
    %cst_112 = arith.constant 0.000000e+00 : f32
    %187 = vector.broadcast %cst_112 : f32 to vector<1x256xf32>
    %188 = arith.subf %187, %186 : vector<1x256xf32>
    %189 = tpu.concatenate %185, %188, %183 in 0 : vector<1x256xf32>, vector<1x256xf32>, vector<1x256xf32> -> vector<3x256xf32>
    %c3_113 = arith.constant 3 : index
    %c0_114 = arith.constant 0 : index
    %c0_115 = arith.constant 0 : index
    %190 = vector.load %arg13[%c3_113, %c0_114, %c0_115] : memref<4x3x256xf32, #tpu.memory_space<vmem>>, vector<1x3x256xf32>
    %191 = vector.shape_cast %190 : vector<1x3x256xf32> to vector<3x256xf32>
    %192 = vector.shape_cast %189 : vector<3x256xf32> to vector<1x3x256xf32>
    tpu.vector_store %arg13[%c3_113, %c0_114, %c0_115], %192 {strides = array<i32>} : memref<4x3x256xf32, #tpu.memory_space<vmem>>, vector<1x3x256xf32>,
    %c3_116 = arith.constant 3 : index
    %c0_117 = arith.constant 0 : index
    %c0_118 = arith.constant 0 : index
    %193 = vector.load %arg7[%c3_116, %c0_117, %c0_118] : memref<4x8x256xf32, #tpu.memory_space<vmem>>, vector<1x8x256xf32>
    %194 = vector.shape_cast %193 : vector<1x8x256xf32> to vector<8x256xf32>
    %195 = arith.mulf %180, %180 : vector<256x8xf32>
    %cst_119 = arith.constant dense<0.000000e+00> : vector<256xf32>
    %196 = vector.multi_reduction <add>, %195, %cst_119 [1] : vector<256x8xf32> to vector<256xf32>
    %197 = vector.shape_cast %196 : vector<256xf32> to vector<256x1xf32>
    %198 = arith.mulf %194, %194 : vector<8x256xf32>
    %cst_120 = arith.constant dense<0.000000e+00> : vector<256xf32>
    %199 = vector.multi_reduction <add>, %198, %cst_120 [0] : vector<8x256xf32> to vector<256xf32>
    %200 = vector.shape_cast %199 : vector<256xf32> to vector<1x256xf32>
    %cst_121 = arith.constant dense<0.000000e+00> : vector<256x256xf32>
    %201 = tpu.matmul %180, %194, %cst_121 {dimension_numbers = #tpu.dot_dimension_numbers<[1], [0], [0], [1], [0, 0, 1, 1], [], []>} : vector<256x8xf32>, vector<8x256xf32>, vector<256x256xf32> -> vector<256x256xf32>
    %cst_122 = arith.constant 2.000000e+00 : f32
    %202 = vector.broadcast %cst_122 : f32 to vector<256x256xf32>
    %203 = arith.mulf %202, %201 : vector<256x256xf32>
    %204 = vector.broadcast %197 : vector<256x1xf32> to vector<256x256xf32>
    %205 = arith.subf %204, %203 : vector<256x256xf32>
    %cst_123 = arith.constant dense<0x7F800000> : vector<256xf32>
    %206 = vector.multi_reduction <minimumf>, %205, %cst_123 [0] : vector<256x256xf32> to vector<256xf32>
    %207 = vector.shape_cast %206 : vector<256xf32> to vector<1x256xf32>
    %208 = arith.addf %207, %200 : vector<1x256xf32>
    %cst_124 = arith.constant 0.000000e+00 : f32
    %209 = vector.broadcast %cst_124 : f32 to vector<1x256xf32>
    %210 = arith.maximumf %208, %209 : vector<1x256xf32>
    %211 = vector.shape_cast %210 : vector<1x256xf32> to vector<1x1x256xf32>
    %cst_125 = arith.constant dense<0.000000e+00> : vector<1xf32>
    %212 = vector.multi_reduction <add>, %211, %cst_125 [1, 2] : vector<1x1x256xf32> to vector<1xf32>
    %213 = vector.shape_cast %212 : vector<1xf32> to vector<1x1x1xf32>
    %214 = vector.extract %213[0, 0, 0] : f32 from vector<1x1x1xf32>
    %cst_126 = arith.constant 2.560000e+02 : f32
    %215 = arith.divf %214, %cst_126 : f32
    %cst_127 = arith.constant 0.000000e+00 : f32
    %216 = vector.broadcast %cst_127 : f32 to vector<1x128xf32>
    %217 = vector.broadcast %215 : f32 to vector<1x128xf32>
    %218 = arith.addf %217, %216 : vector<1x128xf32>
    %c0_128 = arith.constant 0 : index
    %c3_129 = arith.constant 3 : index
    %c0_130 = arith.constant 0 : index
    %219 = vector.load %arg14[%c0_128, %c3_129, %c0_130] : memref<1x7x128xf32, #tpu.memory_space<vmem>>, vector<1x1x128xf32>
    %220 = vector.shape_cast %219 : vector<1x1x128xf32> to vector<1x128xf32>
    %221 = vector.shape_cast %218 : vector<1x128xf32> to vector<1x1x128xf32>
    tpu.vector_store %arg14[%c0_128, %c3_129, %c0_130], %221 {strides = array<i32>} : memref<1x7x128xf32, #tpu.memory_space<vmem>>, vector<1x1x128xf32>,
    %c0_131 = arith.constant 0 : index
    %c0_132 = arith.constant 0 : index
    %c0_133 = arith.constant 0 : index
    %222 = vector.load %arg8[%c0_131, %c0_132, %c0_133] : memref<4x16x128xf32, #tpu.memory_space<vmem>>, vector<4x16x128xf32>
    %223 = vector.shape_cast %222 : vector<4x16x128xf32> to vector<64x128xf32>
    %c0_134 = arith.constant 0 : index
    %c0_135 = arith.constant 0 : index
    %c0_136 = arith.constant 0 : index
    %224 = vector.load %arg9[%c0_134, %c0_135, %c0_136] : memref<4x16x128xf32, #tpu.memory_space<vmem>>, vector<4x16x128xf32>
    %225 = vector.shape_cast %224 : vector<4x16x128xf32> to vector<64x128xf32>
    %c0_137 = arith.constant 0 : index
    %c0_138 = arith.constant 0 : index
    %c0_139 = arith.constant 0 : index
    %c0_140 = arith.constant 0 : index
    %226 = vector.load %arg10[%c0_137, %c0_138, %c0_139, %c0_140] : memref<3x4x16x128xf32, #tpu.memory_space<vmem>>, vector<1x4x16x128xf32>
    %227 = vector.shape_cast %226 : vector<1x4x16x128xf32> to vector<4x16x128xf32>
    %228 = vector.shape_cast %227 : vector<4x16x128xf32> to vector<64x128xf32>
    %229 = arith.mulf %223, %228 : vector<64x128xf32>
    %230 = arith.mulf %229, %225 : vector<64x128xf32>
    %231 = arith.addf %229, %225 : vector<64x128xf32>
    %232 = math.absf %230 : vector<64x128xf32>
    %233 = vector.shape_cast %232 : vector<64x128xf32> to vector<1x64x128xf32>
    %cst_141 = arith.constant dense<0.000000e+00> : vector<1xf32>
    %234 = vector.multi_reduction <add>, %233, %cst_141 [1, 2] : vector<1x64x128xf32> to vector<1xf32>
    %235 = vector.shape_cast %234 : vector<1xf32> to vector<1x1x1xf32>
    %236 = vector.extract %235[0, 0, 0] : f32 from vector<1x1x1xf32>
    %237 = arith.subf %231, %230 : vector<64x128xf32>
    %238 = math.absf %237 : vector<64x128xf32>
    %239 = vector.shape_cast %238 : vector<64x128xf32> to vector<1x64x128xf32>
    %cst_142 = arith.constant dense<0.000000e+00> : vector<1xf32>
    %240 = vector.multi_reduction <add>, %239, %cst_142 [1, 2] : vector<1x64x128xf32> to vector<1xf32>
    %241 = vector.shape_cast %240 : vector<1xf32> to vector<1x1x1xf32>
    %242 = vector.extract %241[0, 0, 0] : f32 from vector<1x1x1xf32>
    %cst_143 = arith.constant 5.000000e-01 : f32
    %243 = vector.broadcast %cst_143 : f32 to vector<64x128xf32>
    %244 = arith.cmpf ogt, %223, %243 : vector<64x128xf32>
    %245 = arith.extui %244 : vector<64x128xi1> to vector<64x128xi32>
    %246 = arith.sitofp %245 : vector<64x128xi32> to vector<64x128xf32>
    %247 = tpu.concatenate %246, %246, %246 in 0 : vector<64x128xf32>, vector<64x128xf32>, vector<64x128xf32> -> vector<192x128xf32>
    %c0_144 = arith.constant 0 : index
    %c0_145 = arith.constant 0 : index
    %c0_146 = arith.constant 0 : index
    %c0_147 = arith.constant 0 : index
    %248 = vector.load %arg11[%c0_144, %c0_145, %c0_146, %c0_147] : memref<3x4x16x128xf32, #tpu.memory_space<vmem>>, vector<3x4x16x128xf32>
    %249 = vector.shape_cast %248 : vector<3x4x16x128xf32> to vector<192x128xf32>
    %c0_148 = arith.constant 0 : index
    %c0_149 = arith.constant 0 : index
    %c0_150 = arith.constant 0 : index
    %c0_151 = arith.constant 0 : index
    %250 = vector.load %arg12[%c0_148, %c0_149, %c0_150, %c0_151] : memref<3x4x16x128xf32, #tpu.memory_space<vmem>>, vector<3x4x16x128xf32>
    %251 = vector.shape_cast %250 : vector<3x4x16x128xf32> to vector<192x128xf32>
    %c0_152 = arith.constant 0 : index
    %c0_153 = arith.constant 0 : index
    %c0_154 = arith.constant 0 : index
    %c0_155 = arith.constant 0 : index
    %252 = vector.load %arg10[%c0_152, %c0_153, %c0_154, %c0_155] : memref<3x4x16x128xf32, #tpu.memory_space<vmem>>, vector<3x4x16x128xf32>
    %253 = vector.shape_cast %252 : vector<3x4x16x128xf32> to vector<192x128xf32>
    %254 = arith.mulf %251, %247 : vector<192x128xf32>
    %255 = arith.subf %249, %254 : vector<192x128xf32>
    %256 = math.absf %255 : vector<192x128xf32>
    %257 = arith.mulf %256, %253 : vector<192x128xf32>
    %258 = vector.shape_cast %257 : vector<192x128xf32> to vector<1x192x128xf32>
    %cst_156 = arith.constant dense<0.000000e+00> : vector<1xf32>
    %259 = vector.multi_reduction <add>, %258, %cst_156 [1, 2] : vector<1x192x128xf32> to vector<1xf32>
    %260 = vector.shape_cast %259 : vector<1xf32> to vector<1x1x1xf32>
    %261 = vector.extract %260[0, 0, 0] : f32 from vector<1x1x1xf32>
    %cst_157 = arith.constant 0.000000e+00 : f32
    %262 = vector.broadcast %cst_157 : f32 to vector<1x128xf32>
    %263 = vector.broadcast %236 : f32 to vector<1x128xf32>
    %264 = arith.addf %263, %262 : vector<1x128xf32>
    %c0_158 = arith.constant 0 : index
    %c4 = arith.constant 4 : index
    %c0_159 = arith.constant 0 : index
    %265 = vector.load %arg14[%c0_158, %c4, %c0_159] : memref<1x7x128xf32, #tpu.memory_space<vmem>>, vector<1x1x128xf32>
    %266 = vector.shape_cast %265 : vector<1x1x128xf32> to vector<1x128xf32>
    %267 = vector.shape_cast %264 : vector<1x128xf32> to vector<1x1x128xf32>
    tpu.vector_store %arg14[%c0_158, %c4, %c0_159], %267 {strides = array<i32>} : memref<1x7x128xf32, #tpu.memory_space<vmem>>, vector<1x1x128xf32>,
    %cst_160 = arith.constant 0.000000e+00 : f32
    %268 = vector.broadcast %cst_160 : f32 to vector<1x128xf32>
    %269 = vector.broadcast %242 : f32 to vector<1x128xf32>
    %270 = arith.addf %269, %268 : vector<1x128xf32>
    %c0_161 = arith.constant 0 : index
    %c5 = arith.constant 5 : index
    %c0_162 = arith.constant 0 : index
    %271 = vector.load %arg14[%c0_161, %c5, %c0_162] : memref<1x7x128xf32, #tpu.memory_space<vmem>>, vector<1x1x128xf32>
    %272 = vector.shape_cast %271 : vector<1x1x128xf32> to vector<1x128xf32>
    %273 = vector.shape_cast %270 : vector<1x128xf32> to vector<1x1x128xf32>
    tpu.vector_store %arg14[%c0_161, %c5, %c0_162], %273 {strides = array<i32>} : memref<1x7x128xf32, #tpu.memory_space<vmem>>, vector<1x1x128xf32>,
    %cst_163 = arith.constant 0.000000e+00 : f32
    %274 = vector.broadcast %cst_163 : f32 to vector<1x128xf32>
    %275 = vector.broadcast %261 : f32 to vector<1x128xf32>
    %276 = arith.addf %275, %274 : vector<1x128xf32>
    %c0_164 = arith.constant 0 : index
    %c6 = arith.constant 6 : index
    %c0_165 = arith.constant 0 : index
    %277 = vector.load %arg14[%c0_164, %c6, %c0_165] : memref<1x7x128xf32, #tpu.memory_space<vmem>>, vector<1x1x128xf32>
    %278 = vector.shape_cast %277 : vector<1x1x128xf32> to vector<1x128xf32>
    %279 = vector.shape_cast %276 : vector<1x128xf32> to vector<1x1x128xf32>
    tpu.vector_store %arg14[%c0_164, %c6, %c0_165], %279 {strides = array<i32>} : memref<1x7x128xf32, #tpu.memory_space<vmem>>, vector<1x1x128xf32>,
    return
  }
  func.func @transform_0(%arg0: i32) -> (i32, i32) {
    %c0_i32 = arith.constant 0 : i32
    %c0_i32_0 = arith.constant 0 : i32
    %c0_i32_1 = arith.constant 0 : i32
    return %c0_i32, %c0_i32_0 : i32, i32
  }
  func.func @transform_1(%arg0: i32) -> (i32, i32) {
    %c0_i32 = arith.constant 0 : i32
    %c0_i32_0 = arith.constant 0 : i32
    %c0_i32_1 = arith.constant 0 : i32
    return %c0_i32, %c0_i32_0 : i32, i32
  }
  func.func @transform_2(%arg0: i32) -> (i32, i32, i32) {
    %c0_i32 = arith.constant 0 : i32
    %c0_i32_0 = arith.constant 0 : i32
    %c0_i32_1 = arith.constant 0 : i32
    return %arg0, %c0_i32, %c0_i32_0 : i32, i32, i32
  }
  func.func @transform_3(%arg0: i32) -> (i32, i32, i32) {
    %c0_i32 = arith.constant 0 : i32
    %c0_i32_0 = arith.constant 0 : i32
    %c0_i32_1 = arith.constant 0 : i32
    return %arg0, %c0_i32, %c0_i32_0 : i32, i32, i32
  }
  func.func @transform_4(%arg0: i32) -> (i32, i32, i32) {
    %c0_i32 = arith.constant 0 : i32
    %c0_i32_0 = arith.constant 0 : i32
    %c0_i32_1 = arith.constant 0 : i32
    return %arg0, %c0_i32, %c0_i32_0 : i32, i32, i32
  }
  func.func @transform_5(%arg0: i32) -> (i32, i32, i32) {
    %c0_i32 = arith.constant 0 : i32
    %c0_i32_0 = arith.constant 0 : i32
    %c0_i32_1 = arith.constant 0 : i32
    return %arg0, %c0_i32, %c0_i32_0 : i32, i32, i32
  }
  func.func @transform_6(%arg0: i32) -> (i32, i32, i32) {
    %c0_i32 = arith.constant 0 : i32
    %c0_i32_0 = arith.constant 0 : i32
    %c0_i32_1 = arith.constant 0 : i32
    return %arg0, %c0_i32, %c0_i32_0 : i32, i32, i32
  }
  func.func @transform_7(%arg0: i32) -> (i32, i32, i32) {
    %c0_i32 = arith.constant 0 : i32
    %c0_i32_0 = arith.constant 0 : i32
    %c0_i32_1 = arith.constant 0 : i32
    return %arg0, %c0_i32, %c0_i32_0 : i32, i32, i32
  }
  func.func @transform_8(%arg0: i32) -> (i32, i32, i32) {
    %c0_i32 = arith.constant 0 : i32
    %c0_i32_0 = arith.constant 0 : i32
    %c0_i32_1 = arith.constant 0 : i32
    return %arg0, %c0_i32, %c0_i32_0 : i32, i32, i32
  }
  func.func @transform_9(%arg0: i32) -> (i32, i32, i32, i32) {
    %c0_i32 = arith.constant 0 : i32
    %c0_i32_0 = arith.constant 0 : i32
    %c0_i32_1 = arith.constant 0 : i32
    %c0_i32_2 = arith.constant 0 : i32
    return %c0_i32, %arg0, %c0_i32_0, %c0_i32_1 : i32, i32, i32, i32
  }
  func.func @transform_10(%arg0: i32) -> (i32, i32, i32, i32) {
    %c0_i32 = arith.constant 0 : i32
    %c0_i32_0 = arith.constant 0 : i32
    %c0_i32_1 = arith.constant 0 : i32
    %c0_i32_2 = arith.constant 0 : i32
    return %c0_i32, %arg0, %c0_i32_0, %c0_i32_1 : i32, i32, i32, i32
  }
  func.func @transform_11(%arg0: i32) -> (i32, i32, i32, i32) {
    %c0_i32 = arith.constant 0 : i32
    %c0_i32_0 = arith.constant 0 : i32
    %c0_i32_1 = arith.constant 0 : i32
    %c0_i32_2 = arith.constant 0 : i32
    return %c0_i32, %arg0, %c0_i32_0, %c0_i32_1 : i32, i32, i32, i32
  }
  func.func @transform_12(%arg0: i32) -> (i32, i32, i32) {
    %c0_i32 = arith.constant 0 : i32
    %c0_i32_0 = arith.constant 0 : i32
    %c0_i32_1 = arith.constant 0 : i32
    return %arg0, %c0_i32, %c0_i32_0 : i32, i32, i32
  }
  func.func @transform_13(%arg0: i32) -> (i32, i32, i32) {
    %c0_i32 = arith.constant 0 : i32
    %c0_i32_0 = arith.constant 0 : i32
    %c0_i32_1 = arith.constant 0 : i32
    return %arg0, %c0_i32, %c0_i32_0 : i32, i32, i32
  }
}

</mosaic_0001>

<bundles_post_ra>
// kernel: tpu_custom_call.1
= control target key start
LH: loop header
LB: loop body
LE: loop exit
PB: predicated region body
PF: predicated region fallthrough
CT: control target
= control target key end

     0   :  { %s9921_s0 = inlined_call_operand.hbm [shape: f32[8,256], index: 0, kind: input, shape index: {}]   ;;  %s9922_s1 = inlined_call_operand.vmem [shape: f32[256,8], index: 1, kind: input, shape index: {}]   ;;  %s9923_s2 = inlined_call_operand.vmem [shape: f32[8,8,8], index: 2, kind: input, shape index: {}]   ;;  %s9924_s3 = inlined_call_operand.hbm [shape: f32[8,8,8], index: 3, kind: input, shape index: {}]   ;;  %s9925_s4 = inlined_call_operand.vmem [shape: f32[8,8,1], index: 4, kind: input, shape index: {}]   ;;  %s9926_s5 = inlined_call_operand.vmem [shape: f32[8,1,8], index: 5, kind: input, shape index: {}]   ;;  %s9927_s6 = inlined_call_operand.vmem [shape: f32[8,8,256], index: 6, kind: input, shape index: {}]   ;;  %s9928_s7 = inlined_call_operand.vmem [shape: f32[8,16,128], index: 7, kind: input, shape index: {}]   ;;  %s9929_s8 = inlined_call_operand.hbm [shape: f32[8,16,128], index: 8, kind: input, shape index: {}]   ;;  %s9930_s9 = inlined_call_operand.hbm [shape: f32[3,8,16,128], index: 9, kind: input, shape index: {}]   ;;  %s9931_s10 = inlined_call_operand.hbm [shape: f32[3,8,16,128], index: 10, kind: input, shape index: {}]   ;;  %s9932_s11 = inlined_call_operand.hbm [shape: f32[3,8,16,128], index: 11, kind: input, shape index: {}]   ;;  %s9933_s12 = inlined_call_operand.vmem [shape: f32[8,3,256], index: 12, kind: output, shape index: {0}]   ;;  %s9934_s13 = inlined_call_operand.vmem [shape: f32[2,7,128], index: 13, kind: output, shape index: {1}]  }
   0x1   :  { %9990 = sst [smem:[#allocation67_spill]] %s9921_s0 }
   0x2   :  { %9991 = sst [smem:[#allocation68_spill]] %s9924_s3 }
   0x3   :  { %9992 = sst [smem:[#allocation69_spill]] %s9925_s4 }
   0x4   :  { %9993 = sst [smem:[#allocation70_spill]] %s9933_s12 }
   0x5   :  { %19 = vsyncpa [#allocation3], 0 }
   0x6   :  { %20 = vsyncpa [#allocation5], 0 }
   0x7   :  { %22 = vsyncpa [#allocation5 + $0x1], 0 }
   0x8   :  { %23 = vsyncpa [#allocation8], 0 }
   0x9   :  { %25 = vsyncpa [#allocation8 + $0x1], 0 }
   0xa   :  { %26 = vsyncpa [#allocation11], 0 }
   0xb   :  { %28 = vsyncpa [#allocation11 + $0x1], 0  ;;  %s6913_s25 = smov 0   ;;  %s6915_s26 = smov 0  }
   0xc   :  { %s6917_s27 = smov 0   ;;  %s6919_s28 = smov 0  }
   0xd LB: > { %9994 = sst [smem:[#allocation25_spill]] %s6815_s27  ;;  %s6932_s29 = sadd.s32 4294967295, %s6819_s28   ;;  %s6819_s28 = sphi %s6919_s28, %s10140_s28   ;;  %s6815_s27 = sphi %s6917_s27, %s10142_s27   ;;  %s6811_s26 = sphi %s6915_s26, %s10144_s26   ;;  %s6807_s25 = sphi %s6913_s25, %s10143_s25  }
   0xe   : > { %s6935_s30 = sadd.s32 1, %s6819_s28   ;;  %s109_s15 = sadd.s32 1, %s6815_s27 }
   0xf   : > { %9995 = sst [smem:[#allocation26_spill]] %s6935_s30  ;;  %s106_s14 = ssub.s32 %s6819_s28, %s6935_s30 }
  0x10   : > { %p107_p0 = scmp.eq.s32.totalorder %s106_s14, 0  ;;  %p116_p1 = scmp.ne.s32.totalorder %s6815_s27, %s6811_s26 }
  0x11   : > { %p117_p2 = scmp.eq.s32.totalorder %s6819_s28, 0  ;;  %p122_p3 = scmp.ne.s32.totalorder %s6811_s26, %s6807_s25 }
  0x12   : > { %s6945_s16 = scalar_select %p107_p0, %s6815_s27, %s109_s15  }
  0x13   : > { %p6947_p4 = por %p117_p2, %p116_p1  ;;  %p9939_p5 = scmp.eq.s32.totalorder %s6932_s29, 0 }
  0x14   : > { %9996 = sst [smem:[#allocation27_spill]] %s6945_s16  ;;  %p5832_p6 = scmp.ge.s32.totalorder %s6819_s28, 1 }
  0x15   : > { %p393_p7 = scmp.lt.s32.totalorder %s6819_s28, 3  ;;  %p6956_p8 = por %p9939_p5, %p122_p3 }
  0x16   : > { %s6821_s20 = smov [#allocation2]  }
  0x17   : > { %s9998_s18 = scalar_select %p6956_p8, 1, 0 }
  0x18   : > { %p6960_p9 = pnand %p5832_p6, %p393_p7  ;;  %s406_s21 = sshll.u32 %s6821_s20, 4  ;;  %s407_s21 = int_to_ptr.vmem [resolvable:$true] %s406_s21 }
  0x19   : > { %s6706_s22 = scalar_lea.vmem %s407_s21, 256  ;;  %p6714_p2 = scmp.lt.s32.totalorder %s407_s21, %s407_s21 }
  0x1a   : > { %p6570_p10 = pneg %p6960_p9  ;;  %p6707_p13 = scmp.ne.s32.totalorder %s407_s21, %s6706_s22 }
  0x1b   : > { %p6715_p3 = scmp.lt.s32.totalorder %s6706_s22, %s6706_s22 }
  0x1c   : > { %p6571_p11 = pnand %p6570_p10, %p9939_p5 }
  0x1d   : > { %p6716_p8 = por %p6715_p3, %p6714_p2 }
  0x1e   : > { %p6697_p12 = pneg %p6571_p11 }
  0x20   : > { %p6709_p0 = pnand %p6707_p13, %p6697_p12 }
  0x22   : > { %p6710_p1 = pneg %p6709_p0 }
  0x24   : > { %p6717_p6 = pnand %p6716_p8, %p6710_p1 }
  0x26   : > { %6720 = shalt.err (!%p6717_p6)
}
  0x27   : > { %s10000_s0 = sld [smem:[#allocation67_spill]]  ;;  %p5834_p7 = scmp.ge.s32.totalorder %s6819_s28, 2 }
  0x28   : > { %s9940_s25 = sand.u32 (!%p5834_p7), 1, %s6819_s28   ;;  %s6974_s14 = sand.u32 (!%p5834_p7), 1, %s6815_s27  }
  0x29   : > { %416 = sbr.rel (%p5834_p7) target bundleno = 130 (0x82), region = 24  ;;  %s5835_s15 = sshll.u32 (!%p5834_p7), %s6974_s14, 5 }
  0x2a   : > { %s6171_s20 = sshll.u32 (!%p5834_p7), %s6819_s28, 9  ;;  %s10001_s3 = sld [smem:[#allocation68_spill]] (!%p5834_p7) }
  0x2b   : > { %s6988_s27 = scalar_lea.sflag (!%p5834_p7), [#allocation5], %s9940_s25 }
  0x2d   : > { %6573 = dma.hbm_to_vmem [thread:$0]  (!%p6571_p11), %s10000_s0, 256, %s407_s21, [#allocation3]  }
  0x2e   : > { %s433_s21 = scalar_lea.vmem [#allocation4], %s5835_s15  ;;  %s5838_s0 = sshll.u32 %s6974_s14, 6 }
  0x2f   : > { %s440_s24 = sshll.u32 %s433_s21, 4  ;;  %s6983_s24 = int_to_ptr.vmem [resolvable:$true] %s440_s24 }
  0x30   : > { %s6981_s23 = scalar_lea.hbm %s10001_s3, %s6171_s20  ;;  %s6725_s20 = scalar_lea.hbm %s10001_s3, 1024 }
  0x31   : > { %s6721_s30 = scalar_lea.hbm %s6981_s23, 512  ;;  %p6726_p12 = scmp.lt.s32.totalorder %s6981_s23, %s10001_s3 }
  0x32   : > { %p6722_p8 = scmp.ne.s32.totalorder %s6981_s23, %s6721_s30  ;;  %p6727_p13 = scmp.lt.s32.totalorder %s6725_s20, %s6721_s30 }
  0x34   : > { %p6723_p10 = pnand %p6722_p8, %p6947_p4  ;;  %p6728_p0 = por %p6727_p13, %p6726_p12 }
  0x36   : > { %p6724_p11 = pneg %p6723_p10 }
  0x38   : > { %p6729_p1 = pnand %p6728_p0, %p6724_p11 }
  0x3a   : > { %6732 = shalt.err (!%p6729_p1)
}
  0x3b   : > { %s6733_s15 = scalar_lea.vmem %s6983_s24, 512  ;;  %s6822_s21 = smov [#allocation4]  }
  0x3c   : > { %p6734_p2 = scmp.ne.s32.totalorder %s6983_s24, %s6733_s15  ;;  %s6737_s12 = sshll.u32 %s6822_s21, 4  ;;  %s6738_s12 = int_to_ptr.vmem [resolvable:$false] %s6737_s12 }
  0x3d   : > { %s6739_s16 = scalar_lea.vmem %s6738_s12, 1024  ;;  %p6740_p7 = scmp.lt.s32.totalorder %s6983_s24, %s6738_s12 }
  0x3e   : > { %p6735_p3 = pnand %p6734_p2, %p6947_p4  ;;  %p6741_p8 = scmp.lt.s32.totalorder %s6739_s16, %s6733_s15 }
  0x40   : > { %p6736_p6 = pneg %p6735_p3  ;;  %p6742_p10 = por %p6741_p8, %p6740_p7 }
  0x42   : > { %p6743_p5 = pnand %p6742_p10, %p6736_p6 }
  0x44   : > { %6746 = shalt.err (!%p6743_p5)
}
  0x45   : > { %s9941_s4 = smov 128   ;;  %s9942_s30 = smov 8  }
  0x46   : > { %6537 = dma.hbm_to_vmem [thread:$0]  (%p6947_p4), %s6981_s23, 512, %s6983_s24, %s6988_s27, %s9941_s4, %s9941_s4, %s9942_s30  }
  0x47   : > { %s7015_s20 = sshll.u32 %s6819_s28, 10  ;;  %s491_s12 = scalar_lea.vmem [#allocation6], %s5838_s0 }
  0x48   : > { %s7021_s21 = scalar_lea.hbm %s9929_s8, %s7015_s20  ;;  %s499_s16 = sshll.u32 %s491_s12, 4  ;;  %s500_s16 = int_to_ptr.vmem [resolvable:$true] %s499_s16 }
  0x49   : > { %s6747_s25 = scalar_lea.hbm %s7021_s21, 1024  ;;  %s6751_s4 = scalar_lea.hbm %s9929_s8, 2048 }
  0x4a   : > { %p6748_p5 = scmp.ne.s32.totalorder %s7021_s21, %s6747_s25  ;;  %p6752_p13 = scmp.lt.s32.totalorder %s7021_s21, %s9929_s8 }
  0x4b   : > { %p6753_p0 = scmp.lt.s32.totalorder %s6751_s4, %s6747_s25 }
  0x4c   : > { %p6749_p11 = pnand %p6748_p5, %p6947_p4 }
  0x4d   : > { %p6754_p1 = por %p6753_p0, %p6752_p13 }
  0x4e   : > { %p6750_p12 = pneg %p6749_p11 }
  0x50   : > { %p6755_p2 = pnand %p6754_p1, %p6750_p12 }
  0x52   : > { %6758 = shalt.err (!%p6755_p2)
}
  0x53   : > { %s6759_s0 = scalar_lea.vmem %s500_s16, 1024  ;;  %s6825_s15 = smov [#allocation6]  }
  0x54   : > { %p6760_p3 = scmp.ne.s32.totalorder %s500_s16, %s6759_s0  ;;  %s6763_s12 = sshll.u32 %s6825_s15, 4  ;;  %s6764_s12 = int_to_ptr.vmem [resolvable:$false] %s6763_s12 }
  0x55   : > { %s6765_s3 = scalar_lea.vmem %s6764_s12, 2048  ;;  %p6766_p8 = scmp.lt.s32.totalorder %s500_s16, %s6764_s12 }
  0x56   : > { %p6761_p6 = pnand %p6760_p3, %p6947_p4  ;;  %p6767_p10 = scmp.lt.s32.totalorder %s6765_s3, %s6759_s0 }
  0x58   : > { %p6762_p7 = pneg %p6761_p6  ;;  %p6768_p5 = por %p6767_p10, %p6766_p8 }
  0x5a   : > { %p6769_p11 = pnand %p6768_p5, %p6762_p7 }
  0x5c   : > { %6772 = shalt.err (!%p6769_p11)
}
  0x5d   : > { %s10002_s25 = smov 8   ;;  %s10003_s4 = smov 128  }
  0x5e   : > { %6538 = dma.hbm_to_vmem [thread:$0]  (%p6947_p4), %s7021_s21, 1024, %s500_s16, %s6988_s27, %s10003_s4, %s10003_s4, %s10002_s25  }
  0x5f   : > { %s7046_s3 = smul.u32 192, %s6974_s14  ;;  %s6826_s30 = smov 2048  }
  0x60   : > { %6540 = sst [smem:[#allocation13]] (%p6947_p4), %s6826_s30  ;;  %s6827_s16 = smov 1024  }
  0x61   : > { %s6539_s23 = scalar_select %p6947_p4, [#allocation0], [#allocation18] }
  0x62   : > { %s513_s27 = scalar_lea.vmem [#allocation7], %s7046_s3  ;;  %6541 = sst [smem:[#allocation13 + $0x1]] (%p6947_p4), %s6827_s16 }
  0x63   : > { %s525_s24 = sld [smem:[%s6539_s23]]   ;;  %s533_s21 = sshll.u32 %s513_s27, 4  ;;  %s534_s21 = int_to_ptr.vmem [resolvable:$true] %s533_s21 }
  0x64   : > { %s6828_s22 = smov 8   ;;  %s520_s12 = scalar_lea.hbm %s9930_s9, %s7015_s20 }
  0x65   : > { %6542 = sst [smem:[#allocation13 + $0x2]] (%p6947_p4), %s6828_s22  ;;  %s6829_s25 = smov 128  }
  0x66   : > { %6543 = sst [smem:[#allocation13 + $0x3]] (%p6947_p4), %s6829_s25  ;;  %s10004_s23 = sand.u32 1, %s6819_s28  }
  0x67   : > { %6544 = sst [smem:[#allocation13 + $0x4]] (%p6947_p4), %s6829_s25  ;;  %s510_s27 = scalar_lea.sflag [#allocation8], %s10004_s23 }
  0x68   : > { %6545 = sst [smem:[#allocation13 + $0x5]] (%p6947_p4), %s6828_s22  ;;  %s6830_s16 = smov 131072  }
  0x69   : > { %s5845_s4 = sshll.u32 %s525_s24, 26 }
  0x6a   : > { %s5846_s30 = sadd.s32 134217728, %s5845_s4 }
  0x6b   : > { %6546 = dma.general (%p6947_p4), %s520_s12, 3072, %s534_s21, %s510_s27, %s6830_s16, [#allocation13], %s5846_s30, 0  }
  0x6c   : > { %s6547_s0 = scalar_select %p6947_p4, [#allocation0], [#allocation19] }
  0x6d   : > { %s567_s24 = scalar_lea.hbm %s9931_s10, %s7015_s20  ;;  %s560_s22 = scalar_lea.vmem [#allocation9], %s7046_s3 }
  0x6e   : > { %s572_s28 = sld [smem:[%s6547_s0]]   ;;  %s580_s4 = sshll.u32 %s560_s22, 4  ;;  %s581_s4 = int_to_ptr.vmem [resolvable:$true] %s580_s4 }
  0x6f   : > { %s6831_s21 = smov 2048   ;;  %s6832_s12 = smov 1024  }
  0x70   : > { %6548 = sst [smem:[#allocation15]] (%p6947_p4), %s6831_s21  ;;  %s6833_s30 = smov 8  }
  0x71   : > { %6549 = sst [smem:[#allocation15 + $0x1]] (%p6947_p4), %s6832_s12  ;;  %s6834_s23 = smov 128  }
  0x72   : > { %6550 = sst [smem:[#allocation15 + $0x2]] (%p6947_p4), %s6833_s30  ;;  %s6835_s15 = smov 131072  }
  0x73   : > { %6551 = sst [smem:[#allocation15 + $0x3]] (%p6947_p4), %s6834_s23 }
  0x74   : > { %6552 = sst [smem:[#allocation15 + $0x4]] (%p6947_p4), %s6834_s23  ;;  %s5850_s16 = sshll.u32 %s572_s28, 26 }
  0x75   : > { %6553 = sst [smem:[#allocation15 + $0x5]] (%p6947_p4), %s6833_s30  ;;  %s5851_s0 = sadd.s32 134217728, %s5850_s16 }
  0x76   : > { %6554 = dma.general (%p6947_p4), %s567_s24, 3072, %s581_s4, %s510_s27, %s6835_s15, [#allocation15], %s5851_s0, 0  }
  0x77   : > { %s6555_s25 = scalar_select %p6947_p4, [#allocation0], [#allocation20] }
  0x78   : > { %s607_s22 = scalar_lea.vmem [#allocation10], %s7046_s3  ;;  %s6836_s12 = smov 2048  }
  0x79   : > { %s627_s21 = sshll.u32 %s607_s22, 4  ;;  %s619_s28 = sld [smem:[%s6555_s25]]   ;;  %s628_s21 = int_to_ptr.vmem [resolvable:$true] %s627_s21 }
  0x7a   : > { %6556 = sst [smem:[#allocation17]] (%p6947_p4), %s6836_s12  ;;  %s6837_s27 = smov 1024  }
  0x7b   : > { %6557 = sst [smem:[#allocation17 + $0x1]] (%p6947_p4), %s6837_s27  ;;  %s614_s30 = scalar_lea.hbm %s9932_s11, %s7015_s20 }
  0x7c   : > { %s6838_s23 = smov 8   ;;  %s6839_s16 = smov 128  }
  0x7d   : > { %6558 = sst [smem:[#allocation17 + $0x2]] (%p6947_p4), %s6838_s23  ;;  %s604_s15 = scalar_lea.sflag [#allocation11], %s6974_s14 }
  0x7e   : > { %6559 = sst [smem:[#allocation17 + $0x3]] (%p6947_p4), %s6839_s16  ;;  %s6840_s25 = smov 131072  }
  0x7f   : > { %6560 = sst [smem:[#allocation17 + $0x4]] (%p6947_p4), %s6839_s16  ;;  %s5855_s3 = sshll.u32 %s619_s28, 26 }
  0x80   : > { %6561 = sst [smem:[#allocation17 + $0x5]] (%p6947_p4), %s6838_s23  ;;  %s5856_s0 = sadd.s32 134217728, %s5855_s3 }
  0x81   : > { %6562 = dma.general (%p6947_p4), %s614_s30, 3072, %s628_s21, %s604_s15, %s6840_s25, [#allocation17], %s5856_s0, 0  }
  0x82 PF: > { %652 = sbr.rel (%p6960_p9) target bundleno = 1530 (0x5fa), region = 68 }
  0x87   : > { %p10005_p12 = scmp.eq.s32.totalorder %s6932_s29, 0 }
  0x89   : > { %6790 = dma.done.wait (%p10005_p12), [#allocation3], 256   ;;  %p10006_p13 = pmov %p10005_p12 }
  0x8a   : > { %s658_s20 = sand.u32 1, %s6932_s29   ;;  %s660_s22 = sand.u32 1, %s6811_s26  }
  0x8b   : > { %6792 = vsyncadd (%p10006_p13), [#allocation3], 4294967040  ;;  %s5859_s28 = sshll.u32 %s660_s22, 5  ;;  %s659_s14 = scalar_lea.sflag [#allocation5], %s658_s20 }
  0x8c   : > { %s7122_s12 = scalar_lea.vmem [#allocation4], %s5859_s28  ;;  %p10007_p4 = scmp.ne.s32.totalorder %s9998_s18, 0 }
  0x8e   : > { %6794 = dma.done.wait (%p10007_p4), %s659_s14, 1536  }
  0x8f   : > { %6796 = vsyncadd (%p10007_p4), %s659_s14, 4294965760  ;;  %s5860_s17 = sshll.u32 %s660_s22, 6  ;;  %s6520_s19 = smul.u32 192, %s660_s22 }
  0x90   : > { %s7128_s21 = scalar_lea.vmem [#allocation6], %s5860_s17  ;;  %s677_s27 = scalar_lea.sflag [#allocation8], %s658_s20 }
  0x91   : > { %s7130_s24 = scalar_lea.vmem [#allocation7], %s6520_s19 }
  0x92   : > { %6798 = dma.done.wait (%p10007_p4), %s677_s27, 6144  }
  0x93   : > { %6800 = vsyncadd (%p10007_p4), %s677_s27, 4294961152  ;;  %s7136_s4 = scalar_lea.vmem [#allocation9], %s6520_s19  ;;  %s695_s30 = scalar_lea.sflag [#allocation11], %s660_s22 }
  0x94   : > { %s7138_s23 = scalar_lea.vmem [#allocation10], %s6520_s19 }
  0x95   : > { %6802 = dma.done.wait (%p10007_p4), %s695_s30, 3072  }
  0x96   : > { %6804 = vsyncadd (%p10007_p4), %s695_s30, 4294964224  ;;  %v9943_v0 = vmov 0.0   ;;  %s5861_s16 = sshll.u32 %s6932_s29, 2  ;;  %vm880_vm0 = vcmask 64512   ;;  %v955_v1 = vld [vmem:[%s7122_s12] sm:$0xff]  ;;  %v7150_v2 = vld [vmem:[%s9922_s1] sm:$0xff] }
  0x97   : > { %948 = vmatprep.mubr.f32.mxu0 %v9943_v0  ;;  %p793_p9 = scmp.lt.s32.totalorder %s5861_s16, 7  ;;  %v7155_v3 = vld [vmem:[%s9922_s1 + $0x8] sm:$0xff]  ;;  %6315 = vmatprep.subr.mxu1 %v955_v1  ;;  %v7162_v4 = vld [vmem:[%s9922_s1 + $0x10] sm:$0xff]  ;;  %v7173_v5 = vld [vmem:[%s9922_s1 + $0x18] sm:$0xff]  ;;  %vm1302_vm1 = vcmask 1040384   ;;  %p835_p0 = scmp.lt.s32.totalorder %s6932_s29, 1 }
  0x98   : > { %6317 = vmatprep.mubr.msk.f32.mxu1 %vm880_vm0, %v7150_v2  ;;  %6316 = vmatpush3.msra.mxu1 %v955_v1  ;;  %v7178_v6 = vld [vmem:[%s9922_s1 + $0x20] sm:$0xff]  ;;  %v7188_v7 = vld [vmem:[%s9922_s1 + $0x28] sm:$0xff]  ;;  %v7200_v8 = vld [vmem:[%s9922_s1 + $0x30] sm:$0xff]  ;;  %vm1305_vm10 = vcmask 1041408   ;;  %s10104_s14 = sld [smem:[#allocation70_spill]] }
  0x99   : > { %6318 = vmatmul.mubr.msk.f32.vlgmr.msra.gmra.mxu1 %vm880_vm0, %v7155_v3  ;;  %s10146_s16 = smov (!%p793_p9, %s5861_s16), 7  ;;  %v7210_v10 = vld [vmem:[%s9922_s1 + $0x38] sm:$0xff]  ;;  %v7216_v12 = vld [vmem:[%s9922_s1 + $0x40] sm:$0xff]  ;;  %v7218_v13 = vld [vmem:[#allocation2 + $0x8] sm:$0xff]  ;;  %s10148_s29 = smov (!%p835_p0, %s6932_s29), 1 }
  0x9a   : > { %6320 = vmatprep.mubr.msk.f32.mxu1 %vm880_vm0, %v7162_v4  ;;  %s6180_s19 = sshll.u32 %s10146_s16, 4  ;;  %v7220_v14 = vld [vmem:[#allocation2] sm:$0xff]  ;;  %914 = vmatprep.subr.mxu0 %v7218_v13  ;;  %v7232_v15 = vld [vmem:[%s9922_s1 + $0x48] sm:$0xff]  ;;  %v7237_v16 = vld [vmem:[%s9922_s1 + $0x50] sm:$0xff]  ;;  %s7392_s30 = sshll.u32 %s10146_s16, 3 }
  0x9b   : > { %s7195_s15 = scalar_lea.vmem %s9927_s6, %s6180_s19  ;;  %915 = vmatpush1.msra.mxu0 %v7220_v14  ;;  %v7246_v17 = vld [vmem:[%s9922_s1 + $0x58] sm:$0xff]  ;;  %v7251_v18 = vld [vmem:[%s9922_s1 + $0x60] sm:$0xff]  ;;  %v7260_v19 = vld [vmem:[%s9922_s1 + $0x68] sm:$0xff]  ;;  %s7398_s25 = scalar_lea.vmem %s9923_s2, %s7392_s30 }
  0x9c   : > { %v1314_v9 = vld [vmem:[%s7195_s15 + $0x8] sm:$0xff]  ;;  %v1313_v11 = vld [vmem:[%s7195_s15] sm:$0xff]  ;;  %v7265_v20 = vld [vmem:[%s9922_s1 + $0x70] sm:$0xff]  ;;  %s7407_s22 = scalar_lea.vmem %s9926_s5, %s10146_s16  ;;  %s5875_s27 = sshll.u32 %s10148_s29, 3 }
  0x9d   : > { %6321 = vmatmul.mubr.msk.f32.gmra.mxu1 %vm880_vm0, %v7173_v5  ;;  %6515 = vmatprep.subr.mxu1 %v1314_v9  ;;  %v7274_v21 = vld [vmem:[%s9922_s1 + $0x78] sm:$0xff]  ;;  %v7279_v22 = vld [vmem:[%s9922_s1 + $0x80] sm:$0xff]  ;;  %v7288_v23 = vld [vmem:[%s9922_s1 + $0x88] sm:$0xff]  ;;  %s8596_s18 = scalar_lea.vmem %s9934_s13, %s5875_s27  ;;  %s8615_s28 = scalar_lea.vmem %s9928_s7, %s6180_s19 }
  0x9e   : > { %6323 = vmatprep.mubr.msk.f32.mxu1 %vm880_vm0, %v7178_v6  ;;  %6516 = vmatpush1.msra.mxu1 %v1313_v11  ;;  %v7293_v24 = vld [vmem:[%s9922_s1 + $0x90] sm:$0xff]  ;;  %v7302_v25 = vld [vmem:[%s9922_s1 + $0x98] sm:$0xff]  ;;  %v7307_v26 = vld [vmem:[%s9922_s1 + $0xa0] sm:$0xff]  ;;  %s9698_s17 = scalar_lea.vmem %s10104_s14, %s7392_s30 }
  0x9f   : > { %2076 = vmatprep.subr.mxu1 %v7218_v13  ;;  %1583 = vmatprep.subr.mxu0 %v1314_v9  ;;  %v7316_v27 = vld [vmem:[%s9922_s1 + $0xa8] sm:$0xff]  ;;  %v7321_v28 = vld [vmem:[%s9922_s1 + $0xb0] sm:$0xff]  ;;  %v7330_v29 = vld [vmem:[%s9922_s1 + $0xb8] sm:$0xff] }
  0xa0   : > { %v7335_v30 = vld [vmem:[%s9922_s1 + $0xc0] sm:$0xff]  ;;  %v7344_v31 = vld [vmem:[%s9922_s1 + $0xc8] sm:$0xff]  ;;  %v7349_v32 = vld [vmem:[%s9922_s1 + $0xd0] sm:$0xff] }
  0xa1   : > { %6324 = vmatmul.mubr.msk.f32.gmra.mxu1 %vm880_vm0, %v7188_v7  ;;  %v7358_v33 = vld [vmem:[%s9922_s1 + $0xd8] sm:$0xff]  ;;  %v7363_v34 = vld [vmem:[%s9922_s1 + $0xe0] sm:$0xff]  ;;  %v7372_v35 = vld [vmem:[%s9922_s1 + $0xe8] sm:$0xff] }
  0xa2   : > { %6326 = vmatprep.mubr.msk.f32.mxu1 %vm880_vm0, %v7200_v8  ;;  %v7377_v36 = vld [vmem:[%s9922_s1 + $0xf0] sm:$0xff]  ;;  %v7386_v37 = vld [vmem:[%s9922_s1 + $0xf8] sm:$0xff]  ;;  %v873_v38 = vld [vmem:[%s7398_s25] sm:$0xff] }
  0xa3   : > { %5876 = vmatmul.mubr.msk.f32.vlgmr.msra.gmra.mxu0 %vm880_vm0, %v873_v38  ;;  %v7410_v39 = vld [vmem:[%s7407_s22] ss:$0 sm:$0xff] }
  0xa4   : > { %1584 = vmatpush1.msra.mxu0 %v1313_v11  ;;  %1617 = vmatprep.mubr.f32.mxu0 %v9943_v0 }
  0xa5   : > { %6327 = vmatmul.mubr.msk.f32.gmra.mxu1 %vm880_vm0, %v7210_v10 }
  0xa6   : > { %6329 = vmatprep.mubr.msk.f32.mxu1 %vm880_vm0, %v7216_v12 }
  0xa9   : > { %6330 = vmatmul.mubr.msk.f32.gmra.mxu1 %vm880_vm0, %v7232_v15 }
  0xaa   : > { %6332 = vmatprep.mubr.msk.f32.mxu1 %vm880_vm0, %v7237_v16 }
  0xad   : > { %6333 = vmatmul.mubr.msk.f32.gmra.mxu1 %vm880_vm0, %v7246_v17 }
  0xae   : > { %6335 = vmatprep.mubr.msk.f32.mxu1 %vm880_vm0, %v7251_v18 }
  0xb1   : > { %6336 = vmatmul.mubr.msk.f32.gmra.mxu1 %vm880_vm0, %v7260_v19 }
  0xb2   : > { %6338 = vmatprep.mubr.msk.f32.mxu1 %vm880_vm0, %v7265_v20 }
  0xb5   : > { %6339 = vmatmul.mubr.msk.f32.gmra.mxu1 %vm880_vm0, %v7274_v21 }
  0xb6   : > { %6341 = vmatprep.mubr.msk.f32.mxu1 %vm880_vm0, %v7279_v22 }
  0xb9   : > { %6342 = vmatmul.mubr.msk.f32.gmra.mxu1 %vm880_vm0, %v7288_v23 }
  0xba   : > { %6344 = vmatprep.mubr.msk.f32.mxu1 %vm880_vm0, %v7293_v24 }
  0xbd   : > { %6345 = vmatmul.mubr.msk.f32.gmra.mxu1 %vm880_vm0, %v7302_v25 }
  0xbe   : > { %6347 = vmatprep.mubr.msk.f32.mxu1 %vm880_vm0, %v7307_v26 }
  0xc1   : > { %6348 = vmatmul.mubr.msk.f32.gmra.mxu1 %vm880_vm0, %v7316_v27 }
  0xc2   : > { %6350 = vmatprep.mubr.msk.f32.mxu1 %vm880_vm0, %v7321_v28 }
  0xc5   : > { %6351 = vmatmul.mubr.msk.f32.gmra.mxu1 %vm880_vm0, %v7330_v29 }
  0xc6   : > { %6353 = vmatprep.mubr.msk.f32.mxu1 %vm880_vm0, %v7335_v30 }
  0xc9   : > { %6354 = vmatmul.mubr.msk.f32.gmra.mxu1 %vm880_vm0, %v7344_v31 }
  0xca   : > { %6356 = vmatprep.mubr.msk.f32.mxu1 %vm880_vm0, %v7349_v32 }
  0xcd   : > { %6357 = vmatmul.mubr.msk.f32.gmra.mxu1 %vm880_vm0, %v7358_v33 }
  0xce   : > { %6359 = vmatprep.mubr.msk.f32.mxu1 %vm880_vm0, %v7363_v34 }
  0xd1   : > { %6360 = vmatmul.mubr.msk.f32.gmra.mxu1 %vm880_vm0, %v7372_v35 }
  0xd2   : > { %6362 = vmatprep.mubr.msk.f32.mxu1 %vm880_vm0, %v7377_v36 }
  0xd5   : > { %6363 = vmatmul.mubr.msk.f32.gmra.mxu1 %vm880_vm0, %v7386_v37 }
  0xd6   : > { %1713 = vmatprep.mubr.f32.mxu1 %v9943_v0 }
 0x159   : > { %v6319_v40 = vpop.f32.mrf.mxu1 }
 0x15a   : > { %v1131_v41 = vadd.f32 %v6319_v40, %v7410_v39 }
 0x15b   : > { %v1125_v42 = vpop.f32.mrf.mxu1 }
 0x15c   : > { %v1126_v43 = vadd.f32 %v7410_v39, %v1125_v42  ;;  %v1316_v44 = vmul.f32 %v1131_v41, %v1131_v41 }
 0x15d   : > { %v6322_v45 = vpop.f32.mrf.mxu1 }
 0x15e   : > { %v1141_v46 = vadd.f32 %v6322_v45, %v7410_v39  ;;  %5910 = vmatmul.mubr.msk.f32.vlgmr.msra.gmra.mxu0 %vm880_vm0, %v1126_v43  ;;  %v1350_v47 = vsel %vm880_vm0, %v1316_v44, 0.0  ;;  %v1315_v48 = vmul.f32 %v1126_v43, %v1126_v43 }
 0x15f   : > { %1351 = vadd.xlane.f32.xlu1 %v1350_v47  ;;  %v1135_v49 = vpop.f32.mrf.mxu1  ;;  %1623 = vmatprep.mubr.f32.mxu0 %v9943_v0 }
 0x160   : > { %v1136_v50 = vadd.f32 %v7410_v39, %v1135_v49  ;;  %v1347_v51 = vsel %vm880_vm0, %v1315_v48, 0.0  ;;  %v1318_v52 = vmul.f32 %v1141_v46, %v1141_v46 }
 0x161   : > { %v6325_v53 = vpop.f32.mrf.mxu1  ;;  %1348 = vadd.xlane.f32.xlu0 %v1347_v51 }
 0x162   : > { %v1151_v54 = vadd.f32 %v6325_v53, %v7410_v39  ;;  %5911 = vmatmul.mubr.msk.f32.gmra.mxu0 %vm880_vm0, %v1131_v41  ;;  %v1356_v55 = vsel %vm880_vm0, %v1318_v52, 0.0  ;;  %v1317_v56 = vmul.f32 %v1136_v50, %v1136_v50 }
 0x163   : > { %1357 = vadd.xlane.f32.xlu1 %v1356_v55  ;;  %v1145_v57 = vpop.f32.mrf.mxu1  ;;  %1629 = vmatprep.mubr.f32.mxu0 %v9943_v0 }
 0x164   : > { %v1146_v59 = vadd.f32 %v7410_v39, %v1145_v57  ;;  %v1353_v60 = vsel %vm880_vm0, %v1317_v56, 0.0  ;;  %v1320_v61 = vmul.f32 %v1151_v54, %v1151_v54 }
 0x165   : > { %v6328_v58 = vpop.f32.mrf.mxu1 }
 0x166   : > { %5912 = vmatmul.mubr.msk.f32.gmra.mxu0 %vm880_vm0, %v1136_v50  ;;  %v1161_v1 = vadd.f32 %v6328_v58, %v7410_v39  ;;  %v1362_v9 = vsel %vm880_vm0, %v1320_v61, 0.0  ;;  %v1319_v11 = vmul.f32 %v1146_v59, %v1146_v59 }
 0x167   : > { %v1155_v62 = vpop.f32.mrf.mxu1  ;;  %1354 = vadd.xlane.f32.xlu1 %v1353_v60  ;;  %1635 = vmatprep.mubr.f32.mxu0 %v9943_v0 }
 0x168   : > { %v1156_v41 = vadd.f32 %v7410_v39, %v1155_v62  ;;  %v1359_v42 = vsel %vm880_vm0, %v1319_v11, 0.0  ;;  %v1322_v43 = vmul.f32 %v1161_v1, %v1161_v1 }
 0x169   : > { %v6331_v63 = vpop.f32.mrf.mxu1 }
 0x16a   : > { %5913 = vmatmul.mubr.msk.f32.gmra.mxu0 %vm880_vm0, %v1141_v46  ;;  %v1171_v47 = vadd.f32 %v6331_v63, %v7410_v39  ;;  %v1368_v48 = vsel %vm880_vm0, %v1322_v43, 0.0  ;;  %v1321_v50 = vmul.f32 %v1156_v41, %v1156_v41 }
 0x16b   : > { %v1165_v38 = vpop.f32.mrf.mxu1  ;;  %1363 = vadd.xlane.f32.xlu1 %v1362_v9  ;;  %1641 = vmatprep.mubr.f32.mxu0 %v9943_v0 }
 0x16c   : > { %v1166_v56 = vadd.f32 %v7410_v39, %v1165_v38  ;;  %v1324_v58 = vmul.f32 %v1171_v47, %v1171_v47 }
 0x16d   : > { %v6334_v40 = vpop.f32.mrf.mxu1 }
 0x16e   : > { %5914 = vmatmul.mubr.msk.f32.gmra.mxu0 %vm880_vm0, %v1146_v59  ;;  %v1181_v63 = vadd.f32 %v6334_v40, %v7410_v39  ;;  %v1374_v9 = vsel %vm880_vm0, %v1324_v58, 0.0  ;;  %v1323_v38 = vmul.f32 %v1166_v56, %v1166_v56 }
 0x16f   : > { %v1175_v44 = vpop.f32.mrf.mxu1  ;;  %1360 = vadd.xlane.f32.xlu1 %v1359_v42  ;;  %1647 = vmatprep.mubr.f32.mxu0 %v9943_v0 }
 0x170   : > { %v7437_v45 = vadd.f32 %v7410_v39, %v1175_v44 }
 0x171   : > { %v6337_v46 = vpop.f32.mrf.mxu1 }
 0x172   : > { %5915 = vmatmul.mubr.msk.f32.gmra.mxu0 %vm880_vm0, %v1151_v54  ;;  %v1325_v49 = vmul.f32 %v7437_v45, %v7437_v45  ;;  %v1365_v54 = vsel %vm880_vm0, %v1321_v50, 0.0  ;;  %v7468_v40 = vadd.f32 %v6337_v46, %v7410_v39  ;;  %v7474_v50 = vld [vmem:[%s7122_s12 + $0x8] sm:$0xff] }
 0x173   : > { %v1185_v51 = vpop.f32.mrf.mxu1  ;;  %1369 = vadd.xlane.f32.xlu1 %v1368_v48  ;;  %1653 = vmatprep.mubr.f32.mxu0 %v9943_v0 }
 0x174   : > { %v7446_v52 = vadd.f32 %v7410_v39, %v1185_v51  ;;  %v1377_v53 = vsel %vm880_vm0, %v1325_v49, 0.0  ;;  %v1326_v49 = vmul.f32 %v1181_v63, %v1181_v63 }
 0x175   : > { %v6340_v55 = vpop.f32.mrf.mxu1  ;;  %1378 = vadd.xlane.f32.xlu0 %v1377_v53 }
 0x176   : > { %5916 = vmatmul.mubr.msk.f32.gmra.mxu0 %vm880_vm0, %v1156_v41  ;;  %v1327_v57 = vmul.f32 %v7446_v52, %v7446_v52  ;;  %v1380_v58 = vsel %vm880_vm0, %v1326_v49, 0.0 }
 0x177   : > { %v1195_v59 = vpop.f32.mrf.mxu1  ;;  %1366 = vadd.xlane.f32.xlu1 %v1365_v54  ;;  %1659 = vmatprep.mubr.f32.mxu0 %v9943_v0 }
 0x178   : > { %v7456_v60 = vadd.f32 %v7410_v39, %v1195_v59  ;;  %v1383_v61 = vsel %vm880_vm0, %v1327_v57, 0.0  ;;  %v7484_v57 = vadd.f32 %v6340_v55, %v7410_v39  ;;  %v1328_v59 = vmul.f32 %v7468_v40, %v7468_v40 }
 0x179   : > { %v6343_v62 = vpop.f32.mrf.mxu1  ;;  %1384 = vadd.xlane.f32.xlu0 %v1383_v61 }
 0x17a   : > { %5917 = vmatmul.mubr.msk.f32.gmra.mxu0 %vm880_vm0, %v1161_v1  ;;  %v1329_v11 = vmul.f32 %v7456_v60, %v7456_v60  ;;  %v1371_v1 = vsel %vm880_vm0, %v1323_v38, 0.0  ;;  %v1211_v53 = vadd.f32 %v6343_v62, %v7410_v39  ;;  %v1330_v38 = vmul.f32 %v7484_v57, %v7484_v57 }
 0x17b   : > { %v1205_v41 = vpop.f32.mrf.mxu1  ;;  %1375 = vadd.xlane.f32.xlu1 %v1374_v9  ;;  %1665 = vmatprep.mubr.f32.mxu0 %v9943_v0 }
 0x17c   : > { %v1206_v42 = vadd.f32 %v7410_v39, %v1205_v41  ;;  %v1389_v43 = vsel %vm880_vm0, %v1329_v11, 0.0  ;;  %v1386_v11 = vsel %vm880_vm0, %v1328_v59, 0.0  ;;  %v1392_v49 = vsel %vm880_vm0, %v1330_v38, 0.0 }
 0x17d   : > { %1390 = vadd.xlane.f32.xlu0 %v1389_v43  ;;  %v6346_v44 = vpop.f32.mrf.mxu1 }
 0x17e   : > { %5918 = vmatmul.mubr.msk.f32.gmra.mxu0 %vm880_vm0, %v1166_v56  ;;  %5926 = vmatmul.mubr.msk.f32.vlgmr.msra.gmra.mxu1 %vm880_vm0, %v1206_v42  ;;  %v1331_v48 = vmul.f32 %v1206_v42, %v1206_v42  ;;  %v1221_v43 = vadd.f32 %v6346_v44, %v7410_v39 }
 0x17f   : > { %2077 = vmatpush1.msra.mxu1 %v7220_v14  ;;  %1372 = vadd.xlane.f32.xlu1 %v1371_v1  ;;  %v1215_v51 = vpop.f32.mrf.mxu1 }
 0x180   : > { %v1216_v54 = vadd.f32 %v7410_v39, %v1215_v51  ;;  %1719 = vmatprep.mubr.f32.mxu1 %v9943_v0  ;;  %v1395_v46 = vsel %vm880_vm0, %v1331_v48, 0.0  ;;  %1671 = vmatprep.mubr.f32.mxu0 %v9943_v0  ;;  %v1332_v51 = vmul.f32 %v1211_v53, %v1211_v53 }
 0x181   : > { %1396 = vadd.xlane.f32.xlu0 %v1395_v46  ;;  %v6349_v56 = vpop.f32.mrf.mxu1  ;;  %6365 = vmatprep.subr.mxu1 %v7474_v50 }
 0x182   : > { %5919 = vmatmul.mubr.msk.f32.gmra.mxu0 %vm880_vm0, %v1171_v47  ;;  %5927 = vmatmul.mubr.msk.f32.gmra.mxu1 %vm880_vm0, %v1211_v53  ;;  %v1333_v61 = vmul.f32 %v1216_v54, %v1216_v54  ;;  %v1398_v53 = vsel %vm880_vm0, %v1332_v51, 0.0 }
 0x183   : > { %1381 = vadd.xlane.f32.xlu1 %v1380_v58  ;;  %1677 = vmatprep.mubr.f32.mxu0 %v9943_v0  ;;  %v1225_v62 = vpop.f32.mrf.mxu1 }
 0x184   : > { %1725 = vmatprep.mubr.f32.mxu1 %v9943_v0  ;;  %v1401_v9 = vsel %vm880_vm0, %v1333_v61, 0.0  ;;  %v1226_v55 = vadd.f32 %v7410_v39, %v1225_v62  ;;  %v1334_v61 = vmul.f32 %v1221_v43, %v1221_v43 }
 0x185   : > { %1402 = vadd.xlane.f32.xlu0 %v1401_v9  ;;  %v6352_v47 = vpop.f32.mrf.mxu1 }
 0x186   : > { %5920 = vmatmul.mubr.msk.f32.gmra.mxu0 %vm880_vm0, %v7437_v45  ;;  %5928 = vmatmul.mubr.msk.f32.gmra.mxu1 %vm880_vm0, %v1216_v54  ;;  %v1335_v41 = vmul.f32 %v1226_v55, %v1226_v55 }
 0x187   : > { %1387 = vadd.xlane.f32.xlu1 %v1386_v11  ;;  %1683 = vmatprep.mubr.f32.mxu0 %v9943_v0  ;;  %v1235_v42 = vpop.f32.mrf.mxu1 }
 0x188   : > { %1731 = vmatprep.mubr.f32.mxu1 %v9943_v0  ;;  %v1407_v1 = vsel %vm880_vm0, %v1335_v41, 0.0  ;;  %v1236_v45 = vadd.f32 %v7410_v39, %v1235_v42 }
 0x189   : > { %1408 = vadd.xlane.f32.xlu0 %v1407_v1  ;;  %v6355_v48 = vpop.f32.mrf.mxu1 }
 0x18a   : > { %5921 = vmatmul.mubr.msk.f32.gmra.mxu0 %vm880_vm0, %v1181_v63  ;;  %5929 = vmatmul.mubr.msk.f32.gmra.mxu1 %vm880_vm0, %v1221_v43  ;;  %v1337_v54 = vmul.f32 %v1236_v45, %v1236_v45  ;;  %v1231_v63 = vadd.f32 %v6349_v56, %v7410_v39  ;;  %v1251_v1 = vadd.f32 %v6355_v48, %v7410_v39 }
 0x18b   : > { %1393 = vadd.xlane.f32.xlu1 %v1392_v49  ;;  %1689 = vmatprep.mubr.f32.mxu0 %v9943_v0  ;;  %v1245_v44 = vpop.f32.mrf.mxu1 }
 0x18c   : > { %1737 = vmatprep.mubr.f32.mxu1 %v9943_v0  ;;  %v1413_v46 = vsel %vm880_vm0, %v1337_v54, 0.0  ;;  %v1246_v58 = vadd.f32 %v7410_v39, %v1245_v44  ;;  %v1336_v41 = vmul.f32 %v1231_v63, %v1231_v63 }
 0x18d   : > { %1414 = vadd.xlane.f32.xlu0 %v1413_v46  ;;  %v6358_v59 = vpop.f32.mrf.mxu1 }
 0x18e   : > { %5922 = vmatmul.mubr.msk.f32.gmra.mxu0 %vm880_vm0, %v7446_v52  ;;  %5930 = vmatmul.mubr.msk.f32.gmra.mxu1 %vm880_vm0, %v1226_v55  ;;  %v1339_v62 = vmul.f32 %v1246_v58, %v1246_v58  ;;  %v1241_v52 = vadd.f32 %v6352_v47, %v7410_v39  ;;  %v1404_v55 = vsel %vm880_vm0, %v1334_v61, 0.0  ;;  %v1410_v51 = vsel %vm880_vm0, %v1336_v41, 0.0 }
 0x18f   : > { %1399 = vadd.xlane.f32.xlu1 %v1398_v53  ;;  %1695 = vmatprep.mubr.f32.mxu0 %v9943_v0  ;;  %v1255_v9 = vpop.f32.mrf.mxu1  ;;  %v1261_v48 = vadd.f32 %v6358_v59, %v7410_v39 }
 0x190   : > { %1743 = vmatprep.mubr.f32.mxu1 %v9943_v0  ;;  %v1419_v11 = vsel %vm880_vm0, %v1339_v62, 0.0  ;;  %v1256_v38 = vadd.f32 %v7410_v39, %v1255_v9  ;;  %v1338_v54 = vmul.f32 %v1241_v52, %v1241_v52 }
 0x191   : > { %1420 = vadd.xlane.f32.xlu0 %v1419_v11  ;;  %v6361_v56 = vpop.f32.mrf.mxu1  ;;  %v1342_v9 = vmul.f32 %v1261_v48, %v1261_v48 }
 0x192   : > { %5923 = vmatmul.mubr.msk.f32.gmra.mxu0 %vm880_vm0, %v7468_v40  ;;  %5931 = vmatmul.mubr.msk.f32.gmra.mxu1 %vm880_vm0, %v1231_v63  ;;  %v1341_v42 = vmul.f32 %v1256_v38, %v1256_v38  ;;  %v1340_v63 = vmul.f32 %v1251_v1, %v1251_v1  ;;  %v1271_v59 = vadd.f32 %v6361_v56, %v7410_v39 }
 0x193   : > { %1405 = vadd.xlane.f32.xlu1 %v1404_v55  ;;  %1701 = vmatprep.mubr.f32.mxu0 %v9943_v0  ;;  %v1265_v43 = vpop.f32.mrf.mxu1 }
 0x194   : > { %1749 = vmatprep.mubr.f32.mxu1 %v9943_v0  ;;  %v1425_v49 = vsel %vm880_vm0, %v1341_v42, 0.0  ;;  %v1266_v47 = vadd.f32 %v7410_v39, %v1265_v43  ;;  %v1422_v62 = vsel %vm880_vm0, %v1340_v63, 0.0  ;;  %v1344_v55 = vmul.f32 %v1271_v59, %v1271_v59  ;;  %v5981_v42 = vld [vmem:[%s7195_s15 + $0x10] sm:$0xff]  ;;  %v6054_v63 = vld [vmem:[%s7195_s15 + $0x20] sm:$0xff] }
 0x195   : > { %1426 = vadd.xlane.f32.xlu0 %v1425_v49  ;;  %v6364_v40 = vpop.f32.mrf.mxu1 }
 0x196   : > { %5924 = vmatmul.mubr.msk.f32.gmra.mxu0 %vm880_vm0, %v7456_v60  ;;  %5932 = vmatmul.mubr.msk.f32.gmra.mxu1 %vm880_vm0, %v1236_v45  ;;  %v1343_v44 = vmul.f32 %v1266_v47, %v1266_v47  ;;  %v1416_v60 = vsel %vm880_vm0, %v1338_v54, 0.0  ;;  %v1434_v56 = vsel %vm880_vm0, %v1344_v55, 0.0 }
 0x197   : > { %1411 = vadd.xlane.f32.xlu1 %v1410_v51  ;;  %1707 = vmatprep.mubr.f32.mxu0 %v9943_v0  ;;  %v1275_v46 = vpop.f32.mrf.mxu1 }
 0x198   : > { %1755 = vmatprep.mubr.f32.mxu1 %v9943_v0  ;;  %v1431_v53 = vsel %vm880_vm0, %v1343_v44, 0.0  ;;  %v1276_v61 = vadd.f32 %v7410_v39, %v1275_v46 }
 0x199   : > { %1432 = vadd.xlane.f32.xlu0 %v1431_v53 }
 0x19a   : > { %5925 = vmatmul.mubr.msk.f32.gmra.mxu0 %vm880_vm0, %v7484_v57  ;;  %5933 = vmatmul.mubr.msk.f32.gmra.mxu1 %vm880_vm0, %v1241_v52  ;;  %v1345_v45 = vmul.f32 %v1276_v61, %v1276_v61  ;;  %v1428_v57 = vsel %vm880_vm0, %v1342_v9, 0.0  ;;  %v1281_v52 = vadd.f32 %v6364_v40, %v7410_v39  ;;  %v5942_v39 = vld [vmem:[%s7398_s25 + $0x8] sm:$0xff] }
 0x19b   : > { %1417 = vadd.xlane.f32.xlu1 %v1416_v60  ;;  %1761 = vmatprep.mubr.f32.mxu1 %v9943_v0 }
 0x19c   : > { %v1437_v11 = vsel %vm880_vm0, %v1345_v45, 0.0  ;;  %2685 = vmatprep.mubr.f32.mxu0 %v9943_v0  ;;  %v1346_v41 = vmul.f32 %v1281_v52, %v1281_v52 }
 0x19d   : > { %1438 = vadd.xlane.f32.xlu0 %v1437_v11 }
 0x19e   : > { %5934 = vmatmul.mubr.msk.f32.gmra.mxu1 %vm880_vm0, %v1246_v58  ;;  %v1440_v58 = vsel %vm880_vm0, %v1346_v41, 0.0 }
 0x19f   : > { %1423 = vadd.xlane.f32.xlu1 %v1422_v62  ;;  %1767 = vmatprep.mubr.f32.mxu1 %v9943_v0 }
 0x1a2   : > { %5935 = vmatmul.mubr.msk.f32.gmra.mxu1 %vm880_vm0, %v1251_v1 }
 0x1a3   : > { %1773 = vmatprep.mubr.f32.mxu1 %v9943_v0  ;;  %1429 = vadd.xlane.f32.xlu1 %v1428_v57 }
 0x1a6   : > { %5936 = vmatmul.mubr.msk.f32.gmra.mxu1 %vm880_vm0, %v1256_v38  ;;  %v6018_v38 = vld [vmem:[%s7122_s12 + $0x10] sm:$0xff] }
 0x1a7   : > { %1779 = vmatprep.mubr.f32.mxu1 %v9943_v0  ;;  %1435 = vadd.xlane.f32.xlu1 %v1434_v56 }
 0x1aa   : > { %5937 = vmatmul.mubr.msk.f32.gmra.mxu1 %vm880_vm0, %v1261_v48  ;;  %v6055_v48 = vld [vmem:[%s7195_s15 + $0x28] sm:$0xff] }
 0x1ab   : > { %1785 = vmatprep.mubr.f32.mxu1 %v9943_v0  ;;  %1441 = vadd.xlane.f32.xlu1 %v1440_v58 }
 0x1ae   : > { %5938 = vmatmul.mubr.msk.f32.gmra.mxu1 %vm880_vm0, %v1266_v47 }
 0x1af   : > { %1791 = vmatprep.mubr.f32.mxu1 %v9943_v0 }
 0x1b2   : > { %5939 = vmatmul.mubr.msk.f32.gmra.mxu1 %vm880_vm0, %v1271_v59 }
 0x1b3   : > { %1797 = vmatprep.mubr.f32.mxu1 %v9943_v0 }
 0x1b6   : > { %5940 = vmatmul.mubr.msk.f32.gmra.mxu1 %vm880_vm0, %v1276_v61 }
 0x1b7   : > { %1803 = vmatprep.mubr.f32.mxu1 %v9943_v0 }
 0x1ba   : > { %5941 = vmatmul.mubr.msk.f32.gmra.mxu1 %vm880_vm0, %v1281_v52 }
 0x1bb   : > { %2110 = vmatprep.mubr.f32.mxu1 %v9943_v0 }
 0x1be   : > { %5944 = vmatmul.mubr.msk.f32.vlgmr.msra.gmra.mxu1 %vm880_vm0, %v5942_v39 }
 0x1bf   : > { %6366 = vmatpush3.msra.mxu1 %v7474_v50  ;;  %6367 = vmatprep.mubr.msk.f32.mxu1 %vm880_vm0, %v7150_v2  ;;  %v5982_v50 = vld [vmem:[%s7195_s15 + $0x18] sm:$0xff] }
 0x1c0   : > { %3144 = vmatprep.subr.mxu1 %v7218_v13  ;;  %2651 = vmatprep.subr.mxu0 %v5982_v50 }
 0x1c1   : > { %2652 = vmatpush1.msra.mxu0 %v5981_v42 }
 0x1c2   : > { %6368 = vmatmul.mubr.msk.f32.vlgmr.msra.gmra.mxu1 %vm880_vm0, %v7155_v3  ;;  %4212 = vmatprep.subr.mxu0 %v7218_v13  ;;  %v6015_v13 = vld [vmem:[%s7398_s25 + $0x10] sm:$0xff] }
 0x1c3   : > { %6370 = vmatprep.mubr.msk.f32.mxu1 %vm880_vm0, %v7162_v4  ;;  %3145 = vmatpush1.msra.mxu1 %v7220_v14 }
 0x1c4   : > { %6415 = vmatprep.subr.mxu1 %v6018_v38 }
 0x1c6   : > { %6371 = vmatmul.mubr.msk.f32.gmra.mxu1 %vm880_vm0, %v7173_v5 }
 0x1c7   : > { %6373 = vmatprep.mubr.msk.f32.mxu1 %vm880_vm0, %v7178_v6 }
 0x1ca   : > { %6374 = vmatmul.mubr.msk.f32.gmra.mxu1 %vm880_vm0, %v7188_v7 }
 0x1cb   : > { %6376 = vmatprep.mubr.msk.f32.mxu1 %vm880_vm0, %v7200_v8 }
 0x1ce   : > { %6377 = vmatmul.mubr.msk.f32.gmra.mxu1 %vm880_vm0, %v7210_v10 }
 0x1cf   : > { %6379 = vmatprep.mubr.msk.f32.mxu1 %vm880_vm0, %v7216_v12 }
 0x1d2   : > { %6380 = vmatmul.mubr.msk.f32.gmra.mxu1 %vm880_vm0, %v7232_v15 }
 0x1d3   : > { %6382 = vmatprep.mubr.msk.f32.mxu1 %vm880_vm0, %v7237_v16 }
 0x1d6   : > { %6383 = vmatmul.mubr.msk.f32.gmra.mxu1 %vm880_vm0, %v7246_v17 }
 0x1d7   : > { %6385 = vmatprep.mubr.msk.f32.mxu1 %vm880_vm0, %v7251_v18 }
 0x1da   : > { %6386 = vmatmul.mubr.msk.f32.gmra.mxu1 %vm880_vm0, %v7260_v19 }
 0x1db   : > { %6388 = vmatprep.mubr.msk.f32.mxu1 %vm880_vm0, %v7265_v20 }
 0x1de   : > { %6389 = vmatmul.mubr.msk.f32.gmra.mxu1 %vm880_vm0, %v7274_v21 }
 0x1df   : > { %6391 = vmatprep.mubr.msk.f32.mxu1 %vm880_vm0, %v7279_v22 }
 0x1e2   : > { %6392 = vmatmul.mubr.msk.f32.gmra.mxu1 %vm880_vm0, %v7288_v23 }
 0x1e3   : > { %6394 = vmatprep.mubr.msk.f32.mxu1 %vm880_vm0, %v7293_v24 }
 0x1e6   : > { %6395 = vmatmul.mubr.msk.f32.gmra.mxu1 %vm880_vm0, %v7302_v25 }
 0x1e7   : > { %6397 = vmatprep.mubr.msk.f32.mxu1 %vm880_vm0, %v7307_v26 }
 0x1e8   : > { %v7658_v14 = vpop.xlane.xlu1 %1351 }
 0x1ea   : > { %6398 = vmatmul.mubr.msk.f32.gmra.mxu1 %vm880_vm0, %v7316_v27  ;;  %v1349_v54 = vpop.xlane.xlu0 %1348 }
 0x1eb   : > { %6400 = vmatprep.mubr.msk.f32.mxu1 %vm880_vm0, %v7321_v28 }
 0x1ee   : > { %6401 = vmatmul.mubr.msk.f32.gmra.mxu1 %vm880_vm0, %v7330_v29 }
 0x1ef   : > { %6403 = vmatprep.mubr.msk.f32.mxu1 %vm880_vm0, %v7335_v30 }
 0x1f2   : > { %6404 = vmatmul.mubr.msk.f32.gmra.mxu1 %vm880_vm0, %v7344_v31 }
 0x1f3   : > { %6406 = vmatprep.mubr.msk.f32.mxu1 %vm880_vm0, %v7349_v32 }
 0x1f6   : > { %6407 = vmatmul.mubr.msk.f32.gmra.mxu1 %vm880_vm0, %v7358_v33 }
 0x1f7   : > { %6409 = vmatprep.mubr.msk.f32.mxu1 %vm880_vm0, %v7363_v34 }
 0x1fa   : > { %6410 = vmatmul.mubr.msk.f32.gmra.mxu1 %vm880_vm0, %v7372_v35 }
 0x1fb   : > { %6412 = vmatprep.mubr.msk.f32.mxu1 %vm880_vm0, %v7377_v36 }
 0x1fe   : > { %6413 = vmatmul.mubr.msk.f32.gmra.mxu1 %vm880_vm0, %v7386_v37  ;;  %v7773_v61 = vpop.xlane.xlu0 %1378 }
 0x1ff   : > { %3178 = vmatprep.mubr.f32.mxu1 %v9943_v0 }
 0x202   : > { %6017 = vmatmul.mubr.msk.f32.vlgmr.msra.gmra.mxu1 %vm880_vm0, %v6015_v13 }
 0x203   : > { %6416 = vmatpush3.msra.mxu1 %v6018_v38  ;;  %6417 = vmatprep.mubr.msk.f32.mxu1 %vm880_vm0, %v7150_v2  ;;  %v7666_v2 = vpop.xlane.xlu1 %1357 }
 0x204   : > { %3719 = vmatprep.subr.mxu1 %v6055_v48 }
 0x206   : > { %6418 = vmatmul.mubr.msk.f32.vlgmr.msra.gmra.mxu1 %vm880_vm0, %v7155_v3  ;;  %v7668_v3 = vpop.f32.mrf.mxu0 }
 0x207   : > { %6420 = vmatprep.mubr.msk.f32.mxu1 %vm880_vm0, %v7162_v4  ;;  %10008 = vst [vmem:[#allocation28_spill] sm:$0xff] %v7668_v3  ;;  %3720 = vmatpush1.msra.mxu1 %v6054_v63  ;;  %v5370_v3 = vld [vmem:[%s7136_s4 + $0x20] sm:$0xff] }
 0x208   : > { %v7674_v4 = vpop.f32.mrf.mxu0 }
 0x209   : > { %10009 = vst [vmem:[#allocation29_spill] sm:$0xff] %v7674_v4 }
 0x20a   : > { %6421 = vmatmul.mubr.msk.f32.gmra.mxu1 %vm880_vm0, %v7173_v5  ;;  %v7678_v5 = vpop.xlane.xlu1 %1354 }
 0x20b   : > { %6423 = vmatprep.mubr.msk.f32.mxu1 %vm880_vm0, %v7178_v6 }
 0x20e   : > { %6424 = vmatmul.mubr.msk.f32.gmra.mxu1 %vm880_vm0, %v7188_v7 }
 0x20f   : > { %6426 = vmatprep.mubr.msk.f32.mxu1 %vm880_vm0, %v7200_v8  ;;  %v7690_v8 = vpop.xlane.xlu1 %1363 }
 0x212   : > { %6427 = vmatmul.mubr.msk.f32.gmra.mxu1 %vm880_vm0, %v7210_v10 }
 0x213   : > { %6429 = vmatprep.mubr.msk.f32.mxu1 %vm880_vm0, %v7216_v12 }
 0x216   : > { %6430 = vmatmul.mubr.msk.f32.gmra.mxu1 %vm880_vm0, %v7232_v15 }
 0x217   : > { %6432 = vmatprep.mubr.msk.f32.mxu1 %vm880_vm0, %v7237_v16  ;;  %v7702_v16 = vpop.xlane.xlu1 %1360 }
 0x21a   : > { %6433 = vmatmul.mubr.msk.f32.gmra.mxu1 %vm880_vm0, %v7246_v17 }
 0x21b   : > { %6435 = vmatprep.mubr.msk.f32.mxu1 %vm880_vm0, %v7251_v18 }
 0x21e   : > { %v7682_v6 = vpop.f32.mrf.mxu0  ;;  %6436 = vmatmul.mubr.msk.f32.gmra.mxu1 %vm880_vm0, %v7260_v19 }
 0x21f   : > { %6438 = vmatprep.mubr.msk.f32.mxu1 %vm880_vm0, %v7265_v20  ;;  %v7710_v20 = vpop.xlane.xlu1 %1369  ;;  %v1810_v45 = vmul.f32 2.0, %v7682_v6 }
 0x220   : > { %v7688_v7 = vpop.f32.mrf.mxu0 }
 0x221   : > { %v1811_v55 = vmul.f32 2.0, %v7688_v7  ;;  %v1874_v6 = vsub.f32 %v1349_v54, %v1810_v45  ;;  %v7791_v7 = vpop.xlane.xlu0 %1384 }
 0x222   : > { %v7692_v10 = vpop.f32.mrf.mxu0  ;;  %6439 = vmatmul.mubr.msk.f32.gmra.mxu1 %vm880_vm0, %v7274_v21 }
 0x223   : > { %6441 = vmatprep.mubr.msk.f32.mxu1 %vm880_vm0, %v7279_v22  ;;  %v1812_v38 = vmul.f32 2.0, %v7692_v10 }
 0x224   : > { %v7698_v12 = vpop.f32.mrf.mxu0 }
 0x225   : > { %v1813_v50 = vmul.f32 2.0, %v7698_v12 }
 0x226   : > { %v1631_v15 = vpop.f32.mrf.mxu0  ;;  %6442 = vmatmul.mubr.msk.f32.gmra.mxu1 %vm880_vm0, %v7288_v23 }
 0x227   : > { %6444 = vmatprep.mubr.msk.f32.mxu1 %vm880_vm0, %v7293_v24  ;;  %v7718_v24 = vpop.xlane.xlu1 %1366  ;;  %v1814_v62 = vmul.f32 2.0, %v1631_v15 }
 0x228   : > { %v1633_v17 = vpop.f32.mrf.mxu0 }
 0x229   : > { %v1815_v59 = vmul.f32 2.0, %v1633_v17  ;;  %v1878_v15 = vsub.f32 %v7678_v5, %v1814_v62 }
 0x22a   : > { %v1637_v18 = vpop.f32.mrf.mxu0  ;;  %6445 = vmatmul.mubr.msk.f32.gmra.mxu1 %vm880_vm0, %v7302_v25 }
 0x22b   : > { %6447 = vmatprep.mubr.msk.f32.mxu1 %vm880_vm0, %v7307_v26  ;;  %v1816_v57 = vmul.f32 2.0, %v1637_v18  ;;  %v1879_v17 = vsub.f32 %v7678_v5, %v1815_v59  ;;  %v1876_v59 = vsub.f32 %v7658_v14, %v1812_v38 }
 0x22c   : > { %v1639_v19 = vpop.f32.mrf.mxu0 }
 0x22d   : > { %v1817_v52 = vmul.f32 2.0, %v1639_v19 }
 0x22e   : > { %v1643_v21 = vpop.f32.mrf.mxu0  ;;  %6448 = vmatmul.mubr.msk.f32.gmra.mxu1 %vm880_vm0, %v7316_v27 }
 0x22f   : > { %6450 = vmatprep.mubr.msk.f32.mxu1 %vm880_vm0, %v7321_v28  ;;  %v7726_v28 = vpop.xlane.xlu1 %1375  ;;  %v1818_v56 = vmul.f32 2.0, %v1643_v21  ;;  %v1881_v10 = vsub.f32 %v7666_v2, %v1817_v52 }
 0x230   : > { %v1645_v22 = vpop.f32.mrf.mxu0 }
 0x231   : > { %v1819_v41 = vmul.f32 2.0, %v1645_v22  ;;  %v1880_v22 = vsub.f32 %v7666_v2, %v1816_v57  ;;  %v1882_v63 = vsub.f32 %v7702_v16, %v1818_v56  ;;  %v1938_v2 = vmin.f32 %v1874_v6, %v1878_v15  ;;  %v7815_v6 = vpop.xlane.xlu0 %1390 }
 0x232   : > { %v1649_v23 = vpop.f32.mrf.mxu0  ;;  %6451 = vmatmul.mubr.msk.f32.gmra.mxu1 %vm880_vm0, %v7330_v29 }
 0x233   : > { %6453 = vmatprep.mubr.msk.f32.mxu1 %vm880_vm0, %v7335_v30  ;;  %v1820_v42 = vmul.f32 2.0, %v1649_v23  ;;  %v1883_v45 = vsub.f32 %v7702_v16, %v1819_v41 }
 0x234   : > { %v1651_v25 = vpop.f32.mrf.mxu0 }
 0x235   : > { %v1821_v13 = vmul.f32 2.0, %v1651_v25  ;;  %v1875_v25 = vsub.f32 %v1349_v54, %v1811_v55  ;;  %v1884_v4 = vsub.f32 %v7690_v8, %v1820_v42 }
 0x236   : > { %v1655_v26 = vpop.f32.mrf.mxu0  ;;  %6454 = vmatmul.mubr.msk.f32.gmra.mxu1 %vm880_vm0, %v7344_v31  ;;  %v7738_v31 = vpop.xlane.xlu1 %1372 }
 0x237   : > { %6456 = vmatprep.mubr.msk.f32.mxu1 %vm880_vm0, %v7349_v32  ;;  %v1822_v18 = vmul.f32 2.0, %v1655_v26  ;;  %v1885_v57 = vsub.f32 %v7690_v8, %v1821_v13 }
 0x238   : > { %v1657_v27 = vpop.f32.mrf.mxu0 }
 0x239   : > { %v1823_v12 = vmul.f32 2.0, %v1657_v27  ;;  %v1975_v27 = vmin.f32 %v1875_v25, %v1879_v17 }
 0x23a   : > { %v1661_v43 = vpop.f32.mrf.mxu0  ;;  %6457 = vmatmul.mubr.msk.f32.gmra.mxu1 %vm880_vm0, %v7358_v33  ;;  %v7757_v40 = vpop.xlane.xlu1 %1381 }
 0x23b   : > { %6459 = vmatprep.mubr.msk.f32.mxu1 %vm880_vm0, %v7363_v34  ;;  %v1824_v23 = vmul.f32 2.0, %v1661_v43  ;;  %v1886_v43 = vsub.f32 %v7718_v24, %v1822_v18  ;;  %v1887_v56 = vsub.f32 %v7718_v24, %v1823_v12  ;;  %v1977_v38 = vmin.f32 %v1975_v27, %v1883_v45 }
 0x23c   : > { %v1663_v29 = vpop.f32.mrf.mxu0 }
 0x23d   : > { %v1825_v5 = vmul.f32 2.0, %v1663_v29  ;;  %v1939_v29 = vmin.f32 %v1876_v59, %v1880_v22  ;;  %v1888_v41 = vsub.f32 %v7710_v20, %v1824_v23  ;;  %v1979_v23 = vmin.f32 %v1977_v38, %v1887_v56 }
 0x23e   : > { %v7732_v30 = vpop.f32.mrf.mxu0  ;;  %v7734_v1 = vpop.f32.mrf.mxu1  ;;  %6460 = vmatmul.mubr.msk.f32.gmra.mxu1 %vm880_vm0, %v7372_v35 }
 0x23f   : > { %6462 = vmatprep.mubr.msk.f32.mxu1 %vm880_vm0, %v7377_v36  ;;  %v7775_v60 = vpop.xlane.xlu1 %1387  ;;  %v1826_v54 = vmul.f32 2.0, %v7732_v30  ;;  %v1941_v15 = vmin.f32 %v1939_v29, %v1884_v4 }
 0x240   : > { %v7742_v32 = vpop.f32.mrf.mxu1  ;;  %v7744_v33 = vpop.f32.mrf.mxu0 }
 0x241   : > { %v1890_v22 = vsub.f32 %v7738_v31, %v1826_v54  ;;  %v1943_v25 = vmin.f32 %v1941_v15, %v1888_v41 }
 0x242   : > { %v7746_v34 = vpop.f32.mrf.mxu0  ;;  %v7748_v49 = vpop.f32.mrf.mxu1  ;;  %6463 = vmatmul.mubr.msk.f32.gmra.mxu1 %vm880_vm0, %v7386_v37 }
 0x243   : > { %3753 = vmatprep.mubr.f32.mxu1 %v9943_v0  ;;  %v7793_v21 = vpop.xlane.xlu1 %1393  ;;  %v1877_v0 = vsub.f32 %v7658_v14, %v1813_v50  ;;  %v1940_v14 = vmin.f32 %v1938_v2, %v1882_v63  ;;  %v1889_v50 = vsub.f32 %v7710_v20, %v1825_v5  ;;  %v1828_v24 = vmul.f32 2.0, %v7746_v34 }
 0x244   : > { %v7753_v35 = vpop.f32.mrf.mxu0  ;;  %v7755_v47 = vpop.f32.mrf.mxu1 }
 0x245   : > { %v1976_v55 = vmin.f32 %v1877_v0, %v1881_v10  ;;  %v1827_v0 = vmul.f32 2.0, %v7744_v33  ;;  %v1942_v18 = vmin.f32 %v1940_v14, %v1886_v43  ;;  %v1829_v20 = vmul.f32 2.0, %v7753_v35 }
 0x246   : > { %v7759_v36 = vpop.f32.mrf.mxu0  ;;  %v7761_v51 = vpop.f32.mrf.mxu1 }
 0x247   : > { %v1830_v8 = vmul.f32 2.0, %v7759_v36  ;;  %v7817_v30 = vpop.xlane.xlu1 %1399  ;;  %v1978_v17 = vmin.f32 %v1976_v55, %v1885_v57  ;;  %v1891_v35 = vsub.f32 %v7738_v31, %v1827_v0  ;;  %v1944_v43 = vmin.f32 %v1942_v18, %v1890_v22 }
 0x248   : > { %v7763_v44 = vpop.f32.mrf.mxu0  ;;  %v7765_v46 = vpop.f32.mrf.mxu1 }
 0x249   : > { %v1831_v63 = vmul.f32 2.0, %v7763_v44  ;;  %v1980_v45 = vmin.f32 %v1978_v17, %v1889_v50  ;;  %v1894_v33 = vsub.f32 %v7773_v61, %v1830_v8  ;;  %v1893_v44 = vsub.f32 %v7726_v28, %v1829_v20 }
 0x24a   : > { %v7769_v37 = vpop.f32.mrf.mxu0  ;;  %v7771_v53 = vpop.f32.mrf.mxu1  ;;  %v1842_v17 = vmul.f32 2.0, %v7734_v1  ;;  %v1843_v1 = vmul.f32 2.0, %v7742_v32 }
 0x24b   : > { %v1832_v4 = vmul.f32 2.0, %v7769_v37  ;;  %v1895_v56 = vsub.f32 %v7773_v61, %v1831_v63  ;;  %v7839_v38 = vpop.xlane.xlu1 %1405  ;;  %v1982_v0 = vmin.f32 %v1980_v45, %v1893_v44  ;;  %v1844_v45 = vmul.f32 2.0, %v7748_v49 }
 0x24c   : > { %v7778_v9 = vpop.f32.mrf.mxu0  ;;  %v7780_v11 = vpop.f32.mrf.mxu1 }
 0x24d   : > { %v1833_v34 = vmul.f32 2.0, %v7778_v9  ;;  %v1397_v9 = vpop.xlane.xlu0 %1396  ;;  %v1896_v41 = vsub.f32 %v7757_v40, %v1832_v4 }
 0x24e   : > { %v1691_v58 = vpop.f32.mrf.mxu0  ;;  %v7783_v39 = vpop.f32.mrf.mxu1  ;;  %v1907_v44 = vsub.f32 %v1397_v9, %v1843_v1 }
 0x24f   : > { %v1834_v10 = vmul.f32 2.0, %v1691_v58  ;;  %v1892_v58 = vsub.f32 %v7726_v28, %v1828_v24 }
 0x250   : > { %v1693_v19 = vpop.f32.mrf.mxu0  ;;  %v7789_v48 = vpop.f32.mrf.mxu1 }
 0x251   : > { %v1835_v2 = vmul.f32 2.0, %v1693_v19  ;;  %v1898_v37 = vsub.f32 %v7791_v7, %v1834_v10  ;;  %v1946_v19 = vmin.f32 %v1944_v43, %v1894_v33 }
 0x252   : > { %v1697_v26 = vpop.f32.mrf.mxu0  ;;  %v7799_v62 = vpop.f32.mrf.mxu1 }
 0x253   : > { %v1836_v27 = vmul.f32 2.0, %v1697_v26  ;;  %v1897_v26 = vsub.f32 %v7757_v40, %v1833_v34  ;;  %v1899_v15 = vsub.f32 %v7791_v7, %v1835_v2  ;;  %v1948_v24 = vmin.f32 %v1946_v19, %v1898_v37  ;;  %v1403_v40 = vpop.xlane.xlu0 %1402  ;;  %v7858_v34 = vpop.xlane.xlu1 %1411 }
 0x254   : > { %v1699_v52 = vpop.f32.mrf.mxu0  ;;  %v7807_v16 = vpop.f32.mrf.mxu1  ;;  %v1908_v37 = vsub.f32 %v7817_v30, %v1844_v45 }
 0x255   : > { %v1837_v54 = vmul.f32 2.0, %v1699_v52  ;;  %v1981_v52 = vmin.f32 %v1979_v23, %v1891_v35  ;;  %v1900_v61 = vsub.f32 %v7775_v60, %v1836_v27 }
 0x256   : > { %v1703_v42 = vpop.f32.mrf.mxu0  ;;  %v7813_v13 = vpop.f32.mrf.mxu1 }
 0x257   : > { %v1838_v5 = vmul.f32 2.0, %v1703_v42  ;;  %v1945_v42 = vmin.f32 %v1943_v25, %v1892_v58  ;;  %v1901_v18 = vsub.f32 %v7775_v60, %v1837_v54  ;;  %v1983_v20 = vmin.f32 %v1981_v52, %v1895_v56  ;;  %v1409_v2 = vpop.xlane.xlu0 %1408 }
 0x258   : > { %v1705_v36 = vpop.f32.mrf.mxu0  ;;  %v7823_v12 = vpop.f32.mrf.mxu1  ;;  %v1984_v25 = vmin.f32 %v1982_v0, %v1897_v26  ;;  %v1847_v54 = vmul.f32 2.0, %v7765_v46  ;;  %v1849_v56 = vmul.f32 2.0, %v7780_v11  ;;  %v1851_v11 = vmul.f32 2.0, %v7789_v48 }
 0x259   : > { %v1839_v14 = vmul.f32 2.0, %v1705_v36  ;;  %v1902_v28 = vsub.f32 %v7815_v6, %v1838_v5  ;;  %v1947_v10 = vmin.f32 %v1945_v42, %v1896_v41  ;;  %v1985_v60 = vmin.f32 %v1983_v20, %v1899_v15  ;;  %v1418_v46 = vpop.xlane.xlu1 %1417 }
 0x25a   : > { %v1709_v59 = vpop.f32.mrf.mxu0  ;;  %v7829_v57 = vpop.f32.mrf.mxu1  ;;  %v1906_v5 = vsub.f32 %v1397_v9, %v1842_v17  ;;  %v1986_v35 = vmin.f32 %v1984_v25, %v1901_v18  ;;  %v1850_v41 = vmul.f32 2.0, %v7783_v39  ;;  %v6647_v9 = vld [vmem:[%s7195_s15] sm:$0xff]  ;;  %v1852_v39 = vmul.f32 2.0, %v7799_v62 }
 0x25b   : > { %v1840_v31 = vmul.f32 2.0, %v1709_v59  ;;  %v1903_v36 = vsub.f32 %v7815_v6, %v1839_v14  ;;  %v1950_v63 = vmin.f32 %v1948_v24, %v1902_v28  ;;  %v1949_v33 = vmin.f32 %v1947_v10, %v1900_v61  ;;  %v6646_v28 = vld [vmem:[%s7195_s15 + $0x8] sm:$0xff] }
 0x25c   : > { %v1711_v29 = vpop.f32.mrf.mxu0  ;;  %v7835_v55 = vpop.f32.mrf.mxu1  ;;  %v1845_v59 = vmul.f32 2.0, %v7755_v47  ;;  %v1846_v6 = vmul.f32 2.0, %v7761_v51  ;;  %v1848_v47 = vmul.f32 2.0, %v7771_v53  ;;  %v7874_v52 = vmul.f32 %v6647_v9, %v6647_v9 }
 0x25d   : > { %v1841_v50 = vmul.f32 2.0, %v1711_v29  ;;  %v1904_v23 = vsub.f32 %v7793_v21, %v1840_v31  ;;  %v1952_v43 = vmin.f32 %v1950_v63, %v1906_v5  ;;  %v1415_v31 = vpop.xlane.xlu0 %1414  ;;  %v1913_v17 = vsub.f32 %v7839_v38, %v1849_v56 }
 0x25e   : > { %v7843_v8 = vpop.f32.mrf.mxu1  ;;  %v1909_v51 = vsub.f32 %v7817_v30, %v1845_v59  ;;  %v1910_v29 = vsub.f32 %v1403_v40, %v1846_v6  ;;  %v1911_v30 = vsub.f32 %v1403_v40, %v1847_v54  ;;  %v1912_v61 = vsub.f32 %v7839_v38, %v1848_v47 }
 0x25f   : > { %v1905_v7 = vsub.f32 %v7793_v21, %v1841_v50  ;;  %v1987_v21 = vmin.f32 %v1985_v60, %v1903_v36  ;;  %v1951_v27 = vmin.f32 %v1949_v33, %v1904_v23  ;;  %v7871_v50 = vmul.f32 %v6646_v28, %v6646_v28 }
 0x260   : > { %v7849_v22 = vpop.f32.mrf.mxu1  ;;  %v1954_v42 = vmin.f32 %v1952_v43, %v1910_v29  ;;  %v1914_v0 = vsub.f32 %v1409_v2, %v1850_v41  ;;  %v1853_v24 = vmul.f32 2.0, %v7807_v16  ;;  %v1854_v18 = vmul.f32 2.0, %v7813_v13 }
 0x261   : > { %v1988_v32 = vmin.f32 %v1986_v35, %v1905_v7  ;;  %v1989_v19 = vmin.f32 %v1987_v21, %v1907_v44  ;;  %v1953_v26 = vmin.f32 %v1951_v27, %v1908_v37  ;;  %v1855_v10 = vmul.f32 2.0, %v7823_v12  ;;  %v1421_v25 = vpop.xlane.xlu0 %1420  ;;  %v1424_v12 = vpop.xlane.xlu1 %1423 }
 0x262   : > { %v7854_v4 = vpop.f32.mrf.mxu1  ;;  %v1956_v40 = vmin.f32 %v1954_v42, %v1914_v0  ;;  %v1856_v63 = vmul.f32 2.0, %v7829_v57  ;;  %v1915_v1 = vsub.f32 %v1409_v2, %v1851_v11  ;;  %v1916_v62 = vsub.f32 %v7858_v34, %v1852_v39 }
 0x263   : > { %v1990_v53 = vmin.f32 %v1988_v32, %v1909_v51  ;;  %v1991_v36 = vmin.f32 %v1989_v19, %v1911_v30  ;;  %v1955_v23 = vmin.f32 %v1953_v26, %v1912_v61  ;;  %v1857_v38 = vmul.f32 2.0, %v7835_v55 }
 0x264   : > { %v7862_v58 = vpop.f32.mrf.mxu1  ;;  %v1858_v16 = vmul.f32 2.0, %v7843_v8  ;;  %v1451_v13 = vrot.slane %v7871_v50, 4  ;;  %v1445_v45 = vrot.slane %v7874_v52, 4  ;;  %v1917_v60 = vsub.f32 %v7858_v34, %v1853_v24 }
 0x265   : > { %v1992_v7 = vmin.f32 %v1990_v53, %v1913_v17  ;;  %v1918_v33 = vsub.f32 %v1415_v31, %v1854_v18  ;;  %v1919_v59 = vsub.f32 %v1415_v31, %v1855_v10  ;;  %v1993_v57 = vmin.f32 %v1991_v36, %v1915_v1  ;;  %v1427_v2 = vpop.xlane.xlu0 %1426  ;;  %v1430_v47 = vpop.xlane.xlu1 %1429 }
 0x266   : > { %v1775_v49 = vpop.f32.mrf.mxu1  ;;  %v1957_v6 = vmin.f32 %v1955_v23, %v1916_v62  ;;  %v1859_v35 = vmul.f32 2.0, %v7849_v22  ;;  %v1920_v27 = vsub.f32 %v1418_v46, %v1856_v63  ;;  %v1921_v32 = vsub.f32 %v1418_v46, %v1857_v38 }
 0x267   : > { %v1958_v21 = vmin.f32 %v1956_v40, %v1918_v33  ;;  %v1994_v55 = vmin.f32 %v1992_v7, %v1917_v60  ;;  %v1862_v43 = vmul.f32 2.0, %v1775_v49  ;;  %v1922_v44 = vsub.f32 %v1421_v25, %v1858_v16 }
 0x268   : > { %v1777_v14 = vpop.f32.mrf.mxu1  ;;  %v1860_v37 = vmul.f32 2.0, %v7854_v4  ;;  %v1861_v34 = vmul.f32 2.0, %v7862_v58  ;;  %v1995_v31 = vmin.f32 %v1993_v57, %v1919_v59  ;;  %v1959_v22 = vmin.f32 %v1957_v6, %v1920_v27 }
 0x269   : > { %v1863_v51 = vmul.f32 2.0, %v1777_v14  ;;  %v1923_v19 = vsub.f32 %v1421_v25, %v1859_v35  ;;  %v1433_v28 = vpop.xlane.xlu0 %1432  ;;  %v1996_v9 = vmin.f32 %v1994_v55, %v1921_v32  ;;  %v1960_v49 = vmin.f32 %v1958_v21, %v1922_v44  ;;  %v1436_v11 = vpop.xlane.xlu1 %1435  ;;  %v7900_v32 = vld [vmem:[%s7407_s22 + $0x1] ss:$0 sm:$0xff] }
 0x26a   : > { %v1781_v15 = vpop.f32.mrf.mxu1  ;;  %v1926_v42 = vsub.f32 %v1427_v2, %v1862_v43  ;;  %v1924_v30 = vsub.f32 %v1424_v12, %v1860_v37  ;;  %v1925_v58 = vsub.f32 %v1424_v12, %v1861_v34  ;;  %v1446_v24 = vadd.f32 %v1445_v45, %v7874_v52 }
 0x26b   : > { %v1864_v54 = vmul.f32 2.0, %v1781_v15  ;;  %v1927_v14 = vsub.f32 %v1427_v2, %v1863_v51  ;;  %v1997_v23 = vmin.f32 %v1995_v31, %v1923_v19  ;;  %v1452_v6 = vadd.f32 %v1451_v13, %v7871_v50 }
 0x26c   : > { %v1783_v20 = vpop.f32.mrf.mxu1  ;;  %v1961_v18 = vmin.f32 %v1959_v22, %v1924_v30  ;;  %v1998_v25 = vmin.f32 %v1996_v9, %v1925_v58  ;;  %v1962_v40 = vmin.f32 %v1960_v49, %v1926_v42  ;;  %v1447_v35 = vrot.slane %v1446_v24, 2  ;;  %v7907_v42 = vld [vmem:[%s7122_s12 + $0x18] sm:$0xff] }
 0x26d   : > { %v1865_v29 = vmul.f32 2.0, %v1783_v20  ;;  %v1928_v4 = vsub.f32 %v1430_v47, %v1864_v54  ;;  %v1439_v36 = vpop.xlane.xlu0 %1438  ;;  %v1442_v16 = vpop.xlane.xlu1 %1441  ;;  %v1999_v12 = vmin.f32 %v1997_v23, %v1927_v14  ;;  %v1453_v34 = vrot.slane %v1452_v6, 2 }
 0x26e   : > { %v1787_v48 = vpop.f32.mrf.mxu1  ;;  %v10012_v58 = vmov 0.0  }
 0x26f   : > { %v1866_v56 = vmul.f32 2.0, %v1787_v48  ;;  %v1929_v39 = vsub.f32 %v1430_v47, %v1865_v29  ;;  %v1963_v48 = vmin.f32 %v1961_v18, %v1928_v4  ;;  %v1448_v29 = vadd.f32 %v1447_v35, %v1446_v24 }
 0x270   : > { %v1789_v5 = vpop.f32.mrf.mxu1 }
 0x271   : > { %v1867_v46 = vmul.f32 2.0, %v1789_v5  ;;  %v1930_v17 = vsub.f32 %v1433_v28, %v1866_v56  ;;  %v2000_v60 = vmin.f32 %v1998_v25, %v1929_v39  ;;  %v1449_v49 = vrot.slane %v1448_v29, 1 }
 0x272   : > { %v1793_v8 = vpop.f32.mrf.mxu1 }
 0x273   : > { %v1868_v26 = vmul.f32 2.0, %v1793_v8  ;;  %v1931_v63 = vsub.f32 %v1433_v28, %v1867_v46  ;;  %v1964_v33 = vmin.f32 %v1962_v40, %v1930_v17  ;;  %v1454_v28 = vadd.f32 %v1453_v34, %v1452_v6 }
 0x274   : > { %v1795_v41 = vpop.f32.mrf.mxu1 }
 0x275   : > { %v1869_v15 = vmul.f32 2.0, %v1795_v41  ;;  %v1932_v20 = vsub.f32 %v1436_v11, %v1868_v26  ;;  %v2001_v2 = vmin.f32 %v1999_v12, %v1931_v63  ;;  %v1455_v24 = vrot.slane %v1454_v28, 1 }
 0x276   : > { %v1799_v53 = vpop.f32.mrf.mxu1 }
 0x277   : > { %v1870_v61 = vmul.f32 2.0, %v1799_v53  ;;  %v1933_v1 = vsub.f32 %v1436_v11, %v1869_v15  ;;  %v1965_v52 = vmin.f32 %v1963_v48, %v1932_v20  ;;  %v6648_v15 = vld [vmem:[#allocation2] sm:$0xff] }
 0x278   : > { %v1801_v0 = vpop.f32.mrf.mxu1 }
 0x279   : > { %v1871_v10 = vmul.f32 2.0, %v1801_v0  ;;  %v1934_v62 = vsub.f32 %v1439_v36, %v1870_v61  ;;  %v2002_v27 = vmin.f32 %v2000_v60, %v1933_v1 }
 0x27a   : > { %v1805_v7 = vpop.f32.mrf.mxu1 }
 0x27b   : > { %v1872_v38 = vmul.f32 2.0, %v1805_v7  ;;  %v1935_v45 = vsub.f32 %v1439_v36, %v1871_v10  ;;  %v1966_v55 = vmin.f32 %v1964_v33, %v1934_v62  ;;  %v1450_v10 = vadd.f32 %v1449_v49, %v1448_v29 }
 0x27c   : > { %v1807_v5 = vpop.f32.mrf.mxu1  ;;  %v1456_v62 = vadd.f32 %v1455_v24, %v1454_v28 }
 0x27d   : > { %v1936_v59 = vsub.f32 %v1442_v16, %v1872_v38  ;;  %v1873_v57 = vmul.f32 2.0, %v1807_v5  ;;  %v2003_v37 = vmin.f32 %v2001_v2, %v1935_v45 }
 0x27e   : > { %v7897_v21 = vpop.f32.mrf.mxu1 }
 0x27f   : > { %10010 = vst [vmem:[#allocation30_spill] sm:$0xff] %v7897_v21  ;;  %v1967_v43 = vmin.f32 %v1965_v52, %v1936_v59  ;;  %v1937_v8 = vsub.f32 %v1442_v16, %v1873_v57 }
 0x280   : > { %v7902_v44 = vpop.f32.mrf.mxu1 }
 0x281   : > { %10011 = vst [vmem:[#allocation31_spill] sm:$0xff] %v7902_v44  ;;  %v1968_v54 = vmin.f32 %v1966_v55, %v1967_v43  ;;  %v2004_v47 = vmin.f32 %v2002_v27, %v1937_v8 }
 0x282   : > { %v6369_v51 = vpop.f32.mrf.mxu1 }
 0x283   : > { %v1969_v50 = vrot.slane %v1968_v54, 4  ;;  %v2005_v13 = vmin.f32 %v2003_v37, %v2004_v47  ;;  %v2199_v56 = vadd.f32 %v6369_v51, %v7900_v32 }
 0x284   : > { %v2193_v41 = vpop.f32.mrf.mxu1 }
 0x285   : > { %v1970_v31 = vmin.f32 %v1968_v54, %v1969_v50  ;;  %v2006_v22 = vrot.slane %v2005_v13, 4  ;;  %v2194_v19 = vadd.f32 %v7900_v32, %v2193_v41  ;;  %v2384_v26 = vmul.f32 %v2199_v56, %v2199_v56 }
 0x286   : > { %v6372_v9 = vpop.f32.mrf.mxu1 }
 0x287   : > { %v1971_v46 = vrot.slane %v1970_v31, 2  ;;  %v2007_v53 = vmin.f32 %v2005_v13, %v2006_v22  ;;  %v2209_v30 = vadd.f32 %v6372_v9, %v7900_v32  ;;  %5983 = vmatmul.mubr.msk.f32.vlgmr.msra.gmra.mxu0 %vm880_vm0, %v2194_v19  ;;  %v2418_v4 = vsel %vm880_vm0, %v2384_v26, 0.0 }
 0x288   : > { %4213 = vmatpush1.msra.mxu0 %v6648_v15  ;;  %2419 = vadd.xlane.f32.xlu0 %v2418_v4  ;;  %v2203_v61 = vpop.f32.mrf.mxu1  ;;  %v2383_v11 = vmul.f32 %v2194_v19, %v2194_v19 }
 0x289   : > { %2691 = vmatprep.mubr.f32.mxu0 %v10012_v58  ;;  %v2386_v14 = vmul.f32 %v2209_v30, %v2209_v30  ;;  %v1972_v39 = vmin.f32 %v1970_v31, %v1971_v46  ;;  %v2008_v17 = vrot.slane %v2007_v53, 2  ;;  %6465 = vmatprep.subr.mxu0 %v7907_v42  ;;  %v2204_v18 = vadd.f32 %v7900_v32, %v2203_v61 }
 0x28a   : > { %v6375_v0 = vpop.f32.mrf.mxu1  ;;  %v2415_v20 = vsel %vm880_vm0, %v2383_v11, 0.0 }
 0x28b   : > { %5984 = vmatmul.mubr.msk.f32.gmra.mxu0 %vm880_vm0, %v2199_v56  ;;  %v1973_v36 = vrot.slane %v1972_v39, 1  ;;  %v2009_v25 = vmin.f32 %v2007_v53, %v2008_v17  ;;  %v2219_v40 = vadd.f32 %v6375_v0, %v7900_v32  ;;  %v2424_v7 = vsel %vm880_vm0, %v2386_v14, 0.0 }
 0x28c   : > { %v2213_v23 = vpop.f32.mrf.mxu1  ;;  %2416 = vadd.xlane.f32.xlu0 %v2415_v20  ;;  %2697 = vmatprep.mubr.f32.mxu0 %v10012_v58  ;;  %v2385_v16 = vmul.f32 %v2204_v18, %v2204_v18 }
 0x28d   : > { %v2214_v63 = vadd.f32 %v7900_v32, %v2213_v23  ;;  %v1974_v48 = vmin.f32 %v1972_v39, %v1973_v36  ;;  %v2010_v38 = vrot.slane %v2009_v25, 1  ;;  %v2388_v59 = vmul.f32 %v2219_v40, %v2219_v40 }
 0x28e   : > { %v6378_v1 = vpop.f32.mrf.mxu1  ;;  %v2421_v2 = vsel %vm880_vm0, %v2385_v16, 0.0 }
 0x28f   : > { %5985 = vmatmul.mubr.msk.f32.gmra.mxu0 %vm880_vm0, %v2204_v18  ;;  %v2387_v12 = vmul.f32 %v2214_v63, %v2214_v63  ;;  %v2012_v60 = vadd.f32 %v1974_v48, %v1450_v10  ;;  %v2011_v5 = vmin.f32 %v2009_v25, %v2010_v38  ;;  %v2229_v52 = vadd.f32 %v6378_v1, %v7900_v32 }
 0x290   : > { %v2223_v33 = vpop.f32.mrf.mxu1  ;;  %2425 = vadd.xlane.f32.xlu0 %v2424_v7  ;;  %2703 = vmatprep.mubr.f32.mxu0 %v10012_v58  ;;  %v2430_v8 = vsel %vm880_vm0, %v2388_v59, 0.0 }
 0x291   : > { %v2427_v45 = vsel %vm880_vm0, %v2387_v12, 0.0  ;;  %v2013_v6 = vadd.f32 %v2011_v5, %v1456_v62  ;;  %v2014_v35 = vmax.f32 %v2012_v60, 0.0  ;;  %v2224_v43 = vadd.f32 %v7900_v32, %v2223_v33 }
 0x292   : > { %v6381_v57 = vpop.f32.mrf.mxu1  ;;  %2428 = vadd.xlane.f32.xlu1 %v2427_v45  ;;  %v2390_v37 = vmul.f32 %v2229_v52, %v2229_v52 }
 0x293   : > { %5986 = vmatmul.mubr.msk.f32.gmra.mxu0 %vm880_vm0, %v2209_v30  ;;  %v2015_v55 = vmax.f32 %v2013_v6, 0.0  ;;  %v2016_v47 = vsel %vm1302_vm1, %v2014_v35, 0.0  ;;  %v2389_v56 = vmul.f32 %v2224_v43, %v2224_v43  ;;  %v2239_v19 = vadd.f32 %v6381_v57, %v7900_v32 }
 0x294   : > { %v2233_v27 = vpop.f32.mrf.mxu1  ;;  %2422 = vadd.xlane.f32.xlu0 %v2421_v2  ;;  %2709 = vmatprep.mubr.f32.mxu0 %v10012_v58  ;;  %v2436_v13 = vsel %vm880_vm0, %v2390_v37, 0.0 }
 0x295   : > { %v2017_v34 = vsel %vm1302_vm1, %v2015_v55, 0.0  ;;  %v2433_v28 = vsel %vm880_vm0, %v2389_v56, 0.0  ;;  %v2392_v4 = vmul.f32 %v2239_v19, %v2239_v19  ;;  %v2234_v11 = vadd.f32 %v7900_v32, %v2233_v27 }
 0x296   : > { %v6384_v54 = vpop.f32.mrf.mxu1  ;;  %v2018_v51 = vadd.f32 %v2017_v34, %v2016_v47 }
 0x297   : > { %5987 = vmatmul.mubr.msk.f32.gmra.mxu0 %vm880_vm0, %v2214_v63  ;;  %v2249_v17 = vadd.f32 %v6384_v54, %v7900_v32  ;;  %v2442_v24 = vsel %vm880_vm0, %v2392_v4, 0.0  ;;  %v2391_v10 = vmul.f32 %v2234_v11, %v2234_v11 }
 0x298   : > { %v2243_v29 = vpop.f32.mrf.mxu1  ;;  %2431 = vadd.xlane.f32.xlu0 %v2430_v8  ;;  %2715 = vmatprep.mubr.f32.mxu0 %v10012_v58 }
 0x299   : > { %v2244_v50 = vadd.f32 %v7900_v32, %v2243_v29  ;;  %v2394_v63 = vmul.f32 %v2249_v17, %v2249_v17  ;;  %v2439_v1 = vsel %vm880_vm0, %v2391_v10, 0.0 }
 0x29a   : > { %v6387_v41 = vpop.f32.mrf.mxu1 }
 0x29b   : > { %5988 = vmatmul.mubr.msk.f32.gmra.mxu0 %vm880_vm0, %v2219_v40  ;;  %v2393_v31 = vmul.f32 %v2244_v50, %v2244_v50  ;;  %v2259_v23 = vadd.f32 %v6387_v41, %v7900_v32  ;;  %v2448_v33 = vsel %vm880_vm0, %v2394_v63, 0.0  ;;  %v8069_v63 = vld [vmem:[%s7407_s22 + $0x2] ss:$0 sm:$0xff] }
 0x29c   : > { %v2253_v22 = vpop.f32.mrf.mxu1  ;;  %2437 = vadd.xlane.f32.xlu0 %v2436_v13  ;;  %2721 = vmatprep.mubr.f32.mxu0 %v10012_v58 }
 0x29d   : > { %v7940_v26 = vadd.f32 %v7900_v32, %v2253_v22  ;;  %v2445_v9 = vsel %vm880_vm0, %v2393_v31, 0.0  ;;  %v2396_v16 = vmul.f32 %v2259_v23, %v2259_v23 }
 0x29e   : > { %v6390_v49 = vpop.f32.mrf.mxu1  ;;  %2446 = vadd.xlane.f32.xlu1 %v2445_v9 }
 0x29f   : > { %5989 = vmatmul.mubr.msk.f32.gmra.mxu0 %vm880_vm0, %v2224_v43  ;;  %v2395_v46 = vmul.f32 %v7940_v26, %v7940_v26  ;;  %v7978_v12 = vadd.f32 %v6390_v49, %v7900_v32  ;;  %v2454_v57 = vsel %vm880_vm0, %v2396_v16, 0.0 }
 0x2a0   : > { %v2263_v53 = vpop.f32.mrf.mxu1  ;;  %2434 = vadd.xlane.f32.xlu0 %v2433_v28  ;;  %2727 = vmatprep.mubr.f32.mxu0 %v10012_v58 }
 0x2a1   : > { %v7949_v30 = vadd.f32 %v7900_v32, %v2263_v53  ;;  %v2451_v15 = vsel %vm880_vm0, %v2395_v46, 0.0  ;;  %v2398_v2 = vmul.f32 %v7978_v12, %v7978_v12 }
 0x2a2   : > { %v6393_v61 = vpop.f32.mrf.mxu1  ;;  %2452 = vadd.xlane.f32.xlu1 %v2451_v15 }
 0x2a3   : > { %5990 = vmatmul.mubr.msk.f32.gmra.mxu0 %vm880_vm0, %v2229_v52  ;;  %v2397_v14 = vmul.f32 %v7949_v30, %v7949_v30  ;;  %v7991_v6 = vadd.f32 %v6393_v61, %v7900_v32  ;;  %v2460_v47 = vsel %vm880_vm0, %v2398_v2, 0.0 }
 0x2a4   : > { %v2273_v39 = vpop.f32.mrf.mxu1  ;;  %2019 = vadd.xlane.f32.xlu0 %v2018_v51  ;;  %2733 = vmatprep.mubr.f32.mxu0 %v10012_v58 }
 0x2a5   : > { %v7959_v0 = vadd.f32 %v7900_v32, %v2273_v39  ;;  %v2457_v18 = vsel %vm880_vm0, %v2397_v14, 0.0  ;;  %v2400_v34 = vmul.f32 %v7991_v6, %v7991_v6 }
 0x2a6   : > { %v6396_v20 = vpop.f32.mrf.mxu1  ;;  %2458 = vadd.xlane.f32.xlu1 %v2457_v18 }
 0x2a7   : > { %5991 = vmatmul.mubr.msk.f32.gmra.mxu0 %vm880_vm0, %v2234_v11  ;;  %v2399_v36 = vmul.f32 %v7959_v0, %v7959_v0  ;;  %v8003_v8 = vadd.f32 %v6396_v20, %v7900_v32  ;;  %v2466_v22 = vsel %vm880_vm0, %v2400_v34, 0.0 }
 0x2a8   : > { %v2283_v25 = vpop.f32.mrf.mxu1  ;;  %2443 = vadd.xlane.f32.xlu0 %v2442_v24  ;;  %2739 = vmatprep.mubr.f32.mxu0 %v10012_v58 }
 0x2a9   : > { %v7969_v40 = vadd.f32 %v7900_v32, %v2283_v25  ;;  %v2463_v7 = vsel %vm880_vm0, %v2399_v36, 0.0  ;;  %v2402_v56 = vmul.f32 %v8003_v8, %v8003_v8 }
 0x2aa   : > { %v6399_v48 = vpop.f32.mrf.mxu1  ;;  %2464 = vadd.xlane.f32.xlu1 %v2463_v7 }
 0x2ab   : > { %5992 = vmatmul.mubr.msk.f32.gmra.mxu0 %vm880_vm0, %v2239_v19  ;;  %v2401_v62 = vmul.f32 %v7969_v40, %v7969_v40  ;;  %v8021_v41 = vadd.f32 %v6399_v48, %v7900_v32  ;;  %v2472_v49 = vsel %vm880_vm0, %v2402_v56, 0.0 }
 0x2ac   : > { %v2293_v38 = vpop.f32.mrf.mxu1  ;;  %2440 = vadd.xlane.f32.xlu0 %v2439_v1  ;;  %2745 = vmatprep.mubr.f32.mxu0 %v10012_v58 }
 0x2ad   : > { %v7981_v60 = vadd.f32 %v7900_v32, %v2293_v38  ;;  %v2469_v5 = vsel %vm880_vm0, %v2401_v62, 0.0  ;;  %v2404_v4 = vmul.f32 %v8021_v41, %v8021_v41 }
 0x2ae   : > { %v6402_v52 = vpop.f32.mrf.mxu1  ;;  %2470 = vadd.xlane.f32.xlu1 %v2469_v5 }
 0x2af   : > { %5993 = vmatmul.mubr.msk.f32.gmra.mxu0 %vm880_vm0, %v2244_v50  ;;  %v2403_v45 = vmul.f32 %v7981_v60, %v7981_v60  ;;  %v8034_v46 = vadd.f32 %v6402_v52, %v7900_v32 }
 0x2b0   : > { %v2303_v59 = vpop.f32.mrf.mxu1  ;;  %2449 = vadd.xlane.f32.xlu0 %v2448_v33  ;;  %2751 = vmatprep.mubr.f32.mxu0 %v10012_v58 }
 0x2b1   : > { %v7994_v35 = vadd.f32 %v7900_v32, %v2303_v59  ;;  %v2475_v27 = vsel %vm880_vm0, %v2403_v45, 0.0  ;;  %v2406_v24 = vmul.f32 %v8034_v46, %v8034_v46 }
 0x2b2   : > { %v6405_v55 = vpop.f32.mrf.mxu1  ;;  %2476 = vadd.xlane.f32.xlu1 %v2475_v27 }
 0x2b3   : > { %5994 = vmatmul.mubr.msk.f32.gmra.mxu0 %vm880_vm0, %v2249_v17  ;;  %v2405_v43 = vmul.f32 %v7994_v35, %v7994_v35  ;;  %v2478_v17 = vsel %vm880_vm0, %v2404_v4, 0.0 }
 0x2b4   : > { %v2313_v37 = vpop.f32.mrf.mxu1  ;;  %2757 = vmatprep.mubr.f32.mxu0 %v10012_v58  ;;  %2455 = vadd.xlane.f32.xlu0 %v2454_v57 }
 0x2b5   : > { %v8007_v54 = vadd.f32 %v7900_v32, %v2313_v37  ;;  %v2481_v51 = vsel %vm880_vm0, %v2405_v43, 0.0 }
 0x2b6   : > { %v6408_v29 = vpop.f32.mrf.mxu1  ;;  %2482 = vadd.xlane.f32.xlu1 %v2481_v51 }
 0x2b7   : > { %5995 = vmatmul.mubr.msk.f32.gmra.mxu0 %vm880_vm0, %v7940_v26  ;;  %v2407_v50 = vmul.f32 %v8007_v54, %v8007_v54  ;;  %v8072_v7 = vadd.f32 %v6408_v29, %v7900_v32 }
 0x2b8   : > { %v2323_v13 = vpop.f32.mrf.mxu1  ;;  %2763 = vmatprep.mubr.f32.mxu0 %v10012_v58  ;;  %2461 = vadd.xlane.f32.xlu0 %v2460_v47 }
 0x2b9   : > { %v8024_v31 = vadd.f32 %v7900_v32, %v2323_v13  ;;  %v2487_v19 = vsel %vm880_vm0, %v2407_v50, 0.0  ;;  %v2410_v5 = vmul.f32 %v8072_v7, %v8072_v7 }
 0x2ba   : > { %v6411_v26 = vpop.f32.mrf.mxu1  ;;  %2488 = vadd.xlane.f32.xlu1 %v2487_v19 }
 0x2bb   : > { %5996 = vmatmul.mubr.msk.f32.gmra.mxu0 %vm880_vm0, %v2259_v23  ;;  %v2409_v28 = vmul.f32 %v8024_v31, %v8024_v31  ;;  %v2484_v23 = vsel %vm880_vm0, %v2406_v24, 0.0  ;;  %v8081_v16 = vadd.f32 %v6411_v26, %v7900_v32  ;;  %v2496_v57 = vsel %vm880_vm0, %v2410_v5, 0.0 }
 0x2bc   : > { %v2333_v9 = vpop.f32.mrf.mxu1  ;;  %2769 = vmatprep.mubr.f32.mxu0 %v10012_v58  ;;  %2467 = vadd.xlane.f32.xlu0 %v2466_v22 }
 0x2bd   : > { %v8037_v53 = vadd.f32 %v7900_v32, %v2333_v9  ;;  %v2493_v15 = vsel %vm880_vm0, %v2409_v28, 0.0  ;;  %v2412_v2 = vmul.f32 %v8081_v16, %v8081_v16 }
 0x2be   : > { %v6414_v61 = vpop.f32.mrf.mxu1  ;;  %2494 = vadd.xlane.f32.xlu1 %v2493_v15 }
 0x2bf   : > { %5997 = vmatmul.mubr.msk.f32.gmra.mxu0 %vm880_vm0, %v7949_v30  ;;  %v2411_v11 = vmul.f32 %v8037_v53, %v8037_v53  ;;  %v8055_v30 = vadd.f32 %v6405_v55, %v7900_v32  ;;  %v8093_v45 = vadd.f32 %v6414_v61, %v7900_v32  ;;  %v2502_v37 = vsel %vm880_vm0, %v2412_v2, 0.0 }
 0x2c0   : > { %v2343_v14 = vpop.f32.mrf.mxu1  ;;  %2775 = vmatprep.mubr.f32.mxu0 %v10012_v58  ;;  %2473 = vadd.xlane.f32.xlu0 %v2472_v49 }
 0x2c1   : > { %v8048_v39 = vadd.f32 %v7900_v32, %v2343_v14  ;;  %v2499_v18 = vsel %vm880_vm0, %v2411_v11, 0.0  ;;  %v2408_v1 = vmul.f32 %v8055_v30, %v8055_v30  ;;  %v2414_v47 = vmul.f32 %v8093_v45, %v8093_v45 }
 0x2c2   : > { %v8057_v20 = vpop.f32.mrf.mxu1  ;;  %2500 = vadd.xlane.f32.xlu1 %v2499_v18 }
 0x2c3   : > { %10013 = vst [vmem:[#allocation32_spill] sm:$0xff] %v8057_v20  ;;  %5998 = vmatmul.mubr.msk.f32.gmra.mxu0 %vm880_vm0, %v7978_v12  ;;  %v2413_v10 = vmul.f32 %v8048_v39, %v8048_v39  ;;  %v2490_v33 = vsel %vm880_vm0, %v2408_v1, 0.0 }
 0x2c4   : > { %v8063_v36 = vpop.f32.mrf.mxu1  ;;  %2781 = vmatprep.mubr.f32.mxu0 %v10012_v58  ;;  %2479 = vadd.xlane.f32.xlu0 %v2478_v17 }
 0x2c5   : > { %10014 = vst [vmem:[#allocation33_spill] sm:$0xff] %v8063_v36  ;;  %v2505_v25 = vsel %vm880_vm0, %v2413_v10, 0.0 }
 0x2c6   : > { %v6419_v48 = vpop.f32.mrf.mxu1  ;;  %2506 = vadd.xlane.f32.xlu1 %v2505_v25 }
 0x2c7   : > { %5999 = vmatmul.mubr.msk.f32.gmra.mxu0 %vm880_vm0, %v7959_v0  ;;  %v3267_v52 = vadd.f32 %v6419_v48, %v8069_v63 }
 0x2c8   : > { %v3261_v62 = vpop.f32.mrf.mxu1  ;;  %2787 = vmatprep.mubr.f32.mxu0 %v10012_v58  ;;  %2485 = vadd.xlane.f32.xlu0 %v2484_v23 }
 0x2c9   : > { %v3262_v38 = vadd.f32 %v8069_v63, %v3261_v62  ;;  %v3452_v56 = vmul.f32 %v3267_v52, %v3267_v52 }
 0x2ca   : > { %v6422_v12 = vpop.f32.mrf.mxu1 }
 0x2cb   : > { %6000 = vmatmul.mubr.msk.f32.gmra.mxu0 %vm880_vm0, %v7991_v6  ;;  %6056 = vmatmul.mubr.msk.f32.vlgmr.msra.gmra.mxu1 %vm880_vm0, %v3262_v38  ;;  %v3486_v49 = vsel %vm880_vm0, %v3452_v56, 0.0 }
 0x2cc   : > { %2793 = vmatprep.mubr.f32.mxu0 %v10012_v58  ;;  %3759 = vmatprep.mubr.f32.mxu1 %v10012_v58  ;;  %v3271_v0 = vpop.f32.mrf.mxu1 }
 0x2cd   : > { %2491 = vadd.xlane.f32.xlu0 %v2490_v33  ;;  %v3272_v6 = vadd.f32 %v8069_v63, %v3271_v0 }
 0x2ce   : > { %v6425_v59 = vpop.f32.mrf.mxu1 }
 0x2cf   : > { %6001 = vmatmul.mubr.msk.f32.gmra.mxu0 %vm880_vm0, %v7969_v40  ;;  %6057 = vmatmul.mubr.msk.f32.gmra.mxu1 %vm880_vm0, %v3267_v52  ;;  %v3287_v27 = vadd.f32 %v6425_v59, %v8069_v63  ;;  %v3277_v40 = vadd.f32 %v6422_v12, %v8069_v63  ;;  %v3453_v1 = vmul.f32 %v3272_v6, %v3272_v6 }
 0x2d0   : > { %2799 = vmatprep.mubr.f32.mxu0 %v10012_v58  ;;  %3765 = vmatprep.mubr.f32.mxu1 %v10012_v58  ;;  %v3281_v32 = vpop.f32.mrf.mxu1 }
 0x2d1   : > { %2497 = vadd.xlane.f32.xlu0 %v2496_v57  ;;  %v3456_v55 = vmul.f32 %v3287_v27, %v3287_v27  ;;  %v3282_v22 = vadd.f32 %v8069_v63, %v3281_v32  ;;  %v3454_v24 = vmul.f32 %v3277_v40, %v3277_v40 }
 0x2d2   : > { %v6428_v43 = vpop.f32.mrf.mxu1 }
 0x2d3   : > { %6002 = vmatmul.mubr.msk.f32.gmra.mxu0 %vm880_vm0, %v8003_v8  ;;  %6058 = vmatmul.mubr.msk.f32.gmra.mxu1 %vm880_vm0, %v3272_v6  ;;  %v8113_v34 = vadd.f32 %v6428_v43, %v8069_v63  ;;  %v3498_v51 = vsel %vm880_vm0, %v3456_v55, 0.0  ;;  %v2508_v8 = vsel %vm880_vm0, %v2414_v47, 0.0  ;;  %v3455_v52 = vmul.f32 %v3282_v22, %v3282_v22 }
 0x2d4   : > { %2805 = vmatprep.mubr.f32.mxu0 %v10012_v58  ;;  %3771 = vmatprep.mubr.f32.mxu1 %v10012_v58  ;;  %v3291_v29 = vpop.f32.mrf.mxu1 }
 0x2d5   : > { %2503 = vadd.xlane.f32.xlu0 %v2502_v37  ;;  %3499 = vadd.xlane.f32.xlu1 %v3498_v51  ;;  %v3458_v50 = vmul.f32 %v8113_v34, %v8113_v34 }
 0x2d6   : > { %v8120_v13 = vpop.f32.mrf.mxu1 }
 0x2d7   : > { %6003 = vmatmul.mubr.msk.f32.gmra.mxu0 %vm880_vm0, %v7981_v60  ;;  %6059 = vmatmul.mubr.msk.f32.gmra.mxu1 %vm880_vm0, %v3277_v40  ;;  %v3504_v19 = vsel %vm880_vm0, %v3458_v50, 0.0  ;;  %v3451_v60 = vmul.f32 %v3262_v38, %v3262_v38  ;;  %v3307_v32 = vadd.f32 %v8120_v13, %v8069_v63 }
 0x2d8   : > { %2811 = vmatprep.mubr.f32.mxu0 %v10012_v58  ;;  %3777 = vmatprep.mubr.f32.mxu1 %v10012_v58  ;;  %v3301_v26 = vpop.f32.mrf.mxu1 }
 0x2d9   : > { %v3302_v28 = vadd.f32 %v8069_v63, %v3301_v26  ;;  %2509 = vadd.xlane.f32.xlu0 %v2508_v8  ;;  %3505 = vadd.xlane.f32.xlu1 %v3504_v19  ;;  %v3483_v17 = vsel %vm880_vm0, %v3451_v60, 0.0 }
 0x2da   : > { %v8131_v9 = vpop.f32.mrf.mxu1 }
 0x2db   : > { %6004 = vmatmul.mubr.msk.f32.gmra.mxu0 %vm880_vm0, %v8021_v41  ;;  %6060 = vmatmul.mubr.msk.f32.gmra.mxu1 %vm880_vm0, %v3282_v22  ;;  %v3459_v4 = vmul.f32 %v3302_v28, %v3302_v28  ;;  %v3292_v41 = vadd.f32 %v8069_v63, %v3291_v29  ;;  %v3317_v29 = vadd.f32 %v8131_v9, %v8069_v63 }
 0x2dc   : > { %2817 = vmatprep.mubr.f32.mxu0 %v10012_v58  ;;  %3783 = vmatprep.mubr.f32.mxu1 %v10012_v58  ;;  %v3311_v15 = vpop.f32.mrf.mxu1 }
 0x2dd   : > { %v8140_v61 = vadd.f32 %v8069_v63, %v3311_v15  ;;  %3487 = vadd.xlane.f32.xlu0 %v3486_v49  ;;  %v3507_v11 = vsel %vm880_vm0, %v3459_v4, 0.0  ;;  %v3462_v22 = vmul.f32 %v3317_v29, %v3317_v29 }
 0x2de   : > { %v8143_v14 = vpop.f32.mrf.mxu1  ;;  %3508 = vadd.xlane.f32.xlu1 %v3507_v11 }
 0x2df   : > { %6005 = vmatmul.mubr.msk.f32.gmra.mxu0 %vm880_vm0, %v7994_v35  ;;  %6061 = vmatmul.mubr.msk.f32.gmra.mxu1 %vm880_vm0, %v3287_v27  ;;  %v3461_v18 = vmul.f32 %v8140_v61, %v8140_v61  ;;  %v3492_v35 = vsel %vm880_vm0, %v3454_v24, 0.0  ;;  %v3457_v27 = vmul.f32 %v3292_v41, %v3292_v41  ;;  %v3327_v26 = vadd.f32 %v8143_v14, %v8069_v63 }
 0x2e0   : > { %2823 = vmatprep.mubr.f32.mxu0 %v10012_v58  ;;  %3789 = vmatprep.mubr.f32.mxu1 %v10012_v58  ;;  %v3321_v10 = vpop.f32.mrf.mxu1  ;;  %v3516_v60 = vsel %vm880_vm0, %v3462_v22, 0.0 }
 0x2e1   : > { %v8155_v23 = vadd.f32 %v8069_v63, %v3321_v10  ;;  %3484 = vadd.xlane.f32.xlu0 %v3483_v17  ;;  %v3513_v25 = vsel %vm880_vm0, %v3461_v18, 0.0  ;;  %v3464_v4 = vmul.f32 %v3327_v26, %v3327_v26 }
 0x2e2   : > { %v8158_v48 = vpop.f32.mrf.mxu1  ;;  %3514 = vadd.xlane.f32.xlu1 %v3513_v25 }
 0x2e3   : > { %6006 = vmatmul.mubr.msk.f32.gmra.mxu0 %vm880_vm0, %v8034_v46  ;;  %6062 = vmatmul.mubr.msk.f32.gmra.mxu1 %vm880_vm0, %v3292_v41  ;;  %v3463_v62 = vmul.f32 %v8155_v23, %v8155_v23  ;;  %v3489_v46 = vsel %vm880_vm0, %v3453_v1, 0.0  ;;  %v3522_v24 = vsel %vm880_vm0, %v3464_v4, 0.0 }
 0x2e4   : > { %2829 = vmatprep.mubr.f32.mxu0 %v10012_v58  ;;  %3795 = vmatprep.mubr.f32.mxu1 %v10012_v58  ;;  %v3331_v38 = vpop.f32.mrf.mxu1 }
 0x2e5   : > { %v8169_v12 = vadd.f32 %v8069_v63, %v3331_v38  ;;  %3493 = vadd.xlane.f32.xlu0 %v3492_v35  ;;  %v3519_v33 = vsel %vm880_vm0, %v3463_v62, 0.0 }
 0x2e6   : > { %v8172_v5 = vpop.f32.mrf.mxu1  ;;  %3520 = vadd.xlane.f32.xlu1 %v3519_v33 }
 0x2e7   : > { %6007 = vmatmul.mubr.msk.f32.gmra.mxu0 %vm880_vm0, %v8007_v54  ;;  %6063 = vmatmul.mubr.msk.f32.gmra.mxu1 %vm880_vm0, %v8113_v34  ;;  %v3465_v0 = vmul.f32 %v8169_v12, %v8169_v12  ;;  %v3495_v54 = vsel %vm880_vm0, %v3455_v52, 0.0  ;;  %v3460_v34 = vmul.f32 %v3307_v32, %v3307_v32  ;;  %v3347_v10 = vadd.f32 %v8172_v5, %v8069_v63 }
 0x2e8   : > { %2835 = vmatprep.mubr.f32.mxu0 %v10012_v58  ;;  %3801 = vmatprep.mubr.f32.mxu1 %v10012_v58  ;;  %v3341_v59 = vpop.f32.mrf.mxu1 }
 0x2e9   : > { %v8184_v57 = vadd.f32 %v8069_v63, %v3341_v59  ;;  %3490 = vadd.xlane.f32.xlu0 %v3489_v46  ;;  %v3525_v2 = vsel %vm880_vm0, %v3465_v0, 0.0  ;;  %v3510_v56 = vsel %vm880_vm0, %v3460_v34, 0.0  ;;  %v3468_v1 = vmul.f32 %v3347_v10, %v3347_v10  ;;  %v6650_v34 = vld [vmem:[%s9922_s1 + $0x8] sm:$0xff] }
 0x2ea   : > { %v8187_v6 = vpop.f32.mrf.mxu1  ;;  %3526 = vadd.xlane.f32.xlu1 %v3525_v2  ;;  %v6088_v2 = vld [vmem:[%s7398_s25 + $0x18] sm:$0xff] }
 0x2eb   : > { %6008 = vmatmul.mubr.msk.f32.gmra.mxu0 %vm880_vm0, %v8055_v30  ;;  %6064 = vmatmul.mubr.msk.f32.gmra.mxu1 %vm880_vm0, %v3302_v28  ;;  %v3467_v55 = vmul.f32 %v8184_v57, %v8184_v57  ;;  %v3501_v30 = vsel %vm880_vm0, %v3457_v27, 0.0  ;;  %v8281_v38 = vadd.f32 %v8187_v6, %v8069_v63  ;;  %v3534_v52 = vsel %vm880_vm0, %v3468_v1, 0.0  ;;  %v6662_v1 = vld [vmem:[%s9922_s1 + $0x68] sm:$0xff] }
 0x2ec   : > { %2841 = vmatprep.mubr.f32.mxu0 %v10012_v58  ;;  %3807 = vmatprep.mubr.f32.mxu1 %v10012_v58  ;;  %v3351_v43 = vpop.f32.mrf.mxu1 }
 0x2ed   : > { %v8200_v37 = vadd.f32 %v8069_v63, %v3351_v43  ;;  %3496 = vadd.xlane.f32.xlu0 %v3495_v54  ;;  %v3531_v47 = vsel %vm880_vm0, %v3467_v55, 0.0  ;;  %v3470_v0 = vmul.f32 %v8281_v38, %v8281_v38 }
 0x2ee   : > { %v8203_v40 = vpop.f32.mrf.mxu1  ;;  %3532 = vadd.xlane.f32.xlu1 %v3531_v47  ;;  %v6649_v47 = vld [vmem:[%s9922_s1] sm:$0xff] }
 0x2ef   : > { %6009 = vmatmul.mubr.msk.f32.gmra.mxu0 %vm880_vm0, %v8024_v31  ;;  %6065 = vmatmul.mubr.msk.f32.gmra.mxu1 %vm880_vm0, %v3307_v32  ;;  %v3469_v51 = vmul.f32 %v8200_v37, %v8200_v37  ;;  %v8303_v6 = vadd.f32 %v8203_v40, %v8069_v63 }
 0x2f0   : > { %2847 = vmatprep.mubr.f32.mxu0 %v10012_v58  ;;  %3813 = vmatprep.mubr.f32.mxu1 %v10012_v58  ;;  %v3361_v50 = vpop.f32.mrf.mxu1 }
 0x2f1   : > { %v8216_v13 = vadd.f32 %v8069_v63, %v3361_v50  ;;  %3502 = vadd.xlane.f32.xlu0 %v3501_v30  ;;  %v3537_v8 = vsel %vm880_vm0, %v3469_v51, 0.0  ;;  %v3472_v32 = vmul.f32 %v8303_v6, %v8303_v6  ;;  %v6651_v51 = vld [vmem:[%s9922_s1 + $0x10] sm:$0xff] }
 0x2f2   : > { %v8219_v31 = vpop.f32.mrf.mxu1  ;;  %3538 = vadd.xlane.f32.xlu1 %v3537_v8  ;;  %v6652_v8 = vld [vmem:[%s9922_s1 + $0x18] sm:$0xff] }
 0x2f3   : > { %6010 = vmatmul.mubr.msk.f32.gmra.mxu0 %vm880_vm0, %v8072_v7  ;;  %6066 = vmatmul.mubr.msk.f32.gmra.mxu1 %vm880_vm0, %v8140_v61  ;;  %v3471_v19 = vmul.f32 %v8216_v13, %v8216_v13  ;;  %v3337_v61 = vadd.f32 %v8158_v48, %v8069_v63  ;;  %v8320_v43 = vadd.f32 %v8219_v31, %v8069_v63  ;;  %v3546_v30 = vsel %vm880_vm0, %v3472_v32, 0.0  ;;  %v6653_v31 = vld [vmem:[%s9922_s1 + $0x20] sm:$0xff] }
 0x2f4   : > { %2853 = vmatprep.mubr.f32.mxu0 %v10012_v58  ;;  %3819 = vmatprep.mubr.f32.mxu1 %v10012_v58  ;;  %v3371_v28 = vpop.f32.mrf.mxu1 }
 0x2f5   : > { %v8233_v9 = vadd.f32 %v8069_v63, %v3371_v28  ;;  %3511 = vadd.xlane.f32.xlu0 %v3510_v56  ;;  %v3543_v7 = vsel %vm880_vm0, %v3471_v19, 0.0  ;;  %v3466_v41 = vmul.f32 %v3337_v61, %v3337_v61  ;;  %v6654_v28 = vld [vmem:[%s9922_s1 + $0x28] sm:$0xff] }
 0x2f6   : > { %v8236_v49 = vpop.f32.mrf.mxu1  ;;  %3544 = vadd.xlane.f32.xlu1 %v3543_v7  ;;  %v6655_v7 = vld [vmem:[%s9922_s1 + $0x30] sm:$0xff] }
 0x2f7   : > { %6011 = vmatmul.mubr.msk.f32.gmra.mxu0 %vm880_vm0, %v8037_v53  ;;  %6067 = vmatmul.mubr.msk.f32.gmra.mxu1 %vm880_vm0, %v3317_v29  ;;  %v3473_v15 = vmul.f32 %v8233_v9, %v8233_v9  ;;  %v8343_v29 = vadd.f32 %v8236_v49, %v8069_v63 }
 0x2f8   : > { %2859 = vmatprep.mubr.f32.mxu0 %v10012_v58  ;;  %3825 = vmatprep.mubr.f32.mxu1 %v10012_v58  ;;  %v3381_v11 = vpop.f32.mrf.mxu1 }
 0x2f9   : > { %v8249_v14 = vadd.f32 %v8069_v63, %v3381_v11  ;;  %3517 = vadd.xlane.f32.xlu0 %v3516_v60  ;;  %v3549_v17 = vsel %vm880_vm0, %v3473_v15, 0.0  ;;  %v3476_v50 = vmul.f32 %v8343_v29, %v8343_v29  ;;  %v6128_v60 = vld [vmem:[%s7195_s15 + $0x38] sm:$0xff] }
 0x2fa   : > { %v8252_v53 = vpop.f32.mrf.mxu1  ;;  %3550 = vadd.xlane.f32.xlu1 %v3549_v17  ;;  %v6656_v11 = vld [vmem:[%s9922_s1 + $0x38] sm:$0xff]  ;;  %v6657_v17 = vld [vmem:[%s9922_s1 + $0x40] sm:$0xff] }
 0x2fb   : > { %6012 = vmatmul.mubr.msk.f32.gmra.mxu0 %vm880_vm0, %v8081_v16  ;;  %6068 = vmatmul.mubr.msk.f32.gmra.mxu1 %vm880_vm0, %v8155_v23  ;;  %v3475_v18 = vmul.f32 %v8249_v14, %v8249_v14  ;;  %v3528_v23 = vsel %vm880_vm0, %v3466_v41, 0.0  ;;  %v8360_v56 = vadd.f32 %v8252_v53, %v8069_v63  ;;  %v3558_v19 = vsel %vm880_vm0, %v3476_v50, 0.0 }
 0x2fc   : > { %2865 = vmatprep.mubr.f32.mxu0 %v10012_v58  ;;  %3831 = vmatprep.mubr.f32.mxu1 %v10012_v58  ;;  %v3391_v25 = vpop.f32.mrf.mxu1 }
 0x2fd   : > { %v8266_v48 = vadd.f32 %v8069_v63, %v3391_v25  ;;  %3523 = vadd.xlane.f32.xlu0 %v3522_v24  ;;  %v3555_v16 = vsel %vm880_vm0, %v3475_v18, 0.0 }
 0x2fe   : > { %v8269_v35 = vpop.f32.mrf.mxu1  ;;  %3556 = vadd.xlane.f32.xlu1 %v3555_v16 }
 0x2ff   : > { %6013 = vmatmul.mubr.msk.f32.gmra.mxu0 %vm880_vm0, %v8048_v39  ;;  %6069 = vmatmul.mubr.msk.f32.gmra.mxu1 %vm880_vm0, %v3327_v26  ;;  %v3477_v62 = vmul.f32 %v8266_v48, %v8266_v48  ;;  %v3478_v26 = vmul.f32 %v8360_v56, %v8360_v56  ;;  %v8380_v49 = vadd.f32 %v8269_v35, %v8069_v63  ;;  %v6661_v35 = vld [vmem:[%s9922_s1 + $0x60] sm:$0xff] }
 0x300   : > { %2871 = vmatprep.mubr.f32.mxu0 %v10012_v58  ;;  %3837 = vmatprep.mubr.f32.mxu1 %v10012_v58  ;;  %v3401_v33 = vpop.f32.mrf.mxu1 }
 0x301   : > { %v8284_v5 = vadd.f32 %v8069_v63, %v3401_v33  ;;  %3529 = vadd.xlane.f32.xlu0 %v3528_v23  ;;  %v3561_v39 = vsel %vm880_vm0, %v3477_v62, 0.0  ;;  %v3480_v15 = vmul.f32 %v8380_v49, %v8380_v49  ;;  %v6663_v62 = vld [vmem:[%s9922_s1 + $0x70] sm:$0xff]  ;;  %v6665_v33 = vld [vmem:[%s9922_s1 + $0x80] sm:$0xff] }
 0x302   : > { %v8287_v46 = vpop.f32.mrf.mxu1  ;;  %3562 = vadd.xlane.f32.xlu1 %v3561_v39 }
 0x303   : > { %6014 = vmatmul.mubr.msk.f32.gmra.mxu0 %vm880_vm0, %v8093_v45  ;;  %6070 = vmatmul.mubr.msk.f32.gmra.mxu1 %vm880_vm0, %v8169_v12  ;;  %v3479_v59 = vmul.f32 %v8284_v5, %v8284_v5  ;;  %v3540_v12 = vsel %vm880_vm0, %v3470_v0, 0.0  ;;  %v8402_v53 = vadd.f32 %v8287_v46, %v8069_v63  ;;  %v3570_v18 = vsel %vm880_vm0, %v3480_v15, 0.0  ;;  %v6666_v46 = vld [vmem:[%s9922_s1 + $0x88] sm:$0xff] }
 0x304   : > { %3843 = vmatprep.mubr.f32.mxu1 %v10012_v58  ;;  %4246 = vmatprep.mubr.f32.mxu0 %v10012_v58  ;;  %v3411_v54 = vpop.f32.mrf.mxu1 }
 0x305   : > { %v8306_v27 = vadd.f32 %v8069_v63, %v3411_v54  ;;  %3535 = vadd.xlane.f32.xlu0 %v3534_v52  ;;  %v3567_v45 = vsel %vm880_vm0, %v3479_v59, 0.0  ;;  %v3482_v41 = vmul.f32 %v8402_v53, %v8402_v53  ;;  %v6659_v63 = vld [vmem:[%s9922_s1 + $0x50] sm:$0xff] }
 0x306   : > { %3568 = vadd.xlane.f32.xlu1 %v3567_v45  ;;  %v6667_v52 = vld [vmem:[%s9922_s1 + $0x90] sm:$0xff]  ;;  %v6670_v45 = vld [vmem:[%s9922_s1 + $0xa8] sm:$0xff] }
 0x307   : > { %6071 = vmatmul.mubr.msk.f32.gmra.mxu1 %vm880_vm0, %v3337_v61  ;;  %6090 = vmatmul.mubr.msk.f32.vlgmr.msra.gmra.mxu0 %vm880_vm0, %v6088_v2  ;;  %v3481_v55 = vmul.f32 %v8306_v27, %v8306_v27  ;;  %v3564_v61 = vsel %vm880_vm0, %v3478_v26, 0.0  ;;  %v3576_v16 = vsel %vm880_vm0, %v3482_v41, 0.0 }
 0x308   : > { %6466 = vmatpush3.msra.mxu0 %v7907_v42  ;;  %3849 = vmatprep.mubr.f32.mxu1 %v10012_v58  ;;  %v3474_v42 = vmul.f32 %v8320_v43, %v8320_v43 }
 0x309   : > { %6467 = vmatprep.mubr.msk.f32.mxu0 %vm880_vm0, %v6649_v47  ;;  %3541 = vadd.xlane.f32.xlu0 %v3540_v12  ;;  %v3573_v40 = vsel %vm880_vm0, %v3481_v55, 0.0  ;;  %v6671_v12 = vld [vmem:[%s9922_s1 + $0xb0] sm:$0xff]  ;;  %v6673_v47 = vld [vmem:[%s9922_s1 + $0xc0] sm:$0xff] }
 0x30a   : > { %3574 = vadd.xlane.f32.xlu1 %v3573_v40  ;;  %4787 = vmatprep.subr.mxu0 %v6128_v60  ;;  %v6674_v40 = vld [vmem:[%s9922_s1 + $0xc8] sm:$0xff] }
 0x30b   : > { %6072 = vmatmul.mubr.msk.f32.gmra.mxu1 %vm880_vm0, %v8184_v57  ;;  %6468 = vmatmul.mubr.msk.f32.vlgmr.msra.gmra.mxu0 %vm880_vm0, %v6650_v34  ;;  %v3552_v57 = vsel %vm880_vm0, %v3474_v42, 0.0  ;;  %v6677_v42 = vld [vmem:[%s9922_s1 + $0xe0] sm:$0xff]  ;;  %v6678_v34 = vld [vmem:[%s9922_s1 + $0xe8] sm:$0xff] }
 0x30c   : > { %3855 = vmatprep.mubr.f32.mxu1 %v10012_v58  ;;  %6470 = vmatprep.mubr.msk.f32.mxu0 %vm880_vm0, %v6651_v51  ;;  %v6679_v51 = vld [vmem:[%s9922_s1 + $0xf0] sm:$0xff] }
 0x30d   : > { %3547 = vadd.xlane.f32.xlu0 %v3546_v30  ;;  %v6675_v30 = vld [vmem:[%s9922_s1 + $0xd0] sm:$0xff] }
 0x30f   : > { %6073 = vmatmul.mubr.msk.f32.gmra.mxu1 %vm880_vm0, %v3347_v10  ;;  %6471 = vmatmul.mubr.msk.f32.gmra.mxu0 %vm880_vm0, %v6652_v8  ;;  %v6658_v10 = vld [vmem:[%s9922_s1 + $0x48] sm:$0xff] }
 0x310   : > { %3861 = vmatprep.mubr.f32.mxu1 %v10012_v58  ;;  %6473 = vmatprep.mubr.msk.f32.mxu0 %vm880_vm0, %v6653_v31 }
 0x311   : > { %v8362_v22 = vpop.xlane.xlu0 %2419  ;;  %3553 = vadd.xlane.f32.xlu0 %v3552_v57 }
 0x313   : > { %6074 = vmatmul.mubr.msk.f32.gmra.mxu1 %vm880_vm0, %v8200_v37  ;;  %6474 = vmatmul.mubr.msk.f32.gmra.mxu0 %vm880_vm0, %v6654_v28  ;;  %v6127_v37 = vld [vmem:[%s7195_s15 + $0x30] sm:$0xff] }
 0x314   : > { %3867 = vmatprep.mubr.f32.mxu1 %v10012_v58  ;;  %6476 = vmatprep.mubr.msk.f32.mxu0 %vm880_vm0, %v6655_v7 }
 0x315   : > { %v8384_v4 = vpop.xlane.xlu0 %2416  ;;  %3559 = vadd.xlane.f32.xlu0 %v3558_v19  ;;  %4788 = vmatpush1.msra.mxu0 %v6127_v37 }
 0x317   : > { %6075 = vmatmul.mubr.msk.f32.gmra.mxu1 %vm880_vm0, %v8281_v38  ;;  %6477 = vmatmul.mubr.msk.f32.gmra.mxu0 %vm880_vm0, %v6656_v11 }
 0x318   : > { %3873 = vmatprep.mubr.f32.mxu1 %v10012_v58  ;;  %6479 = vmatprep.mubr.msk.f32.mxu0 %vm880_vm0, %v6657_v17 }
 0x319   : > { %v8404_v24 = vpop.xlane.xlu0 %2425  ;;  %3565 = vadd.xlane.f32.xlu0 %v3564_v61 }
 0x31b   : > { %6076 = vmatmul.mubr.msk.f32.gmra.mxu1 %vm880_vm0, %v8216_v13  ;;  %6480 = vmatmul.mubr.msk.f32.gmra.mxu0 %vm880_vm0, %v6658_v10  ;;  %v6660_v13 = vld [vmem:[%s9922_s1 + $0x58] sm:$0xff] }
 0x31c   : > { %3879 = vmatprep.mubr.f32.mxu1 %v10012_v58  ;;  %6482 = vmatprep.mubr.msk.f32.mxu0 %vm880_vm0, %v6659_v63 }
 0x31d   : > { %v8420_v25 = vpop.xlane.xlu0 %2422  ;;  %3571 = vadd.xlane.f32.xlu0 %v3570_v18 }
 0x31f   : > { %6077 = vmatmul.mubr.msk.f32.gmra.mxu1 %vm880_vm0, %v8303_v6  ;;  %6483 = vmatmul.mubr.msk.f32.gmra.mxu0 %vm880_vm0, %v6660_v13  ;;  %v6669_v6 = vld [vmem:[%s9922_s1 + $0xa0] sm:$0xff]  ;;  %v8564_v13 = vpop.xlane.xlu1 %2428 }
 0x320   : > { %3885 = vmatprep.mubr.f32.mxu1 %v10012_v58  ;;  %6485 = vmatprep.mubr.msk.f32.mxu0 %vm880_vm0, %v6661_v35 }
 0x321   : > { %v8434_v23 = vpop.xlane.xlu0 %2431  ;;  %3577 = vadd.xlane.f32.xlu0 %v3576_v16 }
 0x323   : > { %6078 = vmatmul.mubr.msk.f32.gmra.mxu1 %vm880_vm0, %v8233_v9  ;;  %6486 = vmatmul.mubr.msk.f32.gmra.mxu0 %vm880_vm0, %v6662_v1  ;;  %v6664_v9 = vld [vmem:[%s9922_s1 + $0x78] sm:$0xff] }
 0x324   : > { %3891 = vmatprep.mubr.f32.mxu1 %v10012_v58  ;;  %6488 = vmatprep.mubr.msk.f32.mxu0 %vm880_vm0, %v6663_v62 }
 0x325   : > { %v8447_v38 = vpop.xlane.xlu0 %2437 }
 0x327   : > { %6079 = vmatmul.mubr.msk.f32.gmra.mxu1 %vm880_vm0, %v8320_v43  ;;  %6489 = vmatmul.mubr.msk.f32.gmra.mxu0 %vm880_vm0, %v6664_v9 }
 0x328   : > { %3897 = vmatprep.mubr.f32.mxu1 %v10012_v58  ;;  %6491 = vmatprep.mubr.msk.f32.mxu0 %vm880_vm0, %v6665_v33 }
 0x329   : > { %v8460_v39 = vpop.xlane.xlu0 %2434 }
 0x32b   : > { %6080 = vmatmul.mubr.msk.f32.gmra.mxu1 %vm880_vm0, %v8249_v14  ;;  %6492 = vmatmul.mubr.msk.f32.gmra.mxu0 %vm880_vm0, %v6666_v46  ;;  %v6668_v14 = vld [vmem:[%s9922_s1 + $0x98] sm:$0xff] }
 0x32c   : > { %3903 = vmatprep.mubr.f32.mxu1 %v10012_v58  ;;  %6494 = vmatprep.mubr.msk.f32.mxu0 %vm880_vm0, %v6667_v52 }
 0x32d   : > { %v2020_v0 = vpop.xlane.xlu0 %2019 }
 0x32e   : > { %v2021_v59 = vrot.slane %v2020_v0, 4 }
 0x32f   : > { %6081 = vmatmul.mubr.msk.f32.gmra.mxu1 %vm880_vm0, %v8343_v29  ;;  %6495 = vmatmul.mubr.msk.f32.gmra.mxu0 %vm880_vm0, %v6668_v14 }
 0x330   : > { %v2022_v2 = vadd.f32 %v2021_v59, %v2020_v0  ;;  %3909 = vmatprep.mubr.f32.mxu1 %v10012_v58  ;;  %6497 = vmatprep.mubr.msk.f32.mxu0 %vm880_vm0, %v6669_v6  ;;  %v6681_v59 = vld [vmem:[%s7195_s15 + $0x18] sm:$0xff] }
 0x331   : > { %v8548_v8 = vpop.xlane.xlu0 %2443  ;;  %v2512_v14 = vmul.f32 %v6681_v59, %v6681_v59 }
 0x332   : > { %v2023_v54 = vrot.slane %v2022_v2, 2 }
 0x333   : > { %6082 = vmatmul.mubr.msk.f32.gmra.mxu1 %vm880_vm0, %v8266_v48  ;;  %6498 = vmatmul.mubr.msk.f32.gmra.mxu0 %vm880_vm0, %v6670_v45  ;;  %v6672_v48 = vld [vmem:[%s9922_s1 + $0xb8] sm:$0xff] }
 0x334   : > { %3915 = vmatprep.mubr.f32.mxu1 %v10012_v58  ;;  %6500 = vmatprep.mubr.msk.f32.mxu0 %vm880_vm0, %v6671_v12  ;;  %v2024_v32 = vadd.f32 %v2023_v54, %v2022_v2  ;;  %v6682_v12 = vld [vmem:[%s7195_s15 + $0x10] sm:$0xff] }
 0x335   : > { %v8554_v7 = vpop.xlane.xlu0 %2440 }
 0x336   : > { %v2025_v55 = vrot.slane %v2024_v32, 1 }
 0x337   : > { %6083 = vmatmul.mubr.msk.f32.gmra.mxu1 %vm880_vm0, %v8360_v56  ;;  %6501 = vmatmul.mubr.msk.f32.gmra.mxu0 %vm880_vm0, %v6672_v48 }
 0x338   : > { %v2026_v43 = vadd.f32 %v2025_v55, %v2024_v32  ;;  %3921 = vmatprep.mubr.f32.mxu1 %v10012_v58  ;;  %6503 = vmatprep.mubr.msk.f32.mxu0 %vm880_vm0, %v6673_v47  ;;  %v2511_v32 = vmul.f32 %v6682_v12, %v6682_v12 }
 0x339   : > { %v8562_v10 = vpop.xlane.xlu0 %2449 }
 0x33a   : > { %6521 = vpush %v2026_v43  ;;  %v2519_v43 = vrot.slane %v2512_v14, 4 }
 0x33b   : > { %6084 = vmatmul.mubr.msk.f32.gmra.mxu1 %vm880_vm0, %v8284_v5  ;;  %6504 = vmatmul.mubr.msk.f32.gmra.mxu0 %vm880_vm0, %v6674_v40  ;;  %v6676_v5 = vld [vmem:[%s9922_s1 + $0xd8] sm:$0xff] }
 0x33c   : > { %3927 = vmatprep.mubr.f32.mxu1 %v10012_v58  ;;  %6506 = vmatprep.mubr.msk.f32.mxu0 %vm880_vm0, %v6675_v30 }
 0x33d   : > { %v8569_v9 = vpop.xlane.xlu0 %2455 }
 0x33f   : > { %6085 = vmatmul.mubr.msk.f32.gmra.mxu1 %vm880_vm0, %v8380_v49  ;;  %6507 = vmatmul.mubr.msk.f32.gmra.mxu0 %vm880_vm0, %v6676_v5 }
 0x340   : > { %3933 = vmatprep.mubr.f32.mxu1 %v10012_v58  ;;  %6509 = vmatprep.mubr.msk.f32.mxu0 %vm880_vm0, %v6677_v42  ;;  %v2513_v42 = vrot.slane %v2511_v32, 4 }
 0x341   : > { %v8575_v6 = vpop.xlane.xlu0 %2461 }
 0x343   : > { %6086 = vmatmul.mubr.msk.f32.gmra.mxu1 %vm880_vm0, %v8306_v27  ;;  %6510 = vmatmul.mubr.msk.f32.gmra.mxu0 %vm880_vm0, %v6678_v34  ;;  %v6680_v27 = vld [vmem:[%s9922_s1 + $0xf8] sm:$0xff] }
 0x344   : > { %3939 = vmatprep.mubr.f32.mxu1 %v10012_v58  ;;  %6512 = vmatprep.mubr.msk.f32.mxu0 %vm880_vm0, %v6679_v51 }
 0x345   : > { %v8582_v40 = vpop.xlane.xlu0 %2467 }
 0x347   : > { %v2687_v29 = vpop.f32.mrf.mxu0  ;;  %6087 = vmatmul.mubr.msk.f32.gmra.mxu1 %vm880_vm0, %v8402_v53  ;;  %6513 = vmatmul.mubr.msk.f32.gmra.mxu0 %vm880_vm0, %v6680_v27 }
 0x348   : > { %4821 = vmatprep.mubr.f32.mxu0 %v10012_v58  ;;  %v2878_v56 = vmul.f32 2.0, %v2687_v29  ;;  %v2520_v29 = vadd.f32 %v2519_v43, %v2512_v14  ;;  %v8606_v14 = vpop.xlane.xlu1 %2446 }
 0x349   : > { %v8546_v57 = vpop.f32.mrf.mxu0 }
 0x34a   : > { %v2942_v49 = vsub.f32 %v8384_v4, %v2878_v56 }
 0x34b   : > { %v2693_v50 = vpop.f32.mrf.mxu0 }
 0x34c   : > { %v2880_v60 = vmul.f32 2.0, %v2693_v50  ;;  %v8588_v50 = vpop.xlane.xlu0 %2473 }
 0x34d   : > { %v8550_v31 = vpop.f32.mrf.mxu0 }
 0x34e   : > { %v2944_v53 = vsub.f32 %v8362_v22, %v2880_v60 }
 0x34f   : > { %v2699_v19 = vpop.f32.mrf.mxu0 }
 0x350   : > { %v2882_v26 = vmul.f32 2.0, %v2699_v19 }
 0x351   : > { %v8552_v28 = vpop.f32.mrf.mxu0 }
 0x352   : > { %v2946_v37 = vsub.f32 %v8420_v25, %v2882_v26  ;;  %v2514_v26 = vadd.f32 %v2513_v42, %v2511_v32 }
 0x353   : > { %v2705_v15 = vpop.f32.mrf.mxu0 }
 0x354   : > { %v3006_v61 = vmin.f32 %v2942_v49, %v2946_v37  ;;  %v2884_v11 = vmul.f32 2.0, %v2705_v15  ;;  %v2521_v37 = vrot.slane %v2520_v29, 2 }
 0x355   : > { %v8558_v17 = vpop.f32.mrf.mxu0 }
 0x356   : > { %v2948_v41 = vsub.f32 %v8404_v24, %v2884_v11 }
 0x357   : > { %v2711_v18 = vpop.f32.mrf.mxu0 }
 0x358   : > { %v3007_v63 = vmin.f32 %v2944_v53, %v2948_v41  ;;  %v2886_v16 = vmul.f32 2.0, %v2711_v18  ;;  %v2515_v41 = vrot.slane %v2514_v26, 2 }
 0x359   : > { %v8566_v35 = vpop.f32.mrf.mxu0 }
 0x35a   : > { %v2950_v1 = vsub.f32 %v8564_v13, %v2886_v16  ;;  %v8604_v59 = vadd.f32 %v2515_v41, %v2514_v26 }
 0x35b   : > { %v2717_v62 = vpop.f32.mrf.mxu0 }
 0x35c   : > { %v3008_v33 = vmin.f32 %v3006_v61, %v2950_v1  ;;  %v2888_v46 = vmul.f32 2.0, %v2717_v62  ;;  %v8591_v61 = vpop.xlane.xlu0 %2479  ;;  %v2522_v1 = vadd.f32 %v2521_v37, %v2520_v29 }
 0x35d   : > { %v8571_v52 = vpop.f32.mrf.mxu0 }
 0x35e   : > { %v2952_v0 = vsub.f32 %v8434_v23, %v2888_v46  ;;  %v2523_v32 = vrot.slane %v2522_v1, 1 }
 0x35f   : > { %v2723_v2 = vpop.f32.mrf.mxu0 }
 0x360   : > { %v3009_v54 = vmin.f32 %v3007_v63, %v2952_v0  ;;  %v2890_v45 = vmul.f32 2.0, %v2723_v2 }
 0x361   : > { %v8578_v55 = vpop.f32.mrf.mxu0 }
 0x362   : > { %v2954_v48 = vsub.f32 %v8460_v39, %v2890_v45 }
 0x363   : > { %v2729_v47 = vpop.f32.mrf.mxu0 }
 0x364   : > { %v3010_v30 = vmin.f32 %v3008_v33, %v2954_v48  ;;  %v2892_v5 = vmul.f32 2.0, %v2729_v47  ;;  %v8602_v33 = vpop.xlane.xlu0 %2485  ;;  %v6684_v48 = vld [vmem:[%s7195_s15 + $0x20] sm:$0xff]  ;;  %v2883_v47 = vmul.f32 2.0, %v8552_v28  ;;  %v2881_v28 = vmul.f32 2.0, %v8550_v31  ;;  %v8643_v31 = vpop.xlane.xlu1 %2452 }
 0x365   : > { %v8584_v34 = vpop.f32.mrf.mxu0  ;;  %v3579_v43 = vmul.f32 %v6684_v48, %v6684_v48 }
 0x366   : > { %v2956_v51 = vsub.f32 %v8447_v38, %v2892_v5  ;;  %v2885_v5 = vmul.f32 2.0, %v8558_v17  ;;  %v2947_v41 = vsub.f32 %v8420_v25, %v2883_v47  ;;  %v2893_v25 = vmul.f32 2.0, %v8584_v34 }
 0x367   : > { %v2735_v27 = vpop.f32.mrf.mxu0 }
 0x368   : > { %v3011_v56 = vmin.f32 %v3009_v54, %v2956_v51  ;;  %v2894_v19 = vmul.f32 2.0, %v2735_v27  ;;  %v6683_v54 = vld [vmem:[%s7195_s15 + $0x28] sm:$0xff]  ;;  %v8622_v51 = vpop.xlane.xlu0 %2491  ;;  %v2517_v27 = vrot.slane %v8604_v59, 1 }
 0x369   : > { %v2737_v49 = vpop.f32.mrf.mxu0  ;;  %v3580_v45 = vmul.f32 %v6683_v54, %v6683_v54  ;;  %10015 = vst [vmem:[#allocation34_spill] sm:$0xff] %v8622_v51 }
 0x36a   : > { %v2958_v60 = vsub.f32 %v8554_v7, %v2894_v19  ;;  %v2887_v19 = vmul.f32 2.0, %v8566_v35  ;;  %v2895_v54 = vmul.f32 2.0, %v2737_v49 }
 0x36b   : > { %s6522_s3 = spop %6521  ;;  %v2741_v15 = vpop.f32.mrf.mxu0  ;;  %v3587_v37 = vrot.slane %v3580_v45, 4 }
 0x36c   : > { %v3012_v11 = vmin.f32 %v3010_v30, %v2958_v60  ;;  %s2030_s20 = smul.f32 0.00390625, %s6522_s3  ;;  %v2896_v53 = vmul.f32 2.0, %v2741_v15  ;;  %v8630_v60 = vld [vmem:[%s8615_s28] sm:$0xff]  ;;  %v2889_v15 = vmul.f32 2.0, %v8571_v52 }
 0x36d   : > { %v8598_v18 = vpop.f32.mrf.mxu0  ;;  %vm5342_vm2 = vcmp.gt.f32.partialorder %v8630_v60, 0.5 }
 0x36e   : > { %v2031_v63 = vstv %s2030_s20  ;;  %v2960_v16 = vsub.f32 %v8548_v8, %v2896_v53  ;;  %v3581_v53 = vrot.slane %v3579_v43, 4  ;;  %v8664_v49 = vsel %vm5342_vm2, 1.0, %v10012_v58 }
 0x36f   : > { %2033 = vst [vmem:[%s8596_s18] sm:$0x1] %v2031_v63  ;;  %v2747_v62 = vpop.f32.mrf.mxu0  ;;  %v2949_v63 = vsub.f32 %v8404_v24, %v2885_v5  ;;  %v8651_v24 = vld [vmem:[%s8615_s28 + $0x8] sm:$0xff]  ;;  %10020 = vst [vmem:[#allocation39_spill] sm:$0xff] %v8664_v49 }
 0x370   : > { %v3013_v46 = vmin.f32 %v3011_v56, %v2960_v16  ;;  %v2898_v0 = vmul.f32 2.0, %v2747_v62  ;;  %v2879_v56 = vmul.f32 2.0, %v8546_v57  ;;  %v2891_v57 = vmul.f32 2.0, %v8578_v55 }
 0x371   : > { %v8608_v2 = vpop.f32.mrf.mxu0  ;;  %v8658_v47 = vadd.f32 %v3581_v53, %v3579_v43  ;;  %vm5343_vm3 = vcmp.gt.f32.partialorder %v8651_v24, 0.5 }
 0x372   : > { %v2962_v12 = vsub.f32 %v8606_v14, %v2898_v0  ;;  %v8640_v0 = vpop.xlane.xlu0 %2497  ;;  %v2943_v52 = vsub.f32 %v8384_v4, %v2879_v56  ;;  %v2959_v56 = vsub.f32 %v8554_v7, %v2895_v54  ;;  %v8690_v7 = vmul.f32 2.0, %v8608_v2  ;;  %v5391_v2 = vld [vmem:[%s7138_s23 + $0x8] sm:$0xff] }
 0x373   : > { %v2753_v30 = vpop.f32.mrf.mxu0  ;;  %10017 = vst [vmem:[#allocation36_spill] sm:$0xff] %v8640_v0  ;;  %10019 = vst [vmem:[#allocation38_spill] sm:$0xff] %v8658_v47  ;;  %v5398_v0 = vld [vmem:[%s7138_s23 + $0x40] sm:$0xff] }
 0x374   : > { %v3014_v42 = vmin.f32 %v3012_v11, %v2962_v12  ;;  %v2900_v29 = vmul.f32 2.0, %v2753_v30  ;;  %v8635_v11 = vadd.f32 %v2523_v32, %v2522_v1  ;;  %v2951_v1 = vsub.f32 %v8564_v13, %v2887_v19 }
 0x375   : > { %v8627_v26 = vpop.f32.mrf.mxu0  ;;  %v2945_v12 = vsub.f32 %v8362_v22, %v2881_v28  ;;  %v2953_v32 = vsub.f32 %v8434_v23, %v2889_v15  ;;  %v3043_v4 = vmin.f32 %v2943_v52, %v2947_v41  ;;  %v2955_v13 = vsub.f32 %v8460_v39, %v2891_v57  ;;  %v8677_v28 = vld [vmem:[%s8615_s28 + $0x18] sm:$0xff]  ;;  %v8682_v15 = vpop.xlane.xlu1 %2458 }
 0x376   : > { %v2964_v17 = vsub.f32 %v8562_v10, %v2900_v29  ;;  %10016 = vst [vmem:[#allocation35_spill] sm:$0xff] %v8635_v11  ;;  %v8667_v23 = vpop.xlane.xlu0 %2503  ;;  %v8670_v29 = vld [vmem:[%s8615_s28 + $0x10] sm:$0xff]  ;;  %v2957_v39 = vsub.f32 %v8447_v38, %v2893_v25  ;;  %v2897_v19 = vmul.f32 2.0, %v8598_v18  ;;  %v8686_v41 = vadd.f32 %v2517_v27, %v8604_v59 }
 0x377   : > { %v2759_v35 = vpop.f32.mrf.mxu0  ;;  %v3044_v30 = vmin.f32 %v2945_v12, %v2949_v63  ;;  %10021 = vst [vmem:[#allocation40_spill] sm:$0xff] %v8667_v23  ;;  %v3045_v43 = vmin.f32 %v3043_v4, %v2951_v1  ;;  %vm5344_vm4 = vcmp.gt.f32.partialorder %v8670_v29, 0.5  ;;  %v5366_v63 = vld [vmem:[%s7136_s4] sm:$0xff]  ;;  %vm5345_vm5 = vcmp.gt.f32.partialorder %v8677_v28, 0.5  ;;  %v5371_v23 = vld [vmem:[%s7136_s4 + $0x28] sm:$0xff] }
 0x378   : > { %v3015_v16 = vmin.f32 %v3013_v46, %v2964_v17  ;;  %v2902_v62 = vmul.f32 2.0, %v2759_v35  ;;  %v8653_v46 = vadd.f32 %v3587_v37, %v3580_v45  ;;  %v5390_v45 = vld [vmem:[%s7138_s23] sm:$0xff]  ;;  %10022 = vst [vmem:[#allocation41_spill] sm:$0xff] %v8686_v41  ;;  %v8693_v35 = vld [vmem:[%s8615_s28 + $0x28] sm:$0xff]  ;;  %v2961_v54 = vsub.f32 %v8548_v8, %v2897_v19  ;;  %v5392_v8 = vld [vmem:[%s7138_s23 + $0x10] sm:$0xff] }
 0x379   : > { %v8648_v55 = vpop.f32.mrf.mxu0  ;;  %v3046_v17 = vmin.f32 %v3044_v30, %v2953_v32  ;;  %v5438_v38 = vmul.f32 %v8664_v49, %v5390_v45  ;;  %v3047_v57 = vmin.f32 %v3045_v43, %v2955_v13  ;;  %v2901_v12 = vmul.f32 2.0, %v8627_v26  ;;  %v8715_v4 = vpop.xlane.xlu1 %2464 }
 0x37a   : > { %10018 = vst [vmem:[#allocation37_spill] sm:$0xff] %v8653_v46  ;;  %v2966_v48 = vsub.f32 %v8643_v31, %v2902_v62  ;;  %v8700_v62 = vsel %vm5343_vm3, 1.0, %v10012_v58  ;;  %v8702_v52 = vpop.xlane.xlu0 %2509  ;;  %vm5347_vm7 = vcmp.gt.f32.partialorder %v8693_v35, 0.5  ;;  %v8722_v45 = vsel %vm5344_vm4, 1.0, %v10012_v58 }
 0x37b   : > { %v2765_v34 = vpop.f32.mrf.mxu0  ;;  %10023 = vst [vmem:[#allocation42_spill] sm:$0xff] %v8700_v62  ;;  %10024 = vst [vmem:[#allocation43_spill] sm:$0xff] %v8702_v52  ;;  %v3048_v1 = vmin.f32 %v3046_v17, %v2957_v39  ;;  %v3049_v25 = vmin.f32 %v3047_v57, %v2959_v56  ;;  %v2963_v26 = vsub.f32 %v8606_v14, %v8690_v7  ;;  %v5393_v39 = vld [vmem:[%s7138_s23 + $0x18] sm:$0xff]  ;;  %v2903_v57 = vmul.f32 2.0, %v8648_v55 }
 0x37c   : > { %v3016_v22 = vmin.f32 %v3014_v42, %v2966_v48  ;;  %v2904_v5 = vmul.f32 2.0, %v2765_v34  ;;  %v8680_v42 = vld [vmem:[%s8615_s28 + $0x20] sm:$0xff]  ;;  %v8710_v48 = vld [vmem:[%s8615_s28 + $0x30] sm:$0xff]  ;;  %v5462_v34 = vsub.f32 %v5366_v63, %v5438_v38  ;;  %10026 = vst [vmem:[#allocation45_spill] sm:$0xff] %v8722_v45  ;;  %v5439_v56 = vmul.f32 %v8700_v62, %v5391_v2  ;;  %v5395_v63 = vld [vmem:[%s7138_s23 + $0x28] sm:$0xff] }
 0x37d   : > { %v2767_v37 = vpop.f32.mrf.mxu0  ;;  %vm5346_vm6 = vcmp.gt.f32.partialorder %v8680_v42, 0.5  ;;  %vm5348_vm8 = vcmp.gt.f32.partialorder %v8710_v48, 0.5  ;;  %v2965_v38 = vsub.f32 %v8562_v10, %v2901_v12  ;;  %v8754_v2 = vpop.xlane.xlu1 %2470  ;;  %v5368_v12 = vld [vmem:[%s7136_s4 + $0x10] sm:$0xff]  ;;  %v3051_v11 = vmin.f32 %v3049_v25, %v2963_v26 }
 0x37e   : > { %v2968_v53 = vsub.f32 %v8569_v9, %v2904_v5  ;;  %v8730_v5 = vsel %vm5345_vm5, 1.0, %v10012_v58  ;;  %v8735_v43 = vsel %vm5346_vm6, 1.0, %v10012_v58  ;;  %v8739_v14 = vpop.xlane.xlu0 %3487  ;;  %v5486_v55 = vand.u32 2147483647, %v5462_v34 }
 0x37f   : > { %v2771_v18 = vpop.f32.mrf.mxu0  ;;  %v2905_v36 = vmul.f32 2.0, %v2767_v37  ;;  %v8762_v44 = vsel %vm5348_vm8, 1.0, %v10012_v58  ;;  %v8773_v37 = vld [vmem:[%s7130_s24] sm:$0xff] }
 0x380   : > { %v3017_v59 = vmin.f32 %v3015_v16, %v2968_v53  ;;  %v2906_v27 = vmul.f32 2.0, %v2771_v18  ;;  %v8713_v16 = vld [vmem:[%s8615_s28 + $0x38] sm:$0xff]  ;;  %v5394_v53 = vld [vmem:[%s7138_s23 + $0x20] sm:$0xff]  ;;  %10028 = vst [vmem:[#allocation47_spill] sm:$0xff] %v8762_v44 }
 0x381   : > { %v2773_v32 = vpop.f32.mrf.mxu0  ;;  %10025 = vst [vmem:[#allocation44_spill] sm:$0xff] %v8713_v16  ;;  %vm5349_vm9 = vcmp.gt.f32.partialorder %v8713_v16, 0.5  ;;  %v5367_v18 = vld [vmem:[%s7136_s4 + $0x8] sm:$0xff]  ;;  %v5442_v34 = vmul.f32 %v8735_v43, %v5394_v53  ;;  %v2969_v26 = vsub.f32 %v8569_v9, %v2905_v36  ;;  %v5446_v9 = vmul.f32 %v8664_v49, %v5398_v0 }
 0x382   : > { %v2970_v13 = vsub.f32 %v8682_v15, %v2906_v27  ;;  %v5440_v27 = vmul.f32 %v8722_v45, %v5392_v8  ;;  %v8767_v8 = vsel %vm5349_vm9, 1.0, %v10012_v58  ;;  %v5463_v47 = vsub.f32 %v5367_v18, %v5439_v56  ;;  %v8785_v16 = vpop.xlane.xlu0 %3484  ;;  %v5372_v18 = vld [vmem:[%s7136_s4 + $0x30] sm:$0xff] }
 0x383   : > { %v2777_v30 = vpop.f32.mrf.mxu0  ;;  %10029 = vst [vmem:[#allocation48_spill] sm:$0xff] %v8767_v8 }
 0x384   : > { %v3018_v19 = vmin.f32 %v3016_v22, %v2970_v13  ;;  %v2908_v17 = vmul.f32 2.0, %v2777_v30  ;;  %v8749_v22 = vsel %vm5347_vm7, 1.0, %v10012_v58  ;;  %v3050_v13 = vmin.f32 %v3048_v1, %v2961_v54  ;;  %v5396_v1 = vld [vmem:[%s7138_s23 + $0x30] sm:$0xff]  ;;  %v5397_v54 = vld [vmem:[%s7138_s23 + $0x38] sm:$0xff] }
 0x385   : > { %v2779_v7 = vpop.f32.mrf.mxu0  ;;  %10027 = vst [vmem:[#allocation46_spill] sm:$0xff] %v8749_v22  ;;  %v5441_v30 = vmul.f32 %v8730_v5, %v5393_v39  ;;  %v5369_v39 = vld [vmem:[%s7136_s4 + $0x18] sm:$0xff]  ;;  %v5443_v46 = vmul.f32 %v8749_v22, %v5395_v63  ;;  %v2967_v58 = vsub.f32 %v8643_v31, %v2903_v57  ;;  %v5464_v53 = vsub.f32 %v5368_v12, %v5440_v27  ;;  %v5399_v22 = vld [vmem:[%s7138_s23 + $0x48] sm:$0xff] }
 0x386   : > { %v2972_v10 = vsub.f32 %v8575_v6, %v2908_v17  ;;  %v3052_v41 = vmin.f32 %v3050_v13, %v2965_v38  ;;  %v5444_v56 = vmul.f32 %v8762_v44, %v5396_v1  ;;  %v5445_v25 = vmul.f32 %v8767_v8, %v5397_v54  ;;  %v5373_v63 = vld [vmem:[%s7136_s4 + $0x38] sm:$0xff] }
 0x387   : > { %v2783_v20 = vpop.f32.mrf.mxu0  ;;  %v8792_v57 = vmul.f32 %v5486_v55, %v8773_v37  ;;  %v5467_v12 = vsub.f32 %v5371_v23, %v5443_v46  ;;  %v5487_v1 = vand.u32 2147483647, %v5463_v47  ;;  %v3053_v44 = vmin.f32 %v3051_v11, %v2967_v58  ;;  %v5374_v46 = vld [vmem:[%s7136_s4 + $0x40] sm:$0xff] }
 0x388   : > { %v3019_v17 = vmin.f32 %v3017_v59, %v2972_v10  ;;  %v2910_v21 = vmul.f32 2.0, %v2783_v20  ;;  %v8782_v59 = vpop.xlane.xlu1 %2476  ;;  %v2907_v20 = vmul.f32 2.0, %v2773_v32  ;;  %v5465_v32 = vsub.f32 %v5369_v39, %v5441_v30 }
 0x389   : > { %v8779_v52 = vpop.f32.mrf.mxu0  ;;  %10030 = vst [vmem:[#allocation49_spill] sm:$0xff] %v8792_v57  ;;  %v2909_v54 = vmul.f32 2.0, %v2779_v7  ;;  %v5488_v51 = vand.u32 2147483647, %v5464_v53  ;;  %v5468_v47 = vsub.f32 %v5372_v18, %v5444_v56  ;;  %v5469_v58 = vsub.f32 %v5373_v63, %v5445_v25 }
 0x38a   : > { %v2974_v10 = vsub.f32 %v8715_v4, %v2910_v21  ;;  %v5466_v21 = vsub.f32 %v5370_v3, %v5442_v34  ;;  %v2971_v30 = vsub.f32 %v8682_v15, %v2907_v20  ;;  %v3054_v11 = vmin.f32 %v3052_v41, %v2969_v26  ;;  %v8809_v15 = vld [vmem:[%s7130_s24 + $0x10] sm:$0xff]  ;;  %v8821_v26 = vld [vmem:[%s7136_s4 + $0x48] sm:$0xff] }
 0x38b   : > { %v2789_v31 = vpop.f32.mrf.mxu0  ;;  %v3755_v38 = vpop.f32.mrf.mxu1  ;;  %v5489_v34 = vand.u32 2147483647, %v5465_v32  ;;  %v5400_v20 = vld [vmem:[%s7138_s23 + $0x50] sm:$0xff]  ;;  %v8815_v57 = vand.u32 2147483647, %v5467_v12  ;;  %v2973_v41 = vsub.f32 %v8575_v6, %v2909_v54 }
 0x38c   : > { %v3020_v27 = vmin.f32 %v3018_v19, %v2974_v10  ;;  %v2912_v13 = vmul.f32 2.0, %v2789_v31  ;;  %v8798_v55 = vpop.xlane.xlu1 %2482  ;;  %v8803_v19 = vld [vmem:[%s7130_s24 + $0x8] sm:$0xff]  ;;  %v5490_v39 = vand.u32 2147483647, %v5466_v21  ;;  %v8806_v31 = vpop.xlane.xlu0 %3493  ;;  %v8828_v32 = vmin.f32 %v3053_v44, %v2971_v30 }
 0x38d   : > { %v2791_v8 = vpop.f32.mrf.mxu0  ;;  %v3757_v36 = vpop.f32.mrf.mxu1  ;;  %v8824_v18 = vmul.f32 %v5487_v1, %v8803_v19  ;;  %v8831_v21 = vand.u32 2147483647, %v5468_v47  ;;  %v8833_v6 = vand.u32 2147483647, %v5469_v58  ;;  %v8840_v1 = vmul.f32 %v8722_v45, %v5400_v20 }
 0x38e   : > { %v2976_v3 = vsub.f32 %v8582_v40, %v2912_v13  ;;  %v2913_v23 = vmul.f32 2.0, %v2791_v8  ;;  %v8813_v13 = vmul.f32 %v8700_v62, %v5399_v22  ;;  %v3946_v8 = vmul.f32 2.0, %v3755_v38  ;;  %v8863_v62 = vld [vmem:[%s7136_s4 + $0x50] sm:$0xff] }
 0x38f   : > { %v2795_v7 = vpop.f32.mrf.mxu0  ;;  %v3761_v0 = vpop.f32.mrf.mxu1  ;;  %10031 = vst [vmem:[#allocation50_spill] sm:$0xff] %v8824_v18  ;;  %v3947_v12 = vmul.f32 2.0, %v3757_v36  ;;  %v3056_v58 = vmin.f32 %v3054_v11, %v2973_v41 }
 0x390   : > { %v3021_v53 = vmin.f32 %v3019_v17, %v2976_v3  ;;  %v2914_v10 = vmul.f32 2.0, %v2795_v7  ;;  %v5470_v17 = vsub.f32 %v5374_v46, %v5446_v9  ;;  %v8826_v63 = vpop.xlane.xlu1 %2488  ;;  %v2977_v38 = vsub.f32 %v8582_v40, %v2913_v23  ;;  %v8837_v7 = vld [vmem:[%s7130_s24 + $0x18] sm:$0xff] }
 0x391   : > { %v8818_v56 = vpop.f32.mrf.mxu0  ;;  %v3763_v25 = vpop.f32.mrf.mxu1  ;;  %v8843_v9 = vmul.f32 %v5488_v51, %v8809_v15  ;;  %v5471_v47 = vsub.f32 %v8821_v26, %v8813_v13  ;;  %v3948_v40 = vmul.f32 2.0, %v3761_v0  ;;  %v8857_v11 = vmul.f32 %v5489_v34, %v8837_v7 }
 0x392   : > { %v2978_v22 = vsub.f32 %v8754_v2, %v2914_v10  ;;  %v4010_v10 = vsub.f32 %v8785_v16, %v3946_v8  ;;  %v8848_v18 = vand.u32 2147483647, %v5470_v17  ;;  %v3058_v0 = vmin.f32 %v3056_v58, %v2977_v38 }
 0x393   : > { %v2801_v54 = vpop.f32.mrf.mxu0  ;;  %v3767_v3 = vpop.f32.mrf.mxu1  ;;  %10032 = vst [vmem:[#allocation51_spill] sm:$0xff] %v8843_v9  ;;  %10033 = vst [vmem:[#allocation52_spill] sm:$0xff] %v8857_v11  ;;  %v3949_v13 = vmul.f32 2.0, %v3763_v25  ;;  %v4011_v8 = vsub.f32 %v8785_v16, %v3947_v12  ;;  %v4012_v38 = vsub.f32 %v8739_v14, %v3948_v40 }
 0x394   : > { %v3022_v44 = vmin.f32 %v3020_v27, %v2978_v22  ;;  %v2916_v30 = vmul.f32 2.0, %v2801_v54  ;;  %v3950_v46 = vmul.f32 2.0, %v3767_v3  ;;  %v8850_v20 = vpop.xlane.xlu1 %2494  ;;  %v3491_v22 = vpop.xlane.xlu0 %3490  ;;  %v8854_v54 = vld [vmem:[%s7130_s24 + $0x20] sm:$0xff]  ;;  %v5401_v3 = vld [vmem:[%s7138_s23 + $0x58] sm:$0xff] }
 0x395   : > { %v2803_v36 = vpop.f32.mrf.mxu0  ;;  %v3769_v23 = vpop.f32.mrf.mxu1  ;;  %v8869_v11 = vmul.f32 %v5490_v39, %v8854_v54  ;;  %v4013_v40 = vsub.f32 %v8739_v14, %v3949_v13  ;;  %v8892_v13 = vmul.f32 %v8773_v37, %v8630_v60  ;;  %v8907_v60 = vmul.f32 2.0, %v8779_v52 }
 0x396   : > { %v2980_v51 = vsub.f32 %v8588_v50, %v2916_v30  ;;  %v2917_v9 = vmul.f32 2.0, %v2803_v36  ;;  %v3951_v27 = vmul.f32 2.0, %v3769_v23  ;;  %v4014_v17 = vsub.f32 %v3491_v22, %v3950_v46 }
 0x397   : > { %v2807_v41 = vpop.f32.mrf.mxu0  ;;  %v3773_v26 = vpop.f32.mrf.mxu1  ;;  %v8878_v46 = vmul.f32 %v8730_v5, %v5401_v3  ;;  %10034 = vst [vmem:[#allocation53_spill] sm:$0xff] %v8892_v13 }
 0x398   : > { %v3023_v45 = vmin.f32 %v3021_v53, %v2980_v51  ;;  %v2981_v30 = vsub.f32 %v8588_v50, %v2917_v9  ;;  %v2918_v36 = vmul.f32 2.0, %v2807_v41  ;;  %v3952_v23 = vmul.f32 2.0, %v3773_v26  ;;  %v8871_v16 = vpop.xlane.xlu1 %2500  ;;  %v8875_v9 = vld [vmem:[%s7130_s24 + $0x28] sm:$0xff] }
 0x399   : > { %v8865_v49 = vpop.f32.mrf.mxu0  ;;  %v3775_v34 = vpop.f32.mrf.mxu1  ;;  %v4015_v25 = vsub.f32 %v3491_v22, %v3951_v27  ;;  %v4074_v58 = vmin.f32 %v4010_v10, %v4014_v17  ;;  %v5472_v27 = vsub.f32 %v8863_v62, %v8840_v1  ;;  %v8885_v17 = vld [vmem:[%s7130_s24 + $0x30] sm:$0xff]  ;;  %v8896_v62 = vmul.f32 %v8815_v57, %v8875_v9 }
 0x39a   : > { %v3060_v53 = vmin.f32 %v3058_v0, %v2981_v30  ;;  %v2982_v50 = vsub.f32 %v8782_v59, %v2918_v36  ;;  %v3953_v12 = vmul.f32 2.0, %v3775_v34  ;;  %v4016_v10 = vsub.f32 %v8806_v31, %v3952_v23  ;;  %v3497_v23 = vpop.xlane.xlu0 %3496 }
 0x39b   : > { %v2813_v51 = vpop.f32.mrf.mxu0  ;;  %v3779_v41 = vpop.f32.mrf.mxu1  ;;  %v4111_v39 = vmin.f32 %v4011_v8, %v4015_v25  ;;  %v8887_v30 = vand.u32 2147483647, %v5471_v47  ;;  %10035 = vst [vmem:[#allocation54_spill] sm:$0xff] %v8896_v62 }
 0x39c   : > { %v3024_v22 = vmin.f32 %v3022_v44, %v2982_v50  ;;  %v2920_v0 = vmul.f32 2.0, %v2813_v51  ;;  %v3954_v26 = vmul.f32 2.0, %v3779_v41  ;;  %v4017_v34 = vsub.f32 %v8806_v31, %v3953_v12  ;;  %v8898_v1 = vpop.xlane.xlu1 %2506  ;;  %v5246_v31 = vld [vmem:[%s7128_s21] sm:$0xff]  ;;  %v5247_v12 = vld [vmem:[%s7128_s21 + $0x8] sm:$0xff] }
 0x39d   : > { %v2815_v3 = vpop.f32.mrf.mxu0  ;;  %v3781_v36 = vpop.f32.mrf.mxu1  ;;  %v4075_v14 = vmin.f32 %v4012_v38, %v4016_v10  ;;  %v8904_v38 = vmul.f32 %v8803_v19, %v8651_v24  ;;  %v8912_v51 = vmul.f32 %v8831_v21, %v8885_v17  ;;  %v8916_v24 = vld [vmem:[%s7136_s4 + $0x58] sm:$0xff]  ;;  %v5402_v19 = vld [vmem:[%s7138_s23 + $0x60] sm:$0xff]  ;;  %v8926_v21 = vmul.f32 %v8892_v13, %v5246_v31 }
 0x39e   : > { %v2984_v44 = vsub.f32 %v8591_v61, %v2920_v0  ;;  %v2921_v47 = vmul.f32 2.0, %v2815_v3  ;;  %v3955_v8 = vmul.f32 2.0, %v3781_v36  ;;  %v4112_v25 = vmin.f32 %v4013_v40, %v4017_v34  ;;  %v5250_v13 = vld [vmem:[%s7128_s21 + $0x20] sm:$0xff] }
 0x39f   : > { %10036 = vst [vmem:[#allocation55_spill] sm:$0xff] %v8904_v38  ;;  %v2819_v37 = vpop.f32.mrf.mxu0  ;;  %v3785_v57 = vpop.f32.mrf.mxu1  ;;  %v4018_v50 = vsub.f32 %v3497_v23, %v3954_v26  ;;  %v8923_v26 = vmul.f32 %v8809_v15, %v8670_v29  ;;  %10038 = vst [vmem:[#allocation57_spill] sm:$0xff] %v8926_v21  ;;  %v8936_v29 = vmul.f32 %v8735_v43, %v5402_v19 }
 0x3a0   : > { %v3025_v41 = vmin.f32 %v3023_v45, %v2984_v44  ;;  %v2985_v10 = vsub.f32 %v8591_v61, %v2921_v47  ;;  %v2922_v0 = vmul.f32 2.0, %v2819_v37  ;;  %v3956_v3 = vmul.f32 2.0, %v3785_v57  ;;  %v3500_v44 = vpop.xlane.xlu1 %3499  ;;  %v5248_v47 = vld [vmem:[%s7128_s21 + $0x10] sm:$0xff]  ;;  %v3503_v15 = vpop.xlane.xlu0 %3502 }
 0x3a1   : > { %v8919_v52 = vpop.f32.mrf.mxu0  ;;  %v3787_v36 = vpop.f32.mrf.mxu1  ;;  %v4019_v62 = vsub.f32 %v3497_v23, %v3955_v8  ;;  %v4076_v40 = vmin.f32 %v4074_v58, %v4018_v50  ;;  %10037 = vst [vmem:[#allocation56_spill] sm:$0xff] %v8923_v26  ;;  %v8933_v37 = vmul.f32 %v8904_v38, %v5247_v12 }
 0x3a2   : > { %v8928_v45 = vmin.f32 %v3060_v53, %v2985_v10  ;;  %v2986_v61 = vsub.f32 %v8798_v55, %v2922_v0  ;;  %v3957_v34 = vmul.f32 2.0, %v3787_v36  ;;  %v4020_v58 = vsub.f32 %v3500_v44, %v3956_v3 }
 0x3a3   : > { %10039 = vst [vmem:[#allocation58_spill] sm:$0xff] %v8933_v37  ;;  %v2825_v57 = vpop.f32.mrf.mxu0  ;;  %v3791_v8 = vpop.f32.mrf.mxu1  ;;  %v4113_v23 = vmin.f32 %v4111_v39, %v4019_v62  ;;  %v8940_v10 = vand.u32 2147483647, %v5472_v27  ;;  %v8944_v3 = vmul.f32 %v8837_v7, %v8677_v28  ;;  %v8947_v39 = vmul.f32 %v8923_v26, %v5248_v47 }
 0x3a4   : > { %v3026_v53 = vmin.f32 %v3024_v22, %v2986_v61  ;;  %v2924_v31 = vmul.f32 2.0, %v2825_v57  ;;  %v3958_v50 = vmul.f32 2.0, %v3791_v8  ;;  %v4021_v12 = vsub.f32 %v3500_v44, %v3957_v34  ;;  %v5249_v22 = vld [vmem:[%s7128_s21 + $0x18] sm:$0xff] }
 0x3a5   : > { %v2827_v0 = vpop.f32.mrf.mxu0  ;;  %v3793_v36 = vpop.f32.mrf.mxu1  ;;  %v4077_v38 = vmin.f32 %v4075_v14, %v4020_v58  ;;  %10040 = vst [vmem:[#allocation59_spill] sm:$0xff] %v8944_v3  ;;  %10041 = vst [vmem:[#allocation60_spill] sm:$0xff] %v8947_v39  ;;  %v5286_v61 = vand.u32 2147483647, %v8926_v21  ;;  %v5287_v27 = vand.u32 2147483647, %v8933_v37 }
 0x3a6   : > { %v2988_v62 = vsub.f32 %v8602_v33, %v2924_v31  ;;  %v3959_v19 = vmul.f32 2.0, %v3793_v36  ;;  %v2925_v14 = vmul.f32 2.0, %v2827_v0  ;;  %v4114_v7 = vmin.f32 %v4112_v25, %v4021_v12  ;;  %v3506_v31 = vpop.xlane.xlu1 %3505 }
 0x3a7   : > { %v2831_v44 = vpop.f32.mrf.mxu0  ;;  %v3797_v28 = vpop.f32.mrf.mxu1  ;;  %v4022_v57 = vsub.f32 %v3503_v15, %v3958_v50  ;;  %v8957_v36 = vmul.f32 %v8854_v54, %v8680_v42  ;;  %v8960_v21 = vmul.f32 2.0, %v8818_v56  ;;  %v8966_v25 = vmul.f32 %v8944_v3, %v5249_v22 }
 0x3a8   : > { %v3027_v47 = vmin.f32 %v3025_v41, %v2988_v62  ;;  %v2926_v8 = vmul.f32 2.0, %v2831_v44  ;;  %v3960_v58 = vmul.f32 2.0, %v3797_v28  ;;  %v4023_v26 = vsub.f32 %v3503_v15, %v3959_v19 }
 0x3a9   : > { %10042 = vst [vmem:[#allocation61_spill] sm:$0xff] %v8957_v36  ;;  %v8962_v37 = vpop.f32.mrf.mxu0  ;;  %v3799_v34 = vpop.f32.mrf.mxu1  ;;  %v4078_v0 = vmin.f32 %v4076_v40, %v4022_v57  ;;  %10043 = vst [vmem:[#allocation62_spill] sm:$0xff] %v8966_v25  ;;  %v5288_v12 = vand.u32 2147483647, %v8947_v39  ;;  %v5294_v42 = vadd.f32 %v5287_v27, %v5286_v61  ;;  %v2989_v54 = vsub.f32 %v8602_v33, %v2925_v14  ;;  %v5251_v57 = vld [vmem:[%s7128_s21 + $0x28] sm:$0xff] }
 0x3aa   : > { %v2990_v41 = vsub.f32 %v8826_v63, %v2926_v8  ;;  %v3961_v50 = vmul.f32 2.0, %v3799_v34  ;;  %v4024_v44 = vsub.f32 %v3506_v31, %v3960_v58  ;;  %v4115_v28 = vmin.f32 %v4113_v23, %v4023_v26  ;;  %v10047_v23 = vld [vmem:[#allocation34_spill] sm:$0xff]  ;;  %v3509_v14 = vpop.xlane.xlu1 %3508 }
 0x3ab   : > { %v2837_v56 = vpop.f32.mrf.mxu0  ;;  %v3803_v62 = vpop.f32.mrf.mxu1  ;;  %v8973_v40 = vmul.f32 %v8875_v9, %v8693_v35  ;;  %v8977_v8 = vmul.f32 %v8957_v36, %v5250_v13  ;;  %v8981_v33 = vmul.f32 %v8885_v17, %v8710_v48  ;;  %v5289_v26 = vand.u32 2147483647, %v8966_v25 }
 0x3ac   : > { %v3028_v15 = vmin.f32 %v3026_v53, %v2990_v41  ;;  %v2928_v19 = vmul.f32 2.0, %v2837_v56  ;;  %v3962_v22 = vmul.f32 2.0, %v3803_v62  ;;  %v4025_v61 = vsub.f32 %v3506_v31, %v3961_v50 }
 0x3ad   : > { %10044 = vst [vmem:[#allocation63_spill] sm:$0xff] %v8973_v40  ;;  %10045 = vst [vmem:[#allocation64_spill] sm:$0xff] %v8977_v8  ;;  %v2839_v34 = vpop.f32.mrf.mxu0  ;;  %v3805_v39 = vpop.f32.mrf.mxu1  ;;  %v4079_v27 = vmin.f32 %v4077_v38, %v4024_v44  ;;  %v5295_v58 = vadd.f32 %v5294_v42, %v5288_v12  ;;  %v3064_v41 = vmin.f32 %v8928_v45, %v2989_v54  ;;  %v2919_v44 = vmul.f32 2.0, %v8865_v49 }
 0x3ae   : > { %10046 = vst [vmem:[#allocation65_spill] sm:$0xff] %v8981_v33  ;;  %v2992_v35 = vsub.f32 %v10047_v23, %v2928_v19  ;;  %v2929_v9 = vmul.f32 2.0, %v2839_v34  ;;  %v3963_v53 = vmul.f32 2.0, %v3805_v39  ;;  %v4116_v62 = vmin.f32 %v4114_v7, %v4025_v61 }
 0x3af   : > { %v2843_v13 = vpop.f32.mrf.mxu0  ;;  %v3809_v56 = vpop.f32.mrf.mxu1  ;;  %v4026_v36 = vsub.f32 %v3509_v14, %v3962_v22  ;;  %v8987_v38 = vmul.f32 %v8973_v40, %v5251_v57  ;;  %v5290_v45 = vand.u32 2147483647, %v8977_v8  ;;  %v5296_v34 = vadd.f32 %v5295_v58, %v5289_v26  ;;  %v5261_v58 = vld [vmem:[%s7130_s24 + $0x38] sm:$0xff] }
 0x3b0   : > { %v3029_v48 = vmin.f32 %v3027_v47, %v2992_v35  ;;  %v2993_v17 = vsub.f32 %v10047_v23, %v2929_v9  ;;  %v2930_v31 = vmul.f32 2.0, %v2843_v13  ;;  %v3964_v50 = vmul.f32 2.0, %v3809_v56  ;;  %v3512_v57 = vpop.xlane.xlu0 %3511  ;;  %v5252_v47 = vld [vmem:[%s7128_s21 + $0x30] sm:$0xff] }
 0x3b1   : > { %10048 = vst [vmem:[#allocation34_spill] sm:$0xff] %v8987_v38  ;;  %v2845_v39 = vpop.f32.mrf.mxu0  ;;  %v3811_v19 = vpop.f32.mrf.mxu1  ;;  %v4027_v12 = vsub.f32 %v3509_v14, %v3963_v53  ;;  %v4080_v42 = vmin.f32 %v4078_v0, %v4026_v36  ;;  %v10049_v61 = vsub.f32 %v8715_v4, %v8907_v60  ;;  %v2979_v23 = vsub.f32 %v8754_v2, %v8960_v21  ;;  %v10051_v21 = vld [vmem:[#allocation36_spill] sm:$0xff] }
 0x3b2   : > { %v8992_v54 = vmin.f32 %v3064_v41, %v2993_v17  ;;  %v2994_v7 = vsub.f32 %v8850_v20, %v2930_v31  ;;  %v3965_v22 = vmul.f32 2.0, %v3811_v19  ;;  %v4028_v9 = vsub.f32 %v3512_v57, %v3964_v50  ;;  %v9015_v50 = vld [vmem:[%s7136_s4 + $0x60] sm:$0xff]  ;;  %v5403_v19 = vld [vmem:[%s7138_s23 + $0x68] sm:$0xff] }
 0x3b3   : > { %v3057_v49 = vmin.f32 %v8828_v32, %v10049_v61  ;;  %v2849_v36 = vpop.f32.mrf.mxu0  ;;  %v3815_v0 = vpop.f32.mrf.mxu1  ;;  %v4117_v35 = vmin.f32 %v4115_v28, %v4027_v12  ;;  %v2923_v53 = vmul.f32 2.0, %v8919_v52  ;;  %v2983_v4 = vsub.f32 %v8782_v59, %v2919_v44 }
 0x3b4   : > { %v9003_v14 = vmin.f32 %v3028_v15, %v2994_v7  ;;  %v2932_v41 = vmul.f32 2.0, %v2849_v36  ;;  %v3966_v26 = vmul.f32 2.0, %v3815_v0  ;;  %v4029_v13 = vsub.f32 %v3512_v57, %v3965_v22  ;;  %v3515_v15 = vpop.xlane.xlu1 %3514 }
 0x3b5   : > { %v2851_v60 = vpop.f32.mrf.mxu0  ;;  %v3817_v32 = vpop.f32.mrf.mxu1  ;;  %v9007_v56 = vmin.f32 %v4079_v27, %v4028_v9  ;;  %v9010_v2 = vmul.f32 %v8981_v33, %v5252_v47  ;;  %v5291_v17 = vand.u32 2147483647, %v8987_v38  ;;  %v5297_v31 = vadd.f32 %v5296_v34, %v5290_v45  ;;  %v10052_v34 = vld [vmem:[#allocation44_spill] sm:$0xff] }
 0x3b6   : > { %v2996_v28 = vsub.f32 %v10051_v21, %v2932_v41  ;;  %v3967_v52 = vmul.f32 2.0, %v3817_v32  ;;  %v2927_v59 = vmul.f32 2.0, %v8962_v37  ;;  %v9021_v12 = vmin.f32 %v4116_v62, %v4029_v13  ;;  %v5422_v37 = vld [vmem:[%s7130_s24 + $0x40] sm:$0xff]  ;;  %v5404_v41 = vld [vmem:[%s7138_s23 + $0x70] sm:$0xff] }
 0x3b7   : > { %10050 = vst [vmem:[#allocation66_spill] sm:$0xff] %v9010_v2  ;;  %v2855_v27 = vpop.f32.mrf.mxu0  ;;  %v9019_v44 = vpop.f32.mrf.mxu1  ;;  %v4030_v7 = vsub.f32 %v3515_v15, %v3966_v26  ;;  %v9024_v22 = vmul.f32 %v8833_v6, %v5261_v58  ;;  %v3059_v57 = vmin.f32 %v3057_v49, %v2979_v23  ;;  %v2987_v45 = vsub.f32 %v8798_v55, %v2923_v53  ;;  %v5253_v6 = vld [vmem:[%s7128_s21 + $0x38] sm:$0xff]  ;;  %v10054_v23 = vld [vmem:[#allocation46_spill] sm:$0xff]  ;;  %v5406_v13 = vld [vmem:[%s7138_s23 + $0x80] sm:$0xff] }
 0x3b8   : > { %v9027_v47 = vmin.f32 %v3029_v48, %v2996_v28  ;;  %v9030_v61 = vmul.f32 %v5261_v58, %v10052_v34  ;;  %v4031_v62 = vsub.f32 %v3515_v15, %v3967_v52  ;;  %v5405_v49 = vld [vmem:[%s7138_s23 + $0x78] sm:$0xff]  ;;  %v9041_v55 = vmul.f32 %v10054_v23, %v5403_v19 }
 0x3b9   : > { %v2857_v36 = vpop.f32.mrf.mxu0  ;;  %v9033_v0 = vpop.f32.mrf.mxu1  ;;  %v9035_v9 = vmin.f32 %v4080_v42, %v4030_v7  ;;  %v3061_v53 = vmin.f32 %v3059_v57, %v2983_v4  ;;  %v2931_v26 = vmul.f32 2.0, %v2845_v39  ;;  %v5292_v58 = vand.u32 2147483647, %v9010_v2  ;;  %v5407_v42 = vld [vmem:[%s7138_s23 + $0x88] sm:$0xff]  ;;  %v5408_v7 = vld [vmem:[%s7138_s23 + $0x90] sm:$0xff]  ;;  %v10057_v57 = vld [vmem:[#allocation47_spill] sm:$0xff] }
 0x3ba   : > { %10053 = vst [vmem:[#allocation36_spill] sm:$0xff] %v9030_v61  ;;  %v5298_v32 = vadd.f32 %v5297_v31, %v5291_v17  ;;  %v2991_v28 = vsub.f32 %v8826_v63, %v2927_v59  ;;  %v9049_v19 = vmin.f32 %v4117_v35, %v4031_v62  ;;  %v10055_v34 = vsub.f32 %v8916_v24, %v8878_v46  ;;  %v5409_v63 = vld [vmem:[%s7138_s23 + $0x98] sm:$0xff]  ;;  %v5410_v59 = vld [vmem:[%s7138_s23 + $0xa0] sm:$0xff] }
 0x3bb   : > { %v2861_v52 = vpop.f32.mrf.mxu0  ;;  %v3827_v15 = vpop.f32.mrf.mxu1  ;;  %v9058_v39 = vmul.f32 %v8848_v18, %v5422_v37  ;;  %v3063_v17 = vmin.f32 %v3061_v53, %v2987_v45  ;;  %v9061_v31 = vmul.f32 %v9030_v61, %v5253_v6  ;;  %v9066_v48 = vmul.f32 %v10057_v57, %v5404_v41  ;;  %v10058_v35 = vld [vmem:[#allocation48_spill] sm:$0xff]  ;;  %v9072_v18 = vld [vmem:[%s7136_s4 + $0x68] sm:$0xff]  ;;  %v10059_v37 = vld [vmem:[#allocation39_spill] sm:$0xff] }
 0x3bc   : > { %v9055_v4 = vand.u32 2147483647, %v10055_v34  ;;  %v9069_v62 = vmul.f32 %v10058_v35, %v5405_v49  ;;  %v2933_v2 = vmul.f32 2.0, %v2851_v60  ;;  %v2934_v46 = vmul.f32 2.0, %v2855_v27  ;;  %v5411_v45 = vld [vmem:[%s7138_s23 + $0xa8] sm:$0xff]  ;;  %v10060_v53 = vld [vmem:[#allocation42_spill] sm:$0xff] }
 0x3bd   : > { %10056 = vst [vmem:[#allocation44_spill] sm:$0xff] %v9061_v31  ;;  %v2863_v24 = vpop.f32.mrf.mxu0  ;;  %v3829_v34 = vpop.f32.mrf.mxu1  ;;  %v9076_v6 = vmul.f32 %v10059_v37, %v5406_v13  ;;  %v9079_v61 = vmul.f32 %v10060_v53, %v5407_v42  ;;  %v2995_v41 = vsub.f32 %v8850_v20, %v2931_v26  ;;  %v2936_v49 = vmul.f32 2.0, %v2861_v52  ;;  %v9085_v60 = vld [vmem:[%s7136_s4 + $0x70] sm:$0xff]  ;;  %v10062_v27 = vld [vmem:[#allocation45_spill] sm:$0xff]  ;;  %v9091_v37 = vld [vmem:[%s7136_s4 + $0x78] sm:$0xff] }
 0x3be   : > { %v9082_v38 = vadd.f32 %v5298_v32, %v5292_v58  ;;  %v9088_v33 = vmul.f32 %v10062_v27, %v5408_v7  ;;  %v3065_v8 = vmin.f32 %v3063_v17, %v2991_v28  ;;  %v2935_v40 = vmul.f32 2.0, %v2857_v36  ;;  %v9100_v32 = vld [vmem:[%s7136_s4 + $0x80] sm:$0xff]  ;;  %v9103_v52 = vld [vmem:[%s7136_s4 + $0x88] sm:$0xff]  ;;  %v9137_v57 = vld [vmem:[%s7136_s4 + $0x98] sm:$0xff] }
 0x3bf   : > { %v2867_v25 = vpop.f32.mrf.mxu0  ;;  %v3833_v13 = vpop.f32.mrf.mxu1  ;;  %v9094_v42 = vmul.f32 %v8730_v5, %v5409_v63  ;;  %v9097_v20 = vmul.f32 %v8735_v43, %v5410_v59  ;;  %v2937_v26 = vmul.f32 2.0, %v2863_v24  ;;  %v9106_v28 = vmul.f32 %v10054_v23, %v5411_v45  ;;  %v9114_v59 = vld [vmem:[%s7136_s4 + $0x90] sm:$0xff]  ;;  %v10065_v53 = vld [vmem:[#allocation40_spill] sm:$0xff] }
 0x3c0   : > { %10061 = vst [vmem:[#allocation46_spill] sm:$0xff] %v9082_v38  ;;  %v2938_v58 = vmul.f32 2.0, %v2867_v25  ;;  %v2997_v7 = vsub.f32 %v10051_v21, %v2933_v2  ;;  %v2998_v5 = vsub.f32 %v8871_v16, %v2934_v46  ;;  %v3968_v17 = vmul.f32 2.0, %v9019_v44 }
 0x3c1   : > { %10063 = vst [vmem:[#allocation39_spill] sm:$0xff] %v9097_v20  ;;  %10064 = vst [vmem:[#allocation42_spill] sm:$0xff] %v9106_v28  ;;  %v2869_v43 = vpop.f32.mrf.mxu0  ;;  %v3835_v63 = vpop.f32.mrf.mxu1  ;;  %v3067_v24 = vmin.f32 %v3065_v8, %v2995_v41  ;;  %v3000_v23 = vsub.f32 %v10065_v53, %v2936_v49  ;;  %v2999_v2 = vsub.f32 %v8871_v16, %v2935_v40  ;;  %v3969_v21 = vmul.f32 2.0, %v9033_v0 }
 0x3c2   : > { %v2939_v45 = vmul.f32 2.0, %v2869_v43  ;;  %v3001_v8 = vsub.f32 %v10065_v53, %v2937_v26  ;;  %v3002_v41 = vsub.f32 %v8898_v1, %v2938_v58  ;;  %v3518_v43 = vpop.xlane.xlu0 %3517  ;;  %v3068_v40 = vmin.f32 %v8992_v54, %v2997_v7  ;;  %v10066_v53 = vld [vmem:[#allocation43_spill] sm:$0xff]  ;;  %v3521_v28 = vpop.xlane.xlu1 %3520 }
 0x3c3   : > { %v2873_v46 = vpop.f32.mrf.mxu0  ;;  %v3839_v44 = vpop.f32.mrf.mxu1  ;;  %v3032_v0 = vmin.f32 %v9003_v14, %v2998_v5  ;;  %v3970_v27 = vmul.f32 2.0, %v3827_v15  ;;  %v4032_v35 = vsub.f32 %v3518_v43, %v3968_v17  ;;  %v3033_v3 = vmin.f32 %v9027_v47, %v3000_v23  ;;  %v9143_v23 = vld [vmem:[%s7407_s22 + $0x3] ss:$0 sm:$0xff] }
 0x3c4   : > { %v2940_v49 = vmul.f32 2.0, %v2873_v46  ;;  %v3003_v26 = vsub.f32 %v8898_v1, %v2939_v45  ;;  %v3069_v16 = vmin.f32 %v3067_v24, %v2999_v2  ;;  %v3971_v38 = vmul.f32 2.0, %v3829_v34 }
 0x3c5   : > { %v2875_v25 = vpop.f32.mrf.mxu0  ;;  %v3841_v36 = vpop.f32.mrf.mxu1  ;;  %v3972_v54 = vmul.f32 2.0, %v3833_v13  ;;  %v4033_v15 = vsub.f32 %v3518_v43, %v3969_v21  ;;  %v3070_v5 = vmin.f32 %v3068_v40, %v3001_v8  ;;  %v3034_v17 = vmin.f32 %v3032_v0, %v3002_v41 }
 0x3c6   : > { %v3004_v58 = vsub.f32 %v10066_v53, %v2940_v49  ;;  %v2941_v46 = vmul.f32 2.0, %v2875_v25  ;;  %v3973_v1 = vmul.f32 2.0, %v3835_v63  ;;  %v4083_v24 = vmin.f32 %v9007_v56, %v4032_v35 }
 0x3c7   : > { %v3845_v7 = vpop.f32.mrf.mxu1  ;;  %v9139_v14 = vpop.f32.mrf.mxu0  ;;  %v4034_v34 = vsub.f32 %v3521_v28, %v3970_v27  ;;  %v3071_v2 = vmin.f32 %v3069_v16, %v3003_v26  ;;  %v3974_v8 = vmul.f32 2.0, %v3839_v44  ;;  %v3975_v49 = vmul.f32 2.0, %v3841_v36 }
 0x3c8   : > { %10067 = vst [vmem:[#allocation45_spill] sm:$0xff] %v9139_v14  ;;  %v3035_v20 = vmin.f32 %v3033_v3, %v3004_v58  ;;  %v3005_v47 = vsub.f32 %v10066_v53, %v2941_v46  ;;  %v3524_v3 = vpop.xlane.xlu0 %3523  ;;  %v4120_v63 = vmin.f32 %v9021_v12, %v4033_v15  ;;  %v4035_v0 = vsub.f32 %v3521_v28, %v3971_v38  ;;  %v3527_v44 = vpop.xlane.xlu1 %3526 }
 0x3c9   : > { %v9145_v45 = vpop.f32.mrf.mxu1  ;;  %v9147_v25 = vpop.f32.mrf.mxu0  ;;  %v10069_v53 = vsub.f32 %v9015_v50, %v8936_v29  ;;  %v4084_v36 = vmin.f32 %v9035_v9, %v4034_v34  ;;  %v4037_v46 = vsub.f32 %v3524_v3, %v3973_v1  ;;  %v10070_v12 = vsub.f32 %v9072_v18, %v9041_v55 }
 0x3ca   : > { %10068 = vst [vmem:[#allocation40_spill] sm:$0xff] %v9147_v25  ;;  %v3036_v21 = vmin.f32 %v3034_v17, %v3035_v20  ;;  %v3072_v41 = vmin.f32 %v3070_v5, %v3005_v47  ;;  %v4036_v20 = vsub.f32 %v3524_v3, %v3972_v54  ;;  %v10071_v29 = vsub.f32 %v9085_v60, %v9066_v48 }
 0x3cb   : > { %v9152_v43 = vpop.f32.mrf.mxu1  ;;  %v6469_v40 = vpop.f32.mrf.mxu0  ;;  %v9158_v56 = vand.u32 2147483647, %v10069_v53  ;;  %v9165_v38 = vand.u32 2147483647, %v10070_v12  ;;  %v4038_v5 = vsub.f32 %v3527_v44, %v3974_v8  ;;  %v4121_v1 = vmin.f32 %v9049_v19, %v4035_v0  ;;  %v5423_v8 = vld [vmem:[%s7130_s24 + $0x48] sm:$0xff] }
 0x3cc   : > { %v3037_v35 = vrot.slane %v3036_v21, 4  ;;  %v3073_v27 = vmin.f32 %v3071_v2, %v3072_v41  ;;  %v4335_v16 = vadd.f32 %v6469_v40, %v9143_v23  ;;  %v9170_v50 = vand.u32 2147483647, %v10071_v29 }
 0x3cd   : > { %v3853_v26 = vpop.f32.mrf.mxu1  ;;  %v4329_v58 = vpop.f32.mrf.mxu0  ;;  %v4039_v55 = vsub.f32 %v3527_v44, %v3975_v49  ;;  %v10072_v18 = vsub.f32 %v9091_v37, %v9069_v62  ;;  %v3976_v41 = vmul.f32 2.0, %v3845_v7  ;;  %v10073_v37 = vmov 0.0   ;;  %v5424_v7 = vld [vmem:[%s7130_s24 + $0x50] sm:$0xff] }
 0x3ce   : > { %v3038_v28 = vmin.f32 %v3036_v21, %v3037_v35  ;;  %v3074_v15 = vrot.slane %v3073_v27, 4  ;;  %v4330_v54 = vadd.f32 %v9143_v23, %v4329_v58  ;;  %v4520_v47 = vmul.f32 %v4335_v16, %v4335_v16 }
 0x3cf   : > { %v9173_v17 = vpop.f32.mrf.mxu1  ;;  %v6472_v9 = vpop.f32.mrf.mxu0  ;;  %v9179_v34 = vand.u32 2147483647, %v10072_v18  ;;  %v4085_v21 = vmin.f32 %v4083_v24, %v4036_v20  ;;  %v9190_v49 = vmin.f32 %v4120_v63, %v4037_v46  ;;  %v9193_v35 = vmin.f32 %v4084_v36, %v4038_v5  ;;  %v5425_v63 = vld [vmem:[%s7130_s24 + $0x58] sm:$0xff] }
 0x3d0   : > { %v3039_v48 = vrot.slane %v3038_v28, 2  ;;  %v3075_v60 = vmin.f32 %v3073_v27, %v3074_v15  ;;  %v4519_v2 = vmul.f32 %v4330_v54, %v4330_v54  ;;  %6129 = vmatmul.mubr.msk.f32.vlgmr.msra.gmra.mxu0 %vm880_vm0, %v4330_v54  ;;  %v9184_v3 = vadd.f32 %v6472_v9, %v9143_v23  ;;  %v3530_v54 = vpop.xlane.xlu0 %3529 }
 0x3d1   : > { %v9186_v40 = vpop.f32.mrf.mxu1  ;;  %v4554_v19 = vsel %vm880_vm0, %v4520_v47, 0.0  ;;  %v4339_v62 = vpop.f32.mrf.mxu0  ;;  %4827 = vmatprep.mubr.f32.mxu0 %v10073_v37  ;;  %v9201_v12 = vmin.f32 %v4121_v1, %v4039_v55  ;;  %v9205_v46 = vmul.f32 %v8887_v30, %v5423_v8  ;;  %v9208_v36 = vmul.f32 2.0, %v9145_v45  ;;  %v5426_v55 = vld [vmem:[%s7130_s24 + $0x60] sm:$0xff] }
 0x3d2   : > { %v3040_v0 = vmin.f32 %v3038_v28, %v3039_v48  ;;  %v3076_v53 = vrot.slane %v3075_v60, 2  ;;  %4555 = vadd.xlane.f32.xlu1 %v4554_v19  ;;  %v4340_v24 = vadd.f32 %v9143_v23, %v4339_v62  ;;  %v4551_v44 = vsel %vm880_vm0, %v4519_v2, 0.0 }
 0x3d3   : > { %v9196_v27 = vpop.f32.mrf.mxu1  ;;  %v6475_v20 = vpop.f32.mrf.mxu0  ;;  %v4522_v58 = vmul.f32 %v9184_v3, %v9184_v3  ;;  %4552 = vadd.xlane.f32.xlu0 %v4551_v44  ;;  %v4040_v30 = vsub.f32 %v3530_v54, %v3976_v41  ;;  %v9218_v45 = vmul.f32 %v8940_v10, %v5424_v7  ;;  %v3978_v2 = vmul.f32 2.0, %v9152_v43 }
 0x3d4   : > { %v3077_v29 = vmin.f32 %v3075_v60, %v3076_v53  ;;  %v4521_v28 = vmul.f32 %v4340_v24, %v4340_v24  ;;  %v9211_v15 = vadd.f32 %v6475_v20, %v9143_v23  ;;  %6130 = vmatmul.mubr.msk.f32.gmra.mxu0 %vm880_vm0, %v4335_v16  ;;  %v3041_v1 = vrot.slane %v3040_v0, 1  ;;  %v5427_v53 = vld [vmem:[%s7130_s24 + $0x68] sm:$0xff] }
 0x3d5   : > { %v3865_v5 = vpop.f32.mrf.mxu1  ;;  %v4349_v9 = vpop.f32.mrf.mxu0  ;;  %v4560_v47 = vsel %vm880_vm0, %v4522_v58, 0.0  ;;  %4833 = vmatprep.mubr.f32.mxu0 %v10073_v37  ;;  %v9227_v60 = vmul.f32 %v9055_v4, %v5425_v63  ;;  %v3979_v8 = vmul.f32 2.0, %v3853_v26  ;;  %v9239_v44 = vmul.f32 %v9158_v56, %v5426_v55 }
 0x3d6   : > { %v9221_v18 = vadd.f32 %v9143_v23, %v4349_v9  ;;  %4561 = vadd.xlane.f32.xlu1 %v4560_v47  ;;  %v4557_v16 = vsel %vm880_vm0, %v4521_v28, 0.0  ;;  %v4524_v48 = vmul.f32 %v9211_v15, %v9211_v15  ;;  %v3042_v62 = vmin.f32 %v3040_v0, %v3041_v1  ;;  %v10074_v28 = vld [vmem:[#allocation41_spill] sm:$0xff]  ;;  %v3533_v1 = vpop.xlane.xlu1 %3532 }
 0x3d7   : > { %v3869_v41 = vpop.f32.mrf.mxu1  ;;  %v6478_v19 = vpop.f32.mrf.mxu0  ;;  %v3078_v10 = vrot.slane %v3077_v29, 1  ;;  %4558 = vadd.xlane.f32.xlu0 %v4557_v16  ;;  %v4041_v0 = vsub.f32 %v3530_v54, %v9208_v36  ;;  %v9245_v58 = vmin.f32 %v4085_v21, %v4040_v30  ;;  %v9255_v55 = vmul.f32 %v9165_v38, %v5427_v53  ;;  %v10075_v16 = vld [vmem:[#allocation35_spill] sm:$0xff] }
 0x3d8   : > { %v4523_v7 = vmul.f32 %v9221_v18, %v9221_v18  ;;  %v9234_v20 = vadd.f32 %v6478_v19, %v9143_v23  ;;  %6131 = vmatmul.mubr.msk.f32.gmra.mxu0 %vm880_vm0, %v4340_v24  ;;  %v4566_v4 = vsel %vm880_vm0, %v4524_v48, 0.0  ;;  %v3080_v9 = vadd.f32 %v3042_v62, %v10074_v28 }
 0x3d9   : > { %v9241_v43 = vpop.f32.mrf.mxu1  ;;  %v4359_v26 = vpop.f32.mrf.mxu0  ;;  %4839 = vmatprep.mubr.f32.mxu0 %v10073_v37  ;;  %v3079_v63 = vmin.f32 %v3077_v29, %v3078_v10  ;;  %v3980_v36 = vmul.f32 2.0, %v9173_v17  ;;  %v4042_v29 = vsub.f32 %v3533_v1, %v3978_v2  ;;  %v4043_v30 = vsub.f32 %v3533_v1, %v3979_v8 }
 0x3da   : > { %v4526_v24 = vmul.f32 %v9234_v20, %v9234_v20  ;;  %v9251_v47 = vadd.f32 %v9143_v23, %v4359_v26  ;;  %4567 = vadd.xlane.f32.xlu1 %v4566_v4  ;;  %v4563_v56 = vsel %vm880_vm0, %v4523_v7, 0.0  ;;  %v3536_v10 = vpop.xlane.xlu0 %3535  ;;  %v3082_v17 = vmax.f32 %v3080_v9, 0.0 }
 0x3db   : > { %v3875_v21 = vpop.f32.mrf.mxu1  ;;  %v6481_v54 = vpop.f32.mrf.mxu0  ;;  %v3081_v48 = vadd.f32 %v3079_v63, %v10075_v16  ;;  %4564 = vadd.xlane.f32.xlu0 %v4563_v56  ;;  %v3981_v53 = vmul.f32 2.0, %v9186_v40  ;;  %v3982_v2 = vmul.f32 2.0, %v9196_v27  ;;  %v4124_v4 = vmin.f32 %v9190_v49, %v4041_v0 }
 0x3dc   : > { %v4525_v19 = vmul.f32 %v9251_v47, %v9251_v47  ;;  %v9262_v62 = vadd.f32 %v6481_v54, %v9143_v23  ;;  %6132 = vmatmul.mubr.msk.f32.gmra.mxu0 %vm880_vm0, %v9184_v3  ;;  %v4572_v38 = vsel %vm880_vm0, %v4526_v24, 0.0  ;;  %v3983_v63 = vmul.f32 2.0, %v3865_v5  ;;  %v3539_v54 = vpop.xlane.xlu1 %3538 }
 0x3dd   : > { %v3877_v8 = vpop.f32.mrf.mxu1  ;;  %v4369_v7 = vpop.f32.mrf.mxu0  ;;  %4845 = vmatprep.mubr.f32.mxu0 %v10073_v37  ;;  %v3083_v26 = vmax.f32 %v3081_v48, 0.0  ;;  %v3984_v40 = vmul.f32 2.0, %v3869_v41  ;;  %v4088_v56 = vmin.f32 %v9193_v35, %v4042_v29  ;;  %v4044_v1 = vsub.f32 %v3536_v10, %v3980_v36 }
 0x3de   : > { %v4528_v3 = vmul.f32 %v9262_v62, %v9262_v62  ;;  %v9274_v28 = vadd.f32 %v9143_v23, %v4369_v7  ;;  %4573 = vadd.xlane.f32.xlu1 %v4572_v38  ;;  %v4569_v9 = vsel %vm880_vm0, %v4525_v19, 0.0  ;;  %v4125_v41 = vmin.f32 %v9201_v12, %v4043_v30  ;;  %v5428_v7 = vld [vmem:[%s7130_s24 + $0x70] sm:$0xff] }
 0x3df   : > { %v3881_v24 = vpop.f32.mrf.mxu1  ;;  %v6484_v27 = vpop.f32.mrf.mxu0  ;;  %v3085_v49 = vsel %vm1302_vm1, %v3083_v26, 0.0  ;;  %4570 = vadd.xlane.f32.xlu0 %v4569_v9  ;;  %v3084_v35 = vsel %vm1302_vm1, %v3082_v17, 0.0  ;;  %v4045_v16 = vsub.f32 %v3536_v10, %v3981_v53  ;;  %v4046_v19 = vsub.f32 %v3539_v54, %v3982_v2  ;;  %v5429_v9 = vld [vmem:[%s7130_s24 + $0x78] sm:$0xff] }
 0x3e0   : > { %v4527_v5 = vmul.f32 %v9274_v28, %v9274_v28  ;;  %v9282_v0 = vadd.f32 %v6484_v27, %v9143_v23  ;;  %6133 = vmatmul.mubr.msk.f32.gmra.mxu0 %vm880_vm0, %v9221_v18  ;;  %v4578_v48 = vsel %vm880_vm0, %v4528_v3, 0.0  ;;  %v9290_v38 = vadd.f32 %v3085_v49, %v3084_v35  ;;  %v3542_v26 = vpop.xlane.xlu0 %3541 }
 0x3e1   : > { %v3883_v36 = vpop.f32.mrf.mxu1  ;;  %v4379_v29 = vpop.f32.mrf.mxu0  ;;  %4851 = vmatprep.mubr.f32.mxu0 %v10073_v37  ;;  %v4047_v17 = vsub.f32 %v3539_v54, %v3983_v63  ;;  %v3985_v27 = vmul.f32 2.0, %v9241_v43  ;;  %v3986_v10 = vmul.f32 2.0, %v3875_v21  ;;  %v4089_v2 = vmin.f32 %v9245_v58, %v4044_v1 }
 0x3e2   : > { %v4530_v18 = vmul.f32 %v9282_v0, %v9282_v0  ;;  %v9296_v12 = vadd.f32 %v9143_v23, %v4379_v29  ;;  %v4575_v30 = vsel %vm880_vm0, %v4527_v5, 0.0  ;;  %v4048_v49 = vsub.f32 %v3542_v26, %v3984_v40 }
 0x3e3   : > { %v3887_v53 = vpop.f32.mrf.mxu1  ;;  %v6487_v3 = vpop.f32.mrf.mxu0  ;;  %4576 = vadd.xlane.f32.xlu1 %v4575_v30  ;;  %v3987_v35 = vmul.f32 2.0, %v3877_v8  ;;  %4579 = vadd.xlane.f32.xlu0 %v4578_v48  ;;  %v9310_v43 = vmul.f32 %v9170_v50, %v5428_v7  ;;  %v4126_v58 = vmin.f32 %v4124_v4, %v4045_v16  ;;  %v4090_v40 = vmin.f32 %v4088_v56, %v4046_v19  ;;  %v10076_v19 = vld [vmem:[#allocation38_spill] sm:$0xff] }
 0x3e4   : > { %v4529_v13 = vmul.f32 %v9296_v12, %v9296_v12  ;;  %v9305_v29 = vadd.f32 %v6487_v3, %v9143_v23  ;;  %6134 = vmatmul.mubr.msk.f32.gmra.mxu0 %vm880_vm0, %v9211_v15  ;;  %v4584_v8 = vsel %vm880_vm0, %v4530_v18, 0.0  ;;  %v9315_v1 = vmul.f32 %v9179_v34, %v5429_v9  ;;  %v3545_v48 = vpop.xlane.xlu1 %3544 }
 0x3e5   : > { %v3889_v21 = vpop.f32.mrf.mxu1  ;;  %v4389_v63 = vpop.f32.mrf.mxu0  ;;  %4857 = vmatprep.mubr.f32.mxu0 %v10073_v37  ;;  %v4127_v54 = vmin.f32 %v4125_v41, %v4047_v17  ;;  %v3988_v7 = vmul.f32 2.0, %v3881_v24  ;;  %v4049_v4 = vsub.f32 %v3542_v26, %v3985_v27  ;;  %v4091_v56 = vmin.f32 %v4089_v2, %v4048_v49  ;;  %v10077_v27 = vld [vmem:[#allocation49_spill] sm:$0xff] }
 0x3e6   : > { %v4532_v5 = vmul.f32 %v9305_v29, %v9305_v29  ;;  %v9320_v15 = vadd.f32 %v9143_v23, %v4389_v63  ;;  %v4581_v50 = vsel %vm880_vm0, %v4529_v13, 0.0  ;;  %v4050_v16 = vsub.f32 %v3545_v48, %v3986_v10  ;;  %v10078_v10 = vld [vmem:[#allocation50_spill] sm:$0xff] }
 0x3e7   : > { %v3893_v30 = vpop.f32.mrf.mxu1  ;;  %v6490_v3 = vpop.f32.mrf.mxu0  ;;  %4582 = vadd.xlane.f32.xlu1 %v4581_v50  ;;  %4585 = vadd.xlane.f32.xlu0 %v4584_v8  ;;  %v4051_v13 = vsub.f32 %v3545_v48, %v3987_v35  ;;  %v3989_v24 = vmul.f32 2.0, %v3883_v36  ;;  %v5534_v2 = vadd.f32 %v10078_v10, %v10077_v27  ;;  %v3990_v49 = vmul.f32 2.0, %v3887_v53  ;;  %v10079_v27 = vld [vmem:[#allocation51_spill] sm:$0xff] }
 0x3e8   : > { %v4531_v18 = vmul.f32 %v9320_v15, %v9320_v15  ;;  %v9327_v9 = vadd.f32 %v6490_v3, %v9143_v23  ;;  %6135 = vmatmul.mubr.msk.f32.gmra.mxu0 %vm880_vm0, %v9251_v47  ;;  %v4590_v26 = vsel %vm880_vm0, %v4532_v5, 0.0  ;;  %v3548_v35 = vpop.xlane.xlu0 %3547  ;;  %v6842_v36 = vmov 0  }
 0x3e9   : > { %v3895_v41 = vpop.f32.mrf.mxu1  ;;  %v4399_v17 = vpop.f32.mrf.mxu0  ;;  %4863 = vmatprep.mubr.f32.mxu0 %v10073_v37  ;;  %6629 = vset.pattern.permute.xlu0 %v6842_v36  ;;  %v4128_v5 = vmin.f32 %v4126_v58, %v4049_v4  ;;  %v4092_v3 = vmin.f32 %v4090_v40, %v4050_v16  ;;  %v4052_v34 = vsub.f32 %v3548_v35, %v3988_v7  ;;  %v3991_v10 = vmul.f32 2.0, %v3889_v21  ;;  %v10080_v7 = vld [vmem:[#allocation52_spill] sm:$0xff] }
 0x3ea   : > { %v4534_v63 = vmul.f32 %v9327_v9, %v9327_v9  ;;  %v9338_v50 = vadd.f32 %v9143_v23, %v4399_v17  ;;  %v4587_v47 = vsel %vm880_vm0, %v4531_v18, 0.0  ;;  %6628 = vset.pattern.permute.xlu1 %v6842_v36  ;;  %v5535_v53 = vadd.f32 %v5534_v2, %v10079_v27  ;;  %v3551_v36 = vpop.xlane.xlu1 %3550 }
 0x3eb   : > { %v3899_v8 = vpop.f32.mrf.mxu1  ;;  %v6493_v48 = vpop.f32.mrf.mxu0  ;;  %4588 = vadd.xlane.f32.xlu1 %v4587_v47  ;;  %v4129_v18 = vmin.f32 %v4127_v54, %v4051_v13  ;;  %4591 = vadd.xlane.f32.xlu0 %v4590_v26  ;;  %v3992_v14 = vmul.f32 2.0, %v3893_v30  ;;  %v4053_v40 = vsub.f32 %v3548_v35, %v3989_v24  ;;  %v4054_v54 = vsub.f32 %v3551_v36, %v3990_v49 }
 0x3ec   : > { %v4533_v25 = vmul.f32 %v9338_v50, %v9338_v50  ;;  %v9345_v17 = vadd.f32 %v6493_v48, %v9143_v23  ;;  %6136 = vmatmul.mubr.msk.f32.gmra.mxu0 %vm880_vm0, %v9234_v20  ;;  %v4596_v21 = vsel %vm880_vm0, %v4534_v63, 0.0  ;;  %v5536_v4 = vadd.f32 %v5535_v53, %v10080_v7  ;;  %v10082_v7 = vld [vmem:[#allocation54_spill] sm:$0xff] }
 0x3ed   : > { %v3901_v47 = vpop.f32.mrf.mxu1  ;;  %v4409_v58 = vpop.f32.mrf.mxu0  ;;  %4869 = vmatprep.mubr.f32.mxu0 %v10073_v37  ;;  %v3993_v13 = vmul.f32 2.0, %v3895_v41  ;;  %v3994_v30 = vmul.f32 2.0, %v3899_v8  ;;  %v4093_v27 = vmin.f32 %v4091_v56, %v4052_v34  ;;  %v4055_v53 = vsub.f32 %v3551_v36, %v3991_v10 }
 0x3ee   : > { %v4536_v16 = vmul.f32 %v9345_v17, %v9345_v17  ;;  %v9355_v2 = vadd.f32 %v9143_v23, %v4409_v58  ;;  %v4593_v20 = vsel %vm880_vm0, %v4533_v25, 0.0  ;;  %v5537_v24 = vadd.f32 %v5536_v4, %v8869_v11  ;;  %v3554_v25 = vpop.xlane.xlu0 %3553  ;;  %v3557_v36 = vpop.xlane.xlu1 %3556 }
 0x3ef   : > { %v3905_v26 = vpop.f32.mrf.mxu1  ;;  %v6496_v48 = vpop.f32.mrf.mxu0  ;;  %4594 = vadd.xlane.f32.xlu1 %v4593_v20  ;;  %4597 = vadd.xlane.f32.xlu0 %v4596_v21  ;;  %v10081_v41 = vsub.f32 %v9100_v32, %v9076_v6  ;;  %v4130_v11 = vmin.f32 %v4128_v5, %v4053_v40  ;;  %v4056_v8 = vsub.f32 %v3554_v25, %v3992_v14  ;;  %v3995_v21 = vmul.f32 2.0, %v3901_v47 }
 0x3f0   : > { %v4535_v63 = vmul.f32 %v9355_v2, %v9355_v2  ;;  %v9362_v35 = vadd.f32 %v6496_v48, %v9143_v23  ;;  %6137 = vmatmul.mubr.msk.f32.gmra.mxu0 %vm880_vm0, %v9274_v28  ;;  %v4602_v58 = vsel %vm880_vm0, %v4536_v16, 0.0  ;;  %v5538_v4 = vadd.f32 %v5537_v24, %v10082_v7 }
 0x3f1   : > { %v9369_v49 = vand.u32 2147483647, %v10081_v41  ;;  %v3907_v56 = vpop.f32.mrf.mxu1  ;;  %v4419_v34 = vpop.f32.mrf.mxu0  ;;  %4875 = vmatprep.mubr.f32.mxu0 %v10073_v37  ;;  %v4094_v32 = vmin.f32 %v4092_v3, %v4054_v54  ;;  %v4057_v5 = vsub.f32 %v3554_v25, %v3993_v13  ;;  %v4058_v14 = vsub.f32 %v3557_v36, %v3994_v30 }
 0x3f2   : > { %v4538_v28 = vmul.f32 %v9362_v35, %v9362_v35  ;;  %v9377_v10 = vadd.f32 %v9143_v23, %v4419_v34  ;;  %v4599_v6 = vsel %vm880_vm0, %v4535_v63, 0.0  ;;  %v5539_v40 = vadd.f32 %v5538_v4, %v8912_v51 }
 0x3f3   : > { %v3911_v20 = vpop.f32.mrf.mxu1  ;;  %v6499_v48 = vpop.f32.mrf.mxu0  ;;  %4600 = vadd.xlane.f32.xlu1 %v4599_v6  ;;  %v3996_v16 = vmul.f32 2.0, %v3905_v26  ;;  %v4131_v3 = vmin.f32 %v4129_v18, %v4055_v53  ;;  %4603 = vadd.xlane.f32.xlu0 %v4602_v58  ;;  %v3997_v47 = vmul.f32 2.0, %v3907_v56  ;;  %v4095_v13 = vmin.f32 %v4093_v27, %v4056_v8 }
 0x3f4   : > { %v4537_v24 = vmul.f32 %v9377_v10, %v9377_v10  ;;  %v9384_v41 = vadd.f32 %v6499_v48, %v9143_v23  ;;  %6138 = vmatmul.mubr.msk.f32.gmra.mxu0 %vm880_vm0, %v9262_v62  ;;  %v4608_v51 = vsel %vm880_vm0, %v4538_v28, 0.0  ;;  %v5540_v30 = vadd.f32 %v5539_v40, %v9024_v22  ;;  %v3560_v18 = vpop.xlane.xlu0 %3559  ;;  %v3563_v6 = vpop.xlane.xlu1 %3562  ;;  %v5430_v48 = vld [vmem:[%s7130_s24 + $0x80] sm:$0xff] }
 0x3f5   : > { %v3913_v54 = vpop.f32.mrf.mxu1  ;;  %v4429_v63 = vpop.f32.mrf.mxu0  ;;  %4881 = vmatprep.mubr.f32.mxu0 %v10073_v37  ;;  %v3998_v26 = vmul.f32 2.0, %v3911_v20  ;;  %v4132_v58 = vmin.f32 %v4130_v11, %v4057_v5  ;;  %v4059_v27 = vsub.f32 %v3557_v36, %v3995_v21  ;;  %v4096_v8 = vmin.f32 %v4094_v32, %v4058_v14 }
 0x3f6   : > { %v4540_v25 = vmul.f32 %v9384_v41, %v9384_v41  ;;  %v9394_v34 = vadd.f32 %v9143_v23, %v4429_v63  ;;  %v4605_v62 = vsel %vm880_vm0, %v4537_v24, 0.0  ;;  %v5541_v7 = vadd.f32 %v5540_v30, %v9058_v39 }
 0x3f7   : > { %v3917_v53 = vpop.f32.mrf.mxu1  ;;  %v6502_v56 = vpop.f32.mrf.mxu0  ;;  %4606 = vadd.xlane.f32.xlu1 %v4605_v62  ;;  %v4060_v28 = vsub.f32 %v3560_v18, %v3996_v16  ;;  %4609 = vadd.xlane.f32.xlu0 %v4608_v51  ;;  %v5293_v20 = vand.u32 2147483647, %v9061_v31  ;;  %v3999_v11 = vmul.f32 2.0, %v3913_v54  ;;  %v4061_v39 = vsub.f32 %v3560_v18, %v3997_v47  ;;  %v10105_v31 = vld [vmem:[#allocation53_spill] sm:$0xff] }
 0x3f8   : > { %v4539_v22 = vmul.f32 %v9394_v34, %v9394_v34  ;;  %v9401_v4 = vadd.f32 %v6502_v56, %v9143_v23  ;;  %6139 = vmatmul.mubr.msk.f32.gmra.mxu0 %vm880_vm0, %v9296_v12  ;;  %v4614_v21 = vsel %vm880_vm0, %v4540_v25, 0.0  ;;  %v5542_v5 = vadd.f32 %v5541_v7, %v9205_v46  ;;  %v3566_v18 = vpop.xlane.xlu0 %3565 }
 0x3f9   : > { %v3919_v36 = vpop.f32.mrf.mxu1  ;;  %v4439_v32 = vpop.f32.mrf.mxu0  ;;  %4887 = vmatprep.mubr.f32.mxu0 %v10073_v37  ;;  %v4062_v16 = vsub.f32 %v3563_v6, %v3998_v26  ;;  %v4000_v24 = vmul.f32 2.0, %v3917_v53  ;;  %v4133_v51 = vmin.f32 %v4131_v3, %v4059_v27  ;;  %v9417_v47 = vmul.f32 %v9369_v49, %v5430_v48 }
 0x3fa   : > { %v4542_v14 = vmul.f32 %v9401_v4, %v9401_v4  ;;  %v9413_v12 = vadd.f32 %v9143_v23, %v4439_v32  ;;  %v4611_v40 = vsel %vm880_vm0, %v4539_v22, 0.0  ;;  %v5543_v30 = vadd.f32 %v5542_v5, %v9218_v45 }
 0x3fb   : > { %v3923_v54 = vpop.f32.mrf.mxu1  ;;  %v6505_v63 = vpop.f32.mrf.mxu0  ;;  %4612 = vadd.xlane.f32.xlu1 %v4611_v40  ;;  %v4001_v46 = vmul.f32 2.0, %v3919_v36  ;;  %v4097_v26 = vmin.f32 %v4095_v13, %v4060_v28  ;;  %4615 = vadd.xlane.f32.xlu0 %v4614_v21  ;;  %v4134_v49 = vmin.f32 %v4132_v58, %v4061_v39  ;;  %v4063_v56 = vsub.f32 %v3563_v6, %v3999_v11 }
 0x3fc   : > { %v4541_v25 = vmul.f32 %v9413_v12, %v9413_v12  ;;  %v9423_v62 = vadd.f32 %v6505_v63, %v9143_v23  ;;  %6140 = vmatmul.mubr.msk.f32.gmra.mxu0 %vm880_vm0, %v9282_v0  ;;  %v4620_v45 = vsel %vm880_vm0, %v4542_v14, 0.0  ;;  %v5544_v27 = vadd.f32 %v5543_v30, %v9227_v60  ;;  %v3569_v28 = vpop.xlane.xlu1 %3568 }
 0x3fd   : > { %v3925_v53 = vpop.f32.mrf.mxu1  ;;  %v4449_v3 = vpop.f32.mrf.mxu0  ;;  %4893 = vmatprep.mubr.f32.mxu0 %v10073_v37  ;;  %v4098_v13 = vmin.f32 %v4096_v8, %v4062_v16  ;;  %v4002_v48 = vmul.f32 2.0, %v3923_v54  ;;  %v4064_v58 = vsub.f32 %v3566_v18, %v4000_v24  ;;  %v4065_v39 = vsub.f32 %v3566_v18, %v4001_v46 }
 0x3fe   : > { %v4544_v7 = vmul.f32 %v9423_v62, %v9423_v62  ;;  %v9433_v22 = vadd.f32 %v9143_v23, %v4449_v3  ;;  %v4617_v0 = vsel %vm880_vm0, %v4541_v25, 0.0  ;;  %v4003_v36 = vmul.f32 2.0, %v3925_v53 }
 0x3ff   : > { %v3929_v32 = vpop.f32.mrf.mxu1  ;;  %v6508_v21 = vpop.f32.mrf.mxu0  ;;  %4618 = vadd.xlane.f32.xlu1 %v4617_v0  ;;  %v5545_v6 = vadd.f32 %v5544_v27, %v9239_v44  ;;  %4621 = vadd.xlane.f32.xlu0 %v4620_v45  ;;  %v10083_v8 = vsub.f32 %v9103_v52, %v9079_v61  ;;  %v4135_v24 = vmin.f32 %v4133_v51, %v4063_v56 }
 0x400   : > { %v4543_v60 = vmul.f32 %v9433_v22, %v9433_v22  ;;  %v9440_v11 = vadd.f32 %v6508_v21, %v9143_v23  ;;  %6141 = vmatmul.mubr.msk.f32.gmra.mxu0 %vm880_vm0, %v9320_v15  ;;  %v4004_v14 = vmul.f32 2.0, %v3929_v32  ;;  %v4626_v44 = vsel %vm880_vm0, %v4544_v7, 0.0  ;;  %v3572_v52 = vpop.xlane.xlu0 %3571  ;;  %v3575_v7 = vpop.xlane.xlu1 %3574 }
 0x401   : > { %v5503_v5 = vand.u32 2147483647, %v10083_v8  ;;  %v3931_v40 = vpop.f32.mrf.mxu1  ;;  %v4459_v16 = vpop.f32.mrf.mxu0  ;;  %4899 = vmatprep.mubr.f32.mxu0 %v10073_v37  ;;  %v5546_v54 = vadd.f32 %v5545_v6, %v9255_v55  ;;  %v4099_v51 = vmin.f32 %v4097_v26, %v4064_v58  ;;  %v4066_v18 = vsub.f32 %v3569_v28, %v4002_v48  ;;  %v5431_v58 = vld [vmem:[%s7130_s24 + $0x88] sm:$0xff] }
 0x402   : > { %v4546_v63 = vmul.f32 %v9440_v11, %v9440_v11  ;;  %v4005_v15 = vmul.f32 2.0, %v3931_v40  ;;  %v9453_v30 = vadd.f32 %v9143_v23, %v4459_v16  ;;  %v4623_v61 = vsel %vm880_vm0, %v4543_v60, 0.0 }
 0x403   : > { %v3935_v46 = vpop.f32.mrf.mxu1  ;;  %v6511_v25 = vpop.f32.mrf.mxu0  ;;  %4624 = vadd.xlane.f32.xlu1 %v4623_v61  ;;  %v4067_v53 = vsub.f32 %v3569_v28, %v4003_v36  ;;  %v5547_v3 = vadd.f32 %v5546_v54, %v9310_v43  ;;  %v4136_v27 = vmin.f32 %v4134_v49, %v4065_v39  ;;  %4627 = vadd.xlane.f32.xlu0 %v4626_v44 }
 0x404   : > { %v4545_v55 = vmul.f32 %v9453_v30, %v9453_v30  ;;  %v4006_v56 = vmul.f32 2.0, %v3935_v46  ;;  %v9460_v45 = vadd.f32 %v6511_v25, %v9143_v23  ;;  %6142 = vmatmul.mubr.msk.f32.gmra.mxu0 %vm880_vm0, %v9305_v29  ;;  %v4068_v28 = vsub.f32 %v3572_v52, %v4004_v14 }
 0x405   : > { %v3937_v0 = vpop.f32.mrf.mxu1  ;;  %v4469_v26 = vpop.f32.mrf.mxu0  ;;  %4905 = vmatprep.mubr.f32.mxu0 %v10073_v37  ;;  %v4069_v43 = vsub.f32 %v3572_v52, %v4005_v15  ;;  %v4632_v48 = vsel %vm880_vm0, %v4546_v63, 0.0  ;;  %v5548_v36 = vadd.f32 %v5547_v3, %v9315_v1  ;;  %v4100_v60 = vmin.f32 %v4098_v13, %v4066_v18  ;;  %v5386_v63 = vld [vmem:[%s7136_s4 + $0xa0] sm:$0xff] }
 0x406   : > { %v4548_v32 = vmul.f32 %v9460_v45, %v9460_v45  ;;  %v4007_v21 = vmul.f32 2.0, %v3937_v0  ;;  %v9470_v49 = vadd.f32 %v9143_v23, %v4469_v26  ;;  %v4629_v29 = vsel %vm880_vm0, %v4545_v55, 0.0  ;;  %v5387_v26 = vld [vmem:[%s7136_s4 + $0xa8] sm:$0xff] }
 0x407   : > { %v3941_v6 = vpop.f32.mrf.mxu1  ;;  %v4137_v39 = vmin.f32 %v4135_v24, %v4067_v53  ;;  %v6514_v8 = vpop.f32.mrf.mxu0  ;;  %4630 = vadd.xlane.f32.xlu1 %v4629_v29  ;;  %v4070_v14 = vsub.f32 %v3575_v7, %v4006_v56  ;;  %v10084_v1 = vsub.f32 %v9114_v59, %v9088_v33  ;;  %4633 = vadd.xlane.f32.xlu0 %v4632_v48 }
 0x408   : > { %v4547_v16 = vmul.f32 %v9470_v49, %v9470_v49  ;;  %v4008_v44 = vmul.f32 2.0, %v3941_v6  ;;  %v9480_v54 = vadd.f32 %v6514_v8, %v9143_v23  ;;  %6143 = vmatmul.mubr.msk.f32.gmra.mxu0 %vm880_vm0, %v9338_v50  ;;  %v4071_v13 = vsub.f32 %v3575_v7, %v4007_v21  ;;  %v3578_v24 = vpop.xlane.xlu0 %3577  ;;  %v10087_v21 = vld [vmem:[#allocation37_spill] sm:$0xff] }
 0x409   : > { %v5504_v40 = vand.u32 2147483647, %v10084_v1  ;;  %v4101_v15 = vmin.f32 %v4099_v51, %v4068_v28  ;;  %v4138_v61 = vmin.f32 %v4136_v27, %v4069_v43  ;;  %v3943_v52 = vpop.f32.mrf.mxu1  ;;  %v4479_v33 = vpop.f32.mrf.mxu0  ;;  %4911 = vmatprep.mubr.f32.mxu0 %v10073_v37  ;;  %v5527_v59 = vmul.f32 %v5503_v5, %v5431_v58  ;;  %v5432_v51 = vld [vmem:[%s7130_s24 + $0x90] sm:$0xff]  ;;  %v10085_v27 = vld [vmem:[#allocation39_spill] sm:$0xff] }
 0x40a   : > { %v5549_v46 = vadd.f32 %v5548_v36, %v9417_v47  ;;  %v4550_v25 = vmul.f32 %v9480_v54, %v9480_v54  ;;  %v4009_v18 = vmul.f32 2.0, %v3943_v52  ;;  %v9490_v50 = vadd.f32 %v9143_v23, %v4479_v33  ;;  %v5412_v28 = vld [vmem:[%s7138_s23 + $0xb0] sm:$0xff] }
 0x40b   : > { %v4638_v53 = vsel %vm880_vm0, %v4548_v32, 0.0  ;;  %v4102_v3 = vmin.f32 %v4100_v60, %v4070_v14  ;;  %v4635_v55 = vsel %vm880_vm0, %v4547_v16, 0.0  ;;  %v4072_v56 = vsub.f32 %v3578_v24, %v4008_v44  ;;  %v5433_v60 = vld [vmem:[%s7130_s24 + $0x98] sm:$0xff]  ;;  %v10091_v44 = vld [vmem:[#allocation42_spill] sm:$0xff] }
 0x40c   : > { %v5482_v5 = vsub.f32 %v5386_v63, %v10085_v27  ;;  %v4549_v47 = vmul.f32 %v9490_v50, %v9490_v50  ;;  %v4139_v7 = vmin.f32 %v4137_v39, %v4071_v13  ;;  %4636 = vadd.xlane.f32.xlu1 %v4635_v55  ;;  %v4073_v0 = vsub.f32 %v3578_v24, %v4009_v18  ;;  %v5413_v63 = vld [vmem:[%s7138_s23 + $0xb8] sm:$0xff]  ;;  %v10092_v18 = vld [vmem:[#allocation48_spill] sm:$0xff]  ;;  %s10093_s23 = sld [smem:[#allocation69_spill]] }
 0x40d   : > { %6144 = vmatmul.mubr.msk.f32.gmra.mxu0 %vm880_vm0, %v9327_v9  ;;  %v4103_v23 = vmin.f32 %v4101_v15, %v4072_v56  ;;  %4639 = vadd.xlane.f32.xlu0 %v4638_v53  ;;  %v10086_v43 = vsub.f32 %v9137_v57, %v9094_v42  ;;  %v5528_v36 = vmul.f32 %v5504_v40, %v5432_v51  ;;  %v3589_v29 = vrot.slane %v10087_v21, 2  ;;  %v10089_v57 = vld [vmem:[#allocation46_spill] sm:$0xff]  ;;  %v10090_v40 = vld [vmem:[#allocation47_spill] sm:$0xff] }
 0x40e   : > { %4917 = vmatprep.mubr.f32.mxu0 %v10073_v37  ;;  %v5550_v32 = vadd.f32 %v5549_v46, %v5527_v59  ;;  %v4140_v58 = vmin.f32 %v4138_v61, %v4073_v0  ;;  %v4641_v6 = vsel %vm880_vm0, %v4549_v47, 0.0  ;;  %v4644_v9 = vsel %vm880_vm0, %v4550_v25, 0.0  ;;  %v5434_v59 = vld [vmem:[%s7130_s24 + $0xa0] sm:$0xff]  ;;  %v5389_v55 = vld [vmem:[%s7136_s4 + $0xb8] sm:$0xff]  ;;  %v5435_v0 = vld [vmem:[%s7130_s24 + $0xa8] sm:$0xff] }
 0x40f   : > { %v5505_v48 = vand.u32 2147483647, %v10086_v43  ;;  %v10088_v39 = vrot.slane %v10076_v19, 2  ;;  %v4104_v14 = vmin.f32 %v4102_v3, %v4103_v23  ;;  %v5300_v42 = vadd.f32 %v10089_v57, %v5293_v20 }
 0x410   : > { %v4141_v1 = vmin.f32 %v4139_v7, %v4140_v58  ;;  %4642 = vadd.xlane.f32.xlu1 %v4641_v6  ;;  %v5460_v16 = vmul.f32 %v10090_v40, %v5412_v28  ;;  %v5483_v13 = vsub.f32 %v5387_v26, %v10091_v44  ;;  %v5506_v15 = vand.u32 2147483647, %v5482_v5 }
 0x411   : > { %v3584_v8 = vadd.f32 %v10088_v39, %v10076_v19  ;;  %6145 = vmatmul.mubr.msk.f32.gmra.mxu0 %vm880_vm0, %v9355_v2  ;;  %v4105_v24 = vrot.slane %v4104_v14, 4  ;;  %4645 = vadd.xlane.f32.xlu0 %v4644_v9  ;;  %v5388_v19 = vld [vmem:[%s7136_s4 + $0xb0] sm:$0xff]  ;;  %v5529_v61 = vmul.f32 %v5505_v48, %v5433_v60  ;;  %v5551_v20 = vadd.f32 %v5550_v32, %v5528_v36 }
 0x412   : > { %4923 = vmatprep.mubr.f32.mxu0 %v10073_v37  ;;  %v3590_v52 = vadd.f32 %v3589_v29, %v10087_v21  ;;  %v4142_v33 = vrot.slane %v4141_v1, 4  ;;  %v5461_v53 = vmul.f32 %v10092_v18, %v5413_v63  ;;  %v5484_v51 = vsub.f32 %v5388_v19, %v5460_v16  ;;  %v5436_v29 = vld [vmem:[%s7130_s24 + $0xb0] sm:$0xff]  ;;  %s9567_s16 = scalar_lea.vmem %s10093_s23, %s7392_s30 }
 0x413   : > { %v4106_v46 = vmin.f32 %v4104_v14, %v4105_v24  ;;  %v3585_v2 = vrot.slane %v3584_v8, 1  ;;  %v5507_v56 = vand.u32 2147483647, %v5483_v13  ;;  %v5530_v27 = vmul.f32 %v5506_v15, %v5434_v59  ;;  %v5437_v14 = vld [vmem:[%s7130_s24 + $0xb8] sm:$0xff] }
 0x414   : > { %v4143_v25 = vmin.f32 %v4141_v1, %v4142_v33  ;;  %3087 = vadd.xlane.f32.xlu1 %v9290_v38  ;;  %v5552_v5 = vadd.f32 %v5551_v20, %v5529_v61  ;;  %v3591_v47 = vrot.slane %v3590_v52, 1  ;;  %v5485_v26 = vsub.f32 %v5389_v55, %v5461_v53 }
 0x415   : > { %6146 = vmatmul.mubr.msk.f32.gmra.mxu0 %vm880_vm0, %v9345_v17  ;;  %v4107_v3 = vrot.slane %v4106_v46, 2  ;;  %5301 = vadd.xlane.f32.xlu0 %v5300_v42  ;;  %v3586_v17 = vadd.f32 %v3585_v2, %v3584_v8  ;;  %v5508_v43 = vand.u32 2147483647, %v5484_v51  ;;  %v5531_v48 = vmul.f32 %v5507_v56, %v5435_v0 }
 0x416   : > { %4929 = vmatprep.mubr.f32.mxu0 %v10073_v37  ;;  %v4144_v7 = vrot.slane %v4143_v25, 2  ;;  %v5553_v36 = vadd.f32 %v5552_v5, %v5530_v27  ;;  %v3592_v32 = vadd.f32 %v3591_v47, %v3590_v52  ;;  %v5509_v9 = vand.u32 2147483647, %v5485_v26 }
 0x417   : > { %v4108_v23 = vmin.f32 %v4106_v46, %v4107_v3  ;;  %v5532_v60 = vmul.f32 %v5508_v43, %v5436_v29 }
 0x418   : > { %v4145_v38 = vmin.f32 %v4143_v25, %v4144_v7  ;;  %v5554_v39 = vadd.f32 %v5553_v36, %v5531_v48  ;;  %v5533_v40 = vmul.f32 %v5509_v9, %v5437_v14 }
 0x419   : > { %6147 = vmatmul.mubr.msk.f32.gmra.mxu0 %vm880_vm0, %v9377_v10  ;;  %v4109_v28 = vrot.slane %v4108_v23, 1 }
 0x41a   : > { %4935 = vmatprep.mubr.f32.mxu0 %v10073_v37  ;;  %v4146_v21 = vrot.slane %v4145_v38, 1 }
 0x41b   : > { %v4110_v58 = vmin.f32 %v4108_v23, %v4109_v28 }
 0x41c   : > { %v4147_v6 = vmin.f32 %v4145_v38, %v4146_v21 }
 0x41d   : > { %6148 = vmatmul.mubr.msk.f32.gmra.mxu0 %vm880_vm0, %v9362_v35  ;;  %v4148_v10 = vadd.f32 %v4110_v58, %v3586_v17  ;;  %v5555_v35 = vadd.f32 %v5554_v39, %v5532_v60 }
 0x41e   : > { %4941 = vmatprep.mubr.f32.mxu0 %v10073_v37  ;;  %v4149_v8 = vadd.f32 %v4147_v6, %v3592_v32 }
 0x41f   : > { %v4150_v57 = vmax.f32 %v4148_v10, 0.0  ;;  %v5556_v13 = vadd.f32 %v5555_v35, %v5533_v40 }
 0x420   : > { %v4151_v42 = vmax.f32 %v4149_v8, 0.0 }
 0x421   : > { %6149 = vmatmul.mubr.msk.f32.gmra.mxu0 %vm880_vm0, %v9394_v34  ;;  %v4152_v1 = vsel %vm1302_vm1, %v4150_v57, 0.0  ;;  %v6089_v34 = vld [vmem:[%s9567_s16 + $0x18] sm:$0xff] }
 0x422   : > { %4947 = vmatprep.mubr.f32.mxu0 %v10073_v37  ;;  %v4153_v16 = vsel %vm1302_vm1, %v4151_v42, 0.0 }
 0x423   : > { %v4154_v44 = vadd.f32 %v4153_v16, %v4152_v1 }
 0x425   : > { %6150 = vmatmul.mubr.msk.f32.gmra.mxu0 %vm880_vm0, %v9384_v41  ;;  %4155 = vadd.xlane.f32.xlu0 %v4154_v44  ;;  %v874_v41 = vld [vmem:[%s9567_s16] sm:$0xff] }
 0x426   : > { %4953 = vmatprep.mubr.f32.mxu0 %v10073_v37 }
 0x429   : > { %6151 = vmatmul.mubr.msk.f32.gmra.mxu0 %vm880_vm0, %v9413_v12  ;;  %5557 = vadd.xlane.f32.xlu0 %v5556_v13 }
 0x42a   : > { %4959 = vmatprep.mubr.f32.mxu0 %v10073_v37 }
 0x42d   : > { %6152 = vmatmul.mubr.msk.f32.gmra.mxu0 %vm880_vm0, %v9401_v4 }
 0x42e   : > { %4965 = vmatprep.mubr.f32.mxu0 %v10073_v37 }
 0x431   : > { %6153 = vmatmul.mubr.msk.f32.gmra.mxu0 %vm880_vm0, %v9433_v22 }
 0x432   : > { %4971 = vmatprep.mubr.f32.mxu0 %v10073_v37 }
 0x435   : > { %6154 = vmatmul.mubr.msk.f32.gmra.mxu0 %vm880_vm0, %v9423_v62 }
 0x436   : > { %4977 = vmatprep.mubr.f32.mxu0 %v10073_v37 }
 0x439   : > { %6155 = vmatmul.mubr.msk.f32.gmra.mxu0 %vm880_vm0, %v9453_v30 }
 0x43a   : > { %4983 = vmatprep.mubr.f32.mxu0 %v10073_v37 }
 0x43d   : > { %6156 = vmatmul.mubr.msk.f32.gmra.mxu0 %vm880_vm0, %v9440_v11 }
 0x43e   : > { %4989 = vmatprep.mubr.f32.mxu0 %v10073_v37 }
 0x43f   : > { %877 = vperm.xlu0 %6629, %v874_v41  }
 0x441   : > { %6157 = vmatmul.mubr.msk.f32.gmra.mxu0 %vm880_vm0, %v9470_v49 }
 0x442   : > { %4995 = vmatprep.mubr.f32.mxu0 %v10073_v37 }
 0x443   : > { %4176 = vperm.xlu0 %6629, %v6089_v34  }
 0x445   : > { %6158 = vmatmul.mubr.msk.f32.gmra.mxu0 %vm880_vm0, %v9460_v45 }
 0x446   : > { %5001 = vmatprep.mubr.f32.mxu0 %v10073_v37 }
 0x449   : > { %6159 = vmatmul.mubr.msk.f32.gmra.mxu0 %vm880_vm0, %v9490_v50 }
 0x44a   : > { %5007 = vmatprep.mubr.f32.mxu0 %v10073_v37 }
 0x44d   : > { %6160 = vmatmul.mubr.msk.f32.gmra.mxu0 %vm880_vm0, %v9480_v54 }
 0x45b   : > { %v9585_v4 = vpop.xlane.xlu1 %4555 }
 0x45c   : > { %v4553_v12 = vpop.xlane.xlu0 %4552 }
 0x45f   : > { %v9587_v62 = vpop.xlane.xlu1 %4561 }
 0x460   : > { %v4559_v22 = vpop.xlane.xlu0 %4558 }
 0x463   : > { %v9589_v11 = vpop.xlane.xlu1 %4567 }
 0x464   : > { %v9591_v30 = vpop.xlane.xlu0 %4564 }
 0x467   : > { %v9593_v45 = vpop.xlane.xlu1 %4573 }
 0x468   : > { %v9595_v49 = vpop.xlane.xlu0 %4570 }
 0x46c   : > { %v9597_v50 = vpop.xlane.xlu1 %4576  ;;  %v9599_v37 = vpop.xlane.xlu0 %4579 }
 0x470   : > { %v9601_v24 = vpop.xlane.xlu1 %4582  ;;  %v9603_v54 = vpop.xlane.xlu0 %4585 }
 0x474   : > { %v9605_v19 = vpop.xlane.xlu1 %4588  ;;  %v9607_v63 = vpop.xlane.xlu0 %4591 }
 0x478   : > { %v9609_v15 = vpop.xlane.xlu1 %4594  ;;  %v9611_v61 = vpop.xlane.xlu0 %4597 }
 0x47c   : > { %v9613_v20 = vpop.xlane.xlu1 %4600  ;;  %v9615_v52 = vpop.xlane.xlu0 %4603 }
 0x480   : > { %v9617_v33 = vpop.xlane.xlu1 %4606  ;;  %v9619_v59 = vpop.xlane.xlu0 %4609 }
 0x484   : > { %v9621_v46 = vpop.xlane.xlu1 %4612  ;;  %v9623_v2 = vpop.xlane.xlu0 %4615 }
 0x488   : > { %v9625_v25 = vpop.xlane.xlu1 %4618  ;;  %v9627_v18 = vpop.xlane.xlu0 %4621 }
 0x48c   : > { %v9629_v53 = vpop.xlane.xlu1 %4624  ;;  %v9631_v51 = vpop.xlane.xlu0 %4627 }
 0x490   : > { %v9633_v3 = vpop.xlane.xlu1 %4630  ;;  %v4823_v55 = vpop.f32.mrf.mxu0 }
 0x491   : > { %10094 = vst [vmem:[#allocation43_spill] sm:$0xff] %v9633_v3  ;;  %v5014_v56 = vmul.f32 2.0, %v4823_v55  ;;  %v9637_v26 = vpop.xlane.xlu0 %4633 }
 0x492   : > { %v4825_v27 = vpop.f32.mrf.mxu0  ;;  %10096 = vst [vmem:[#allocation35_spill] sm:$0xff] %v9637_v26 }
 0x493   : > { %v5078_v5 = vsub.f32 %v4553_v12, %v5014_v56  ;;  %v5015_v47 = vmul.f32 2.0, %v4825_v27 }
 0x494   : > { %v4829_v7 = vpop.f32.mrf.mxu0 }
 0x495   : > { %v5079_v0 = vsub.f32 %v4553_v12, %v5015_v47  ;;  %v9635_v23 = vpop.xlane.xlu1 %4636  ;;  %v5016_v38 = vmul.f32 2.0, %v4829_v7 }
 0x496   : > { %10095 = vst [vmem:[#allocation41_spill] sm:$0xff] %v9635_v23  ;;  %v4831_v17 = vpop.f32.mrf.mxu0  ;;  %v9643_v9 = vpop.xlane.xlu0 %4639 }
 0x497   : > { %v5080_v28 = vsub.f32 %v9585_v4, %v5016_v38  ;;  %v5017_v43 = vmul.f32 2.0, %v4831_v17  ;;  %10098 = vst [vmem:[#allocation49_spill] sm:$0xff] %v9643_v9  ;;  %v10106_v9 = vld [vmem:[#allocation55_spill] sm:$0xff] }
 0x498   : > { %v4835_v48 = vpop.f32.mrf.mxu0 }
 0x499   : > { %v5081_v36 = vsub.f32 %v9585_v4, %v5017_v43  ;;  %v9641_v32 = vpop.xlane.xlu1 %4642  ;;  %v5018_v21 = vmul.f32 2.0, %v4835_v48 }
 0x49a   : > { %10097 = vst [vmem:[#allocation38_spill] sm:$0xff] %v9641_v32  ;;  %v4837_v29 = vpop.f32.mrf.mxu0  ;;  %v9647_v55 = vpop.xlane.xlu0 %4645  ;;  %v6688_v32 = vld [vmem:[%s7128_s21 + $0x8] sm:$0xff] }
 0x49b   : > { %v5082_v58 = vsub.f32 %v4559_v22, %v5018_v21  ;;  %v5019_v6 = vmul.f32 2.0, %v4837_v29  ;;  %10099 = vst [vmem:[#allocation50_spill] sm:$0xff] %v9647_v55  ;;  %v9741_v23 = vadd.f32 %v6688_v32, %v10106_v9 }
 0x49c   : > { %v4841_v10 = vpop.f32.mrf.mxu0 }
 0x49d   : > { %v5142_v60 = vmin.f32 %v5078_v5, %v5082_v58  ;;  %v5083_v39 = vsub.f32 %v4559_v22, %v5019_v6  ;;  %v5020_v8 = vmul.f32 2.0, %v4841_v10  ;;  %v3088_v14 = vpop.xlane.xlu1 %3087 }
 0x49e   : > { %v3089_v57 = vrot.slane %v3088_v14, 4  ;;  %v4843_v42 = vpop.f32.mrf.mxu0  ;;  %v9652_v58 = vpop.xlane.xlu0 %5301 }
 0x49f   : > { %v5179_v1 = vmin.f32 %v5079_v0, %v5083_v39  ;;  %v5084_v40 = vsub.f32 %v9587_v62, %v5020_v8  ;;  %v5021_v35 = vmul.f32 2.0, %v4843_v42  ;;  %10100 = vst [vmem:[#allocation51_spill] sm:$0xff] %v9652_v58 }
 0x4a0   : > { %v3090_v16 = vadd.f32 %v3089_v57, %v3088_v14  ;;  %v4847_v44 = vpop.f32.mrf.mxu0 }
 0x4a1   : > { %v5143_v13 = vmin.f32 %v5080_v28, %v5084_v40  ;;  %v5085_v41 = vsub.f32 %v9587_v62, %v5021_v35  ;;  %v5022_v34 = vmul.f32 2.0, %v4847_v44 }
 0x4a2   : > { %v3091_v4 = vrot.slane %v3090_v16, 2  ;;  %v4849_v12 = vpop.f32.mrf.mxu0 }
 0x4a3   : > { %v5180_v56 = vmin.f32 %v5081_v36, %v5085_v41  ;;  %v5086_v22 = vsub.f32 %v9591_v30, %v5022_v34  ;;  %v5023_v27 = vmul.f32 2.0, %v4849_v12 }
 0x4a4   : > { %v4853_v5 = vpop.f32.mrf.mxu0  ;;  %v3092_v47 = vadd.f32 %v3091_v4, %v3090_v16 }
 0x4a5   : > { %v5144_v7 = vmin.f32 %v5142_v60, %v5086_v22  ;;  %v5087_v0 = vsub.f32 %v9591_v30, %v5023_v27  ;;  %v5024_v38 = vmul.f32 2.0, %v4853_v5 }
 0x4a6   : > { %v4855_v17 = vpop.f32.mrf.mxu0  ;;  %v3093_v43 = vrot.slane %v3092_v47, 1 }
 0x4a7   : > { %v5181_v28 = vmin.f32 %v5179_v1, %v5087_v0  ;;  %v5088_v62 = vsub.f32 %v9589_v11, %v5024_v38  ;;  %v5025_v48 = vmul.f32 2.0, %v4855_v17 }
 0x4a8   : > { %v4859_v21 = vpop.f32.mrf.mxu0  ;;  %v3094_v29 = vadd.f32 %v3093_v43, %v3092_v47 }
 0x4a9   : > { %v5145_v36 = vmin.f32 %v5143_v13, %v5088_v62  ;;  %v5089_v6 = vsub.f32 %v9589_v11, %v5025_v48  ;;  %v5026_v10 = vmul.f32 2.0, %v4859_v21 }
 0x4aa   : > { %6523 = vpush %v3094_v29  ;;  %v4861_v39 = vpop.f32.mrf.mxu0 }
 0x4ab   : > { %v5182_v60 = vmin.f32 %v5180_v56, %v5089_v6  ;;  %v5090_v30 = vsub.f32 %v9595_v49, %v5026_v10  ;;  %v5027_v8 = vmul.f32 2.0, %v4861_v39 }
 0x4ac   : > { %v4865_v14 = vpop.f32.mrf.mxu0 }
 0x4ad   : > { %v5146_v57 = vmin.f32 %v5144_v7, %v5090_v30  ;;  %v5091_v42 = vsub.f32 %v9595_v49, %v5027_v8  ;;  %v5028_v1 = vmul.f32 2.0, %v4865_v14 }
 0x4ae   : > { %v4867_v40 = vpop.f32.mrf.mxu0  ;;  %v4156_v35 = vpop.xlane.xlu0 %4155 }
 0x4af   : > { %v5183_v16 = vmin.f32 %v5181_v28, %v5091_v42  ;;  %v5092_v44 = vsub.f32 %v9593_v45, %v5028_v1  ;;  %v5029_v13 = vmul.f32 2.0, %v4867_v40  ;;  %v4157_v41 = vrot.slane %v4156_v35, 4  ;;  %v10102_v42 = vld [vmem:[#allocation28_spill] sm:$0xff]  ;;  %v10103_v40 = vld [vmem:[#allocation29_spill] sm:$0xff] }
 0x4b0   : > { %v4871_v11 = vpop.f32.mrf.mxu0 }
 0x4b1   : > { %v5147_v34 = vmin.f32 %v5145_v36, %v5092_v44  ;;  %v5093_v4 = vsub.f32 %v9593_v45, %v5029_v13  ;;  %v5030_v12 = vmul.f32 2.0, %v4871_v11  ;;  %v4158_v56 = vadd.f32 %v4157_v41, %v4156_v35 }
 0x4b2   : > { %v4873_v22 = vpop.f32.mrf.mxu0  ;;  %v9660_v0 = vpop.xlane.xlu0 %5557 }
 0x4b3   : > { %v5184_v27 = vmin.f32 %v5182_v60, %v5093_v4  ;;  %v5094_v5 = vsub.f32 %v9597_v50, %v5030_v12  ;;  %v5031_v47 = vmul.f32 2.0, %v4873_v22  ;;  %v4159_v49 = vrot.slane %v4158_v56, 2  ;;  %10101 = vst [vmem:[#allocation52_spill] sm:$0xff] %v9660_v0 }
 0x4b4   : > { %v4877_v7 = vpop.f32.mrf.mxu0 }
 0x4b5   : > { %v5148_v38 = vmin.f32 %v5146_v57, %v5094_v5  ;;  %v5095_v17 = vsub.f32 %v9597_v50, %v5031_v47  ;;  %v5032_v43 = vmul.f32 2.0, %v4877_v7  ;;  %v4160_v28 = vadd.f32 %v4159_v49, %v4158_v56 }
 0x4b6   : > { %v4879_v62 = vpop.f32.mrf.mxu0 }
 0x4b7   : > { %v5185_v48 = vmin.f32 %v5183_v16, %v5095_v17  ;;  %v5096_v45 = vsub.f32 %v9599_v37, %v5032_v43  ;;  %v5033_v21 = vmul.f32 2.0, %v4879_v62  ;;  %v4161_v29 = vrot.slane %v4160_v28, 1 }
 0x4b8   : > { %v4883_v36 = vpop.f32.mrf.mxu0 }
 0x4b9   : > { %v9664_v6 = vmin.f32 %v5147_v34, %v5096_v45  ;;  %v5097_v10 = vsub.f32 %v9599_v37, %v5033_v21  ;;  %v5034_v39 = vmul.f32 2.0, %v4883_v36  ;;  %v4162_v60 = vadd.f32 %v4161_v29, %v4160_v28 }
 0x4ba   : > { %v4885_v30 = vpop.f32.mrf.mxu0  ;;  %v878_v8 = vpop.permute.xlu0 %877 }
 0x4bb   : > { %v9667_v14 = vmin.f32 %v5184_v27, %v5097_v10  ;;  %v5098_v50 = vsub.f32 %v9601_v24, %v5034_v39  ;;  %v5035_v57 = vmul.f32 2.0, %v4885_v30  ;;  %v951_v1 = vadd.f32 %v10102_v42, %v878_v8  ;;  %6525 = vpush %v4162_v60 }
 0x4bc   : > { %v953_v35 = vadd.f32 %v10103_v40, %v878_v8  ;;  %v4889_v16 = vpop.f32.mrf.mxu0 }
 0x4bd   : > { %v9672_v44 = vmin.f32 %v5148_v38, %v5098_v50  ;;  %v5099_v13 = vsub.f32 %v9601_v24, %v5035_v57  ;;  %6630 = vrcp.f32 %v951_v1 }
 0x4be   : > { %6632 = vrcp.f32 %v953_v35  ;;  %v4891_v37 = vpop.f32.mrf.mxu0 }
 0x4bf   : > { %v9675_v41 = vmin.f32 %v5185_v48, %v5099_v13 }
 0x4c0   : > { %v4895_v11 = vpop.f32.mrf.mxu0 }
 0x4c2   : > { %v4897_v34 = vpop.f32.mrf.mxu0 }
 0x4c4   : > { %v4901_v4 = vpop.f32.mrf.mxu0 }
 0x4c5   : > { %v5040_v0 = vmul.f32 2.0, %v4901_v4 }
 0x4c6   : > { %v9677_v12 = vpop.f32.mrf.mxu0 }
 0x4c8   : > { %v9679_v56 = vpop.f32.mrf.mxu0 }
 0x4ca   : > { %v6631_v22 = vpop.eup %6630  ;;  %v9681_v27 = vpop.f32.mrf.mxu0 }
 0x4cb   : > { %v6633_v5 = vpop.eup %6632  ;;  %v1288_v47 = vrot.slane %v6631_v22, 2  ;;  %v1294_v49 = vrot.slane %v6631_v22, 1 }
 0x4cc   : > { %v1289_v7 = vrot.slane %v6633_v5, 2  ;;  %v1295_v24 = vrot.slane %v6633_v5, 1 }
 0x4cd   : > { %v9683_v38 = vpop.f32.mrf.mxu0  ;;  %v1298_v17 = vmul.f32 %v1294_v49, %v951_v1  ;;  %v1292_v62 = vmul.f32 %v1288_v47, %v951_v1 }
 0x4ce   : > { %v1299_v43 = vmul.f32 %v1295_v24, %v953_v35  ;;  %v1293_v45 = vmul.f32 %v1289_v7, %v953_v35  ;;  %v6685_v24 = vld [vmem:[%s7195_s15 + $0x38] sm:$0xff] }
 0x4cf   : > { %v9685_v28 = vpop.f32.mrf.mxu0  ;;  %v1300_v48 = vsub.f32 0.0, %v1298_v17  ;;  %v4648_v17 = vmul.f32 %v6685_v24, %v6685_v24 }
 0x4d0   : > { %v1301_v21 = vsub.f32 0.0, %v1299_v43 }
 0x4d1   : > { %v9687_v29 = vpop.f32.mrf.mxu0  ;;  %v1303_v36 = vsel %vm1302_vm1, %v1292_v62, %v1300_v48  ;;  %v6686_v62 = vld [vmem:[%s7195_s15 + $0x30] sm:$0xff] }
 0x4d2   : > { %v1304_v10 = vsel %vm1302_vm1, %v1293_v45, %v1301_v21  ;;  %v1306_v39 = vsel %vm1305_vm10, %v1303_v36, %v951_v1  ;;  %v4647_v48 = vmul.f32 %v6686_v62, %v6686_v62  ;;  %v4655_v21 = vrot.slane %v4648_v17, 4  ;;  %v6687_v62 = vld [vmem:[%s7128_s21] sm:$0xff] }
 0x4d3   : > { %v9692_v60 = vpop.f32.mrf.mxu0  ;;  %v1307_v30 = vsel %vm1305_vm10, %v1304_v10, %v953_v35  ;;  %v5036_v36 = vmul.f32 2.0, %v4889_v16  ;;  %v5037_v10 = vmul.f32 2.0, %v4891_v37  ;;  %v9737_v55 = vadd.f32 %v6687_v62, %v10105_v31 }
 0x4d4   : > { %v1310_v8 = vcombine.low %v1306_v39, %v1307_v30  ;;  %v5038_v39 = vmul.f32 2.0, %v4895_v11  ;;  %v5041_v16 = vmul.f32 2.0, %v9677_v12  ;;  %v5042_v37 = vmul.f32 2.0, %v9679_v56  ;;  %v6689_v11 = vld [vmem:[%s7128_s21 + $0x10] sm:$0xff] }
 0x4d5   : > { %v9701_v50 = vpop.f32.mrf.mxu0  ;;  %v9750_v4 = vadd.f32 %v4655_v21, %v4648_v17  ;;  %v5100_v3 = vsub.f32 %v9603_v54, %v5036_v36  ;;  %v5101_v31 = vsub.f32 %v9603_v54, %v5037_v10  ;;  %v5043_v56 = vmul.f32 2.0, %v9681_v27  ;;  %v6690_v21 = vld [vmem:[%s7128_s21 + $0x18] sm:$0xff]  ;;  %v10110_v54 = vld [vmem:[#allocation57_spill] sm:$0xff] }
 0x4d6   : > { %1312 = vst [vmem:[%s9698_s17] sm:$0x77] %v1310_v8  ;;  %v4649_v8 = vrot.slane %v4647_v48, 4  ;;  %v5102_v62 = vsub.f32 %v9605_v19, %v5038_v39  ;;  %v10109_v36 = vld [vmem:[#allocation59_spill] sm:$0xff]  ;;  %v10111_v39 = vld [vmem:[#allocation58_spill] sm:$0xff]  ;;  %v5106_v27 = vsub.f32 %v9609_v15, %v5042_v37  ;;  %v5046_v10 = vmul.f32 2.0, %v9687_v29 }
 0x4d7   : > { %v9704_v57 = vpop.f32.mrf.mxu0  ;;  %10108 = vst [vmem:[#allocation54_spill] sm:$0xff] %v9750_v4 }
 0x4d8   : > { %v9757_v9 = vadd.f32 %v4649_v8, %v4647_v48  ;;  %v10112_v8 = vld [vmem:[#allocation60_spill] sm:$0xff] }
 0x4d9   : > { %v9706_v42 = vpop.f32.mrf.mxu0 }
 0x4db   : > { %v9708_v1 = vpop.f32.mrf.mxu0  ;;  %s6524_s27 = spop %6523 }
 0x4dc   : > { %s3098_s3 = smul.f32 0.00390625, %s6524_s27 }
 0x4dd   : > { %v9710_v40 = vpop.f32.mrf.mxu0 }
 0x4de   : > { %v3099_v13 = vstv %s3098_s3 }
 0x4df   : > { %v9712_v22 = vpop.f32.mrf.mxu0  ;;  %3101 = vst [vmem:[%s8596_s18 + $0x1] sm:$0x1] %v3099_v13  ;;  %v5039_v13 = vmul.f32 2.0, %v4897_v34  ;;  %v10107_v34 = vld [vmem:[#allocation56_spill] sm:$0xff] }
 0x4e0   : > { %v9748_v26 = vadd.f32 %v6689_v11, %v10107_v34  ;;  %v5104_v11 = vsub.f32 %v9607_v63, %v5040_v0  ;;  %v9767_v34 = vadd.f32 %v6690_v21, %v10109_v36  ;;  %v5188_v21 = vmin.f32 %v9667_v14, %v5101_v31 }
 0x4e1   : > { %v9715_v35 = vpop.f32.mrf.mxu0  ;;  %v5103_v12 = vsub.f32 %v9605_v19, %v5039_v13  ;;  %v5105_v19 = vsub.f32 %v9607_v63, %v5041_v16  ;;  %v5151_v13 = vmin.f32 %v9664_v6, %v5100_v3  ;;  %v5152_v36 = vmin.f32 %v9672_v44, %v5102_v62 }
 0x4e2   : > { %v5107_v63 = vsub.f32 %v9609_v15, %v5043_v56  ;;  %v5048_v0 = vmul.f32 2.0, %v9701_v50  ;;  %v5049_v3 = vmul.f32 2.0, %v9704_v57  ;;  %v5050_v6 = vmul.f32 2.0, %v9706_v42 }
 0x4e3   : > { %v9717_v5 = vpop.f32.mrf.mxu0  ;;  %v5189_v48 = vmin.f32 %v9675_v41, %v5103_v12  ;;  %v5153_v37 = vmin.f32 %v5151_v13, %v5104_v11  ;;  %v5190_v44 = vmin.f32 %v5188_v21, %v5105_v19  ;;  %v5154_v31 = vmin.f32 %v5152_v36, %v5106_v27 }
 0x4e4   : > { %v5051_v41 = vmul.f32 2.0, %v9708_v1  ;;  %v5110_v15 = vsub.f32 %v9613_v20, %v5046_v10  ;;  %v5052_v62 = vmul.f32 2.0, %v9710_v40  ;;  %v5054_v12 = vmul.f32 2.0, %v9715_v35 }
 0x4e5   : > { %v9719_v47 = vpop.f32.mrf.mxu0  ;;  %v5191_v56 = vmin.f32 %v5189_v48, %v5107_v63  ;;  %v5112_v11 = vsub.f32 %v9615_v52, %v5048_v0  ;;  %v5114_v1 = vsub.f32 %v9617_v33, %v5050_v6 }
 0x4e6   : > { %v5056_v10 = vmul.f32 2.0, %v9719_v47  ;;  %v5156_v27 = vmin.f32 %v5154_v31, %v5110_v15 }
 0x4e7   : > { %v9721_v49 = vpop.f32.mrf.mxu0 }
 0x4e8   : > { %v5057_v35 = vmul.f32 2.0, %v9721_v49  ;;  %v5158_v49 = vmin.f32 %v5156_v27, %v5114_v1 }
 0x4e9   : > { %v9723_v7 = vpop.f32.mrf.mxu0 }
 0x4ea   : > { %v5058_v48 = vmul.f32 2.0, %v9723_v7  ;;  %v5120_v7 = vsub.f32 %v9623_v2, %v5056_v10 }
 0x4eb   : > { %v9726_v43 = vpop.f32.mrf.mxu0 }
 0x4ec   : > { %s6526_s30 = spop %6525  ;;  %v5059_v47 = vmul.f32 2.0, %v9726_v43 }
 0x4ed   : > { %v9729_v45 = vpop.f32.mrf.mxu0  ;;  %s4166_s0 = smul.f32 0.00390625, %s6526_s30 }
 0x4ee   : > { %v5060_v21 = vmul.f32 2.0, %v9729_v45  ;;  %v5123_v31 = vsub.f32 %v9625_v25, %v5059_v47 }
 0x4ef   : > { %v9731_v30 = vpop.f32.mrf.mxu0  ;;  %v4167_v24 = vstv %s4166_s0 }
 0x4f0   : > { %4169 = vst [vmem:[%s8596_s18 + $0x2] sm:$0x1] %v4167_v24  ;;  %v5044_v24 = vmul.f32 2.0, %v9683_v38  ;;  %v5045_v38 = vmul.f32 2.0, %v9685_v28  ;;  %v5047_v28 = vmul.f32 2.0, %v9692_v60  ;;  %v5053_v60 = vmul.f32 2.0, %v9712_v22 }
 0x4f1   : > { %v9733_v58 = vpop.f32.mrf.mxu0  ;;  %v5115_v22 = vsub.f32 %v9617_v33, %v5051_v41 }
 0x4f2   : > { %v5108_v16 = vsub.f32 %v9611_v61, %v5044_v24  ;;  %v5109_v29 = vsub.f32 %v9611_v61, %v5045_v38  ;;  %v5111_v42 = vsub.f32 %v9613_v20, %v5047_v28  ;;  %v5055_v24 = vmul.f32 2.0, %v9717_v5 }
 0x4f3   : > { %v9755_v32 = vpop.f32.mrf.mxu0  ;;  %v5113_v61 = vsub.f32 %v9615_v52, %v5049_v3  ;;  %v5116_v20 = vsub.f32 %v9619_v59, %v5052_v62  ;;  %v5117_v5 = vsub.f32 %v9619_v59, %v5053_v60  ;;  %v5118_v38 = vsub.f32 %v9621_v46, %v5054_v12 }
 0x4f4   : > { %v5155_v57 = vmin.f32 %v5153_v37, %v5108_v16  ;;  %v5192_v19 = vmin.f32 %v5190_v44, %v5109_v29  ;;  %v5193_v0 = vmin.f32 %v5191_v56, %v5111_v42  ;;  %v5119_v13 = vsub.f32 %v9621_v46, %v5055_v24 }
 0x4f5   : > { %v9763_v17 = vpop.f32.mrf.mxu0  ;;  %v5121_v28 = vsub.f32 %v9623_v2, %v5057_v35  ;;  %v5122_v59 = vsub.f32 %v9625_v25, %v5058_v48  ;;  %v5061_v37 = vmul.f32 2.0, %v9731_v30  ;;  %v5160_v46 = vmin.f32 %v5158_v49, %v5118_v38  ;;  %v10114_v48 = vld [vmem:[#allocation35_spill] sm:$0xff] }
 0x4f6   : > { %v5157_v33 = vmin.f32 %v5155_v57, %v5112_v11  ;;  %v5194_v36 = vmin.f32 %v5192_v19, %v5113_v61  ;;  %v5195_v16 = vmin.f32 %v5193_v0, %v5115_v22  ;;  %v5062_v43 = vmul.f32 2.0, %v9733_v58  ;;  %v10115_v0 = vld [vmem:[#allocation41_spill] sm:$0xff] }
 0x4f7   : > { %v4975_v4 = vpop.f32.mrf.mxu0  ;;  %v5124_v29 = vsub.f32 %v9627_v18, %v5060_v21  ;;  %v5064_v41 = vmul.f32 2.0, %v9763_v17  ;;  %v5063_v2 = vmul.f32 2.0, %v9755_v32  ;;  %v5162_v56 = vmin.f32 %v5160_v46, %v5122_v59  ;;  %v10116_v21 = vld [vmem:[#allocation49_spill] sm:$0xff] }
 0x4f8   : > { %v5159_v3 = vmin.f32 %v5157_v33, %v5116_v20  ;;  %v5196_v6 = vmin.f32 %v5194_v36, %v5117_v5  ;;  %v5197_v45 = vmin.f32 %v5195_v16, %v5119_v13  ;;  %v5065_v62 = vmul.f32 2.0, %v4975_v4 }
 0x4f9   : > { %v4979_v14 = vpop.f32.mrf.mxu0  ;;  %v5125_v57 = vsub.f32 %v9627_v18, %v5061_v37  ;;  %v5126_v58 = vsub.f32 %v9629_v53, %v5062_v43  ;;  %v5128_v17 = vsub.f32 %v9631_v51, %v5064_v41  ;;  %v5127_v4 = vsub.f32 %v9629_v53, %v5063_v2  ;;  %v10120_v2 = vld [vmem:[#allocation50_spill] sm:$0xff] }
 0x4fa   : > { %v5161_v15 = vmin.f32 %v5159_v3, %v5120_v7  ;;  %v5066_v60 = vmul.f32 2.0, %v4979_v14  ;;  %v5198_v30 = vmin.f32 %v5196_v6, %v5121_v28  ;;  %v5199_v1 = vmin.f32 %v5197_v45, %v5123_v31  ;;  %v10113_v14 = vld [vmem:[#allocation43_spill] sm:$0xff]  ;;  %v10118_v6 = vld [vmem:[#allocation38_spill] sm:$0xff] }
 0x4fb   : > { %v4981_v50 = vpop.f32.mrf.mxu0  ;;  %v5129_v32 = vsub.f32 %v9631_v51, %v5065_v62  ;;  %v5164_v5 = vmin.f32 %v5162_v56, %v5126_v58  ;;  %v10117_v36 = vsub.f32 %v9737_v55, %v10110_v54  ;;  %v10119_v55 = vsub.f32 %v9741_v23, %v10111_v39  ;;  %v10122_v23 = vld [vmem:[#allocation62_spill] sm:$0xff] }
 0x4fc   : > { %v5067_v24 = vmul.f32 2.0, %v4981_v50  ;;  %v5163_v10 = vmin.f32 %v5161_v15, %v5124_v29  ;;  %v5130_v22 = vsub.f32 %v10113_v14, %v5066_v60  ;;  %v5201_v7 = vmin.f32 %v5199_v1, %v5127_v4 }
 0x4fd   : > { %v4985_v40 = vpop.f32.mrf.mxu0  ;;  %v5318_v49 = vand.u32 2147483647, %v10117_v36  ;;  %v5319_v54 = vand.u32 2147483647, %v10119_v55  ;;  %v5313_v39 = vsub.f32 %v9767_v34, %v10122_v23  ;;  %v5943_v23 = vld [vmem:[%s9567_s16 + $0x8] sm:$0xff] }
 0x4fe   : > { %v5068_v42 = vmul.f32 2.0, %v4985_v40  ;;  %v5200_v40 = vmin.f32 %v5198_v30, %v5125_v57  ;;  %v5131_v38 = vsub.f32 %v10113_v14, %v5067_v24  ;;  %v5165_v53 = vmin.f32 %v5163_v10, %v5128_v17  ;;  %v6691_v24 = vld [vmem:[%s7128_s21 + $0x20] sm:$0xff]  ;;  %v10124_v17 = vld [vmem:[#allocation54_spill] sm:$0xff] }
 0x4ff   : > { %v4987_v52 = vpop.f32.mrf.mxu0  ;;  %v5166_v16 = vmin.f32 %v5164_v5, %v5130_v22  ;;  %v5326_v10 = vadd.f32 %v5319_v54, %v5318_v49 }
 0x500   : > { %v5069_v11 = vmul.f32 2.0, %v4987_v52  ;;  %v5132_v27 = vsub.f32 %v10114_v48, %v5068_v42 }
 0x501   : > { %v4991_v63 = vpop.f32.mrf.mxu0 }
 0x502   : > { %v5070_v25 = vmul.f32 2.0, %v4991_v63  ;;  %v5133_v52 = vsub.f32 %v10114_v48, %v5069_v11  ;;  %v5202_v63 = vmin.f32 %v5200_v40, %v5129_v32  ;;  %v5167_v37 = vmin.f32 %v5165_v53, %v5132_v27  ;;  %v10121_v11 = vld [vmem:[#allocation61_spill] sm:$0xff]  ;;  %v10125_v48 = vld [vmem:[#allocation63_spill] sm:$0xff] }
 0x503   : > { %v4993_v44 = vpop.f32.mrf.mxu0  ;;  %v6692_v40 = vld [vmem:[%s7128_s21 + $0x28] sm:$0xff] }
 0x504   : > { %v5071_v35 = vmul.f32 2.0, %v4993_v44  ;;  %v5134_v13 = vsub.f32 %v10115_v0, %v5070_v25  ;;  %v5203_v44 = vmin.f32 %v5201_v7, %v5131_v38  ;;  %v5204_v45 = vmin.f32 %v5202_v63, %v5133_v52  ;;  %v10127_v53 = vld [vmem:[#allocation65_spill] sm:$0xff] }
 0x505   : > { %v4997_v12 = vpop.f32.mrf.mxu0  ;;  %v5282_v25 = vadd.f32 %v6691_v24, %v10121_v11  ;;  %v5283_v27 = vadd.f32 %v6692_v40, %v10125_v48 }
 0x506   : > { %v5072_v19 = vmul.f32 2.0, %v4997_v12  ;;  %v5135_v28 = vsub.f32 %v10115_v0, %v5071_v35  ;;  %v5168_v31 = vmin.f32 %v5166_v16, %v5134_v13  ;;  %v4651_v12 = vrot.slane %v9757_v9, 2 }
 0x507   : > { %v4999_v61 = vpop.f32.mrf.mxu0 }
 0x508   : > { %v5073_v50 = vmul.f32 2.0, %v4999_v61  ;;  %v5136_v51 = vsub.f32 %v10116_v21, %v5072_v19  ;;  %v5205_v30 = vmin.f32 %v5203_v44, %v5135_v28  ;;  %v10123_v61 = vsub.f32 %v9748_v26, %v10112_v8 }
 0x509   : > { %v5003_v18 = vpop.f32.mrf.mxu0  ;;  %v4657_v19 = vrot.slane %v10124_v17, 2  ;;  %v4652_v22 = vadd.f32 %v4651_v12, %v9757_v9 }
 0x50a   : > { %v5074_v20 = vmul.f32 2.0, %v5003_v18  ;;  %v5137_v3 = vsub.f32 %v10116_v21, %v5073_v50  ;;  %v5169_v41 = vmin.f32 %v5167_v37, %v5136_v51  ;;  %v5320_v1 = vand.u32 2147483647, %v10123_v61  ;;  %v10126_v50 = vld [vmem:[#allocation64_spill] sm:$0xff]  ;;  %v10128_v21 = vld [vmem:[#allocation34_spill] sm:$0xff]  ;;  %v6694_v37 = vld [vmem:[%s7128_s21 + $0x38] sm:$0xff] }
 0x50b   : > { %v5005_v47 = vpop.f32.mrf.mxu0  ;;  %v5314_v34 = vsub.f32 %v5282_v25, %v10126_v50  ;;  %v4658_v26 = vadd.f32 %v4657_v19, %v10124_v17  ;;  %v4653_v52 = vrot.slane %v4652_v22, 1  ;;  %v5315_v51 = vsub.f32 %v5283_v27, %v10128_v21  ;;  %v10132_v61 = vld [vmem:[#allocation51_spill] sm:$0xff]  ;;  %v10133_v17 = vld [vmem:[#allocation52_spill] sm:$0xff] }
 0x50c   : > { %v5075_v33 = vmul.f32 2.0, %v5005_v47  ;;  %v5138_v46 = vsub.f32 %v10118_v6, %v5074_v20  ;;  %v5206_v56 = vmin.f32 %v5204_v45, %v5137_v3  ;;  %v5321_v20 = vand.u32 2147483647, %v5313_v39  ;;  %v6693_v47 = vld [vmem:[%s7128_s21 + $0x30] sm:$0xff]  ;;  %v10129_v3 = vld [vmem:[#allocation36_spill] sm:$0xff] }
 0x50d   : > { %v5009_v59 = vpop.f32.mrf.mxu0  ;;  %v5327_v5 = vadd.f32 %v5326_v10, %v5320_v1  ;;  %v5284_v9 = vadd.f32 %v6693_v47, %v10127_v53  ;;  %v4659_v49 = vrot.slane %v4658_v26, 1  ;;  %v4654_v28 = vadd.f32 %v4653_v52, %v4652_v22  ;;  %v6016_v39 = vld [vmem:[%s9567_s16 + $0x10] sm:$0xff] }
 0x50e   : > { %v5076_v43 = vmul.f32 2.0, %v5009_v59  ;;  %v5139_v15 = vsub.f32 %v10118_v6, %v5075_v33  ;;  %v5170_v57 = vmin.f32 %v5168_v31, %v5138_v46  ;;  %v5322_v33 = vand.u32 2147483647, %v5314_v34  ;;  %v10130_v46 = vld [vmem:[#allocation66_spill] sm:$0xff] }
 0x50f   : > { %v5011_v29 = vpop.f32.mrf.mxu0  ;;  %v5328_v36 = vadd.f32 %v5327_v5, %v5321_v20  ;;  %v5285_v6 = vadd.f32 %v6694_v37, %v10129_v3  ;;  %v5323_v44 = vand.u32 2147483647, %v5315_v51  ;;  %v4660_v31 = vadd.f32 %v4659_v49, %v4658_v26  ;;  %v10137_v51 = vld [vmem:[#allocation31_spill] sm:$0xff]  ;;  %v10139_v3 = vld [vmem:[#allocation33_spill] sm:$0xff] }
 0x510   : > { %v5140_v62 = vsub.f32 %v10120_v2, %v5076_v43  ;;  %v5077_v60 = vmul.f32 2.0, %v5011_v29  ;;  %v5207_v4 = vmin.f32 %v5205_v30, %v5139_v15  ;;  %v5316_v43 = vsub.f32 %v5284_v9, %v10130_v46  ;;  %v10131_v15 = vld [vmem:[#allocation44_spill] sm:$0xff]  ;;  %v10136_v9 = vld [vmem:[#allocation30_spill] sm:$0xff] }
 0x511   : > { %v5329_v45 = vadd.f32 %v5328_v36, %v5322_v33  ;;  %v5303_v1 = vrot.slane %v10132_v61, 4  ;;  %v5559_v19 = vrot.slane %v10133_v17, 4 }
 0x512   : > { %v5171_v42 = vmin.f32 %v5169_v41, %v5140_v62  ;;  %v5141_v58 = vsub.f32 %v10120_v2, %v5077_v60  ;;  %v5317_v2 = vsub.f32 %v5285_v6, %v10131_v15  ;;  %v5324_v62 = vand.u32 2147483647, %v5316_v43 }
 0x513   : > { %v5330_v60 = vadd.f32 %v5329_v45, %v5323_v44  ;;  %v5304_v10 = vadd.f32 %v5303_v1, %v10132_v61 }
 0x514   : > { %v5172_v32 = vmin.f32 %v5170_v57, %v5171_v42  ;;  %v5208_v14 = vmin.f32 %v5206_v56, %v5141_v58  ;;  %v5325_v57 = vand.u32 2147483647, %v5317_v2 }
 0x515   : > { %v5331_v42 = vadd.f32 %v5330_v60, %v5324_v62  ;;  %v5305_v22 = vrot.slane %v5304_v10, 2 }
 0x516   : > { %v5173_v35 = vrot.slane %v5172_v32, 4  ;;  %v5209_v18 = vmin.f32 %v5207_v4, %v5208_v14  ;;  %v4177_v4 = vpop.permute.xlu0 %4176 }
 0x517   : > { %v5332_v25 = vadd.f32 %v5331_v42, %v5325_v57  ;;  %v5306_v5 = vadd.f32 %v5305_v22, %v5304_v10 }
 0x518   : > { %v5174_v8 = vmin.f32 %v5172_v32, %v5173_v35  ;;  %v5210_v38 = vrot.slane %v5209_v18, 4  ;;  %v10134_v32 = vld [vmem:[#allocation45_spill] sm:$0xff]  ;;  %v5560_v35 = vadd.f32 %v5559_v19, %v10133_v17 }
 0x519   : > { %v9871_v14 = vadd.f32 %v10134_v32, %v4177_v4 }
 0x51a   : > { %v5175_v0 = vrot.slane %v5174_v8, 2  ;;  %v5211_v13 = vmin.f32 %v5209_v18, %v5210_v38  ;;  %v10135_v18 = vld [vmem:[#allocation40_spill] sm:$0xff]  ;;  %v5561_v34 = vrot.slane %v5560_v35, 2 }
 0x51b   : > { %v9875_v40 = vadd.f32 %v10135_v18, %v4177_v4  ;;  %6634 = vrcp.f32 %v9871_v14 }
 0x51c   : > { %v5176_v7 = vmin.f32 %v5174_v8, %v5175_v0  ;;  %v5212_v63 = vrot.slane %v5211_v13, 2  ;;  %v5562_v47 = vadd.f32 %v5561_v34, %v5560_v35 }
 0x51d   : > { %6636 = vrcp.f32 %v9875_v40 }
 0x51e   : > { %v5213_v16 = vmin.f32 %v5211_v13, %v5212_v63  ;;  %v5177_v59 = vrot.slane %v5176_v7, 1  ;;  %v5307_v13 = vrot.slane %v5306_v5, 1 }
 0x520   : > { %v5178_v29 = vmin.f32 %v5176_v7, %v5177_v59  ;;  %v5214_v55 = vrot.slane %v5213_v16, 1  ;;  %v10138_v59 = vld [vmem:[#allocation32_spill] sm:$0xff] }
 0x522   : > { %v5215_v54 = vmin.f32 %v5213_v16, %v5214_v55  ;;  %v5216_v41 = vadd.f32 %v5178_v29, %v4654_v28  ;;  %v5308_v16 = vadd.f32 %v5307_v13, %v5306_v5  ;;  %v5563_v28 = vrot.slane %v5562_v47, 1 }
 0x524   : > { %v5217_v12 = vadd.f32 %v5215_v54, %v4660_v31  ;;  %v5218_v30 = vmax.f32 %v5216_v41, 0.0  ;;  %v5564_v45 = vadd.f32 %v5563_v28, %v5562_v47 }
 0x526   : > { %v5219_v56 = vmax.f32 %v5217_v12, 0.0  ;;  %v5220_v58 = vsel %vm1302_vm1, %v5218_v30, 0.0 }
 0x528   : > { %v5221_v24 = vsel %vm1302_vm1, %v5219_v56, 0.0  ;;  %v6635_v44 = vpop.eup %6634 }
 0x529   : > { %v5222_v11 = vadd.f32 %v5221_v24, %v5220_v58  ;;  %v4498_v29 = vrot.slane %v6635_v44, 1  ;;  %v4492_v41 = vrot.slane %v6635_v44, 2 }
 0x52a   : > { %v6637_v31 = vpop.eup %6636 }
 0x52b   : > { %5223 = vadd.xlane.f32.xlu1 %v5222_v11  ;;  %v4499_v55 = vrot.slane %v6637_v31, 1  ;;  %v4502_v15 = vmul.f32 %v4498_v29, %v9871_v14  ;;  %v4493_v57 = vrot.slane %v6637_v31, 2  ;;  %v4496_v24 = vmul.f32 %v4492_v41, %v9871_v14 }
 0x52d   : > { %v4503_v2 = vmul.f32 %v4499_v55, %v9875_v40  ;;  %v4504_v11 = vsub.f32 0.0, %v4502_v15  ;;  %v4497_v35 = vmul.f32 %v4493_v57, %v9875_v40 }
 0x52f   : > { %5333 = vadd.xlane.f32.xlu1 %v5332_v25  ;;  %v4505_v25 = vsub.f32 0.0, %v4503_v2 }
 0x531   : > { %v4507_v5 = vsel %vm1302_vm1, %v4497_v35, %v4505_v25 }
 0x540   : > { %2040 = vperm.xlu1 %6628, %v5943_v23  }
 0x544   : > { %3108 = vperm.xlu1 %6628, %v6016_v39  }
 0x5b4   : > { %v5224_v48 = vpop.xlane.xlu1 %5223 }
 0x5b5   : > { %v5225_v27 = vrot.slane %v5224_v48, 4 }
 0x5b7   : > { %v5226_v50 = vadd.f32 %v5225_v27, %v5224_v48  ;;  %v4506_v27 = vsel %vm1302_vm1, %v4496_v24, %v4504_v11 }
 0x5b8   : > { %v5334_v20 = vpop.xlane.xlu1 %5333 }
 0x5b9   : > { %v5227_v26 = vrot.slane %v5226_v50, 2  ;;  %v5335_v8 = vrot.slane %v5334_v20, 4 }
 0x5bb   : > { %v5336_v38 = vadd.f32 %v5335_v8, %v5334_v20  ;;  %v5228_v52 = vadd.f32 %v5227_v26, %v5226_v50 }
 0x5bc   : > { %v2041_v0 = vpop.permute.xlu1 %2040 }
 0x5bd   : > { %v5337_v53 = vrot.slane %v5336_v38, 2  ;;  %v2113_v21 = vadd.f32 %v10136_v9, %v2041_v0  ;;  %v2115_v33 = vadd.f32 %v10137_v51, %v2041_v0  ;;  %v5229_v36 = vrot.slane %v5228_v52, 1 }
 0x5be   : > { %v4509_v9 = vsel %vm1305_vm10, %v4507_v5, %v9875_v40 }
 0x5bf   : > { %6638 = vrcp.f32 %v2113_v21  ;;  %v5230_v49 = vadd.f32 %v5229_v36, %v5228_v52  ;;  %v5338_v7 = vadd.f32 %v5337_v53, %v5336_v38  ;;  %v4508_v53 = vsel %vm1305_vm10, %v4506_v27, %v9871_v14 }
 0x5c0   : > { %6640 = vrcp.f32 %v2115_v33  ;;  %v3109_v63 = vpop.permute.xlu1 %3108 }
 0x5c1   : > { %v3181_v37 = vadd.f32 %v10138_v59, %v3109_v63  ;;  %v3183_v6 = vadd.f32 %v10139_v3, %v3109_v63  ;;  %6527 = vpush %v5230_v49  ;;  %v5339_v46 = vrot.slane %v5338_v7, 1  ;;  %v4512_v49 = vcombine.low %v4508_v53, %v4509_v9 }
 0x5c2   : > { %6529 = vpush %v5308_v16 }
 0x5c3   : > { %6642 = vrcp.f32 %v3181_v37  ;;  %v5340_v43 = vadd.f32 %v5339_v46, %v5338_v7  ;;  %6126 = vst [vmem:[%s9698_s17 + $0x18] sm:$0x77] %v4512_v49 }
 0x5c4   : > { %6644 = vrcp.f32 %v3183_v6 }
 0x5c5   : > { %6531 = vpush %v5340_v43 }
 0x5c6   : > { %6533 = vpush %v5564_v45 }
 0x5cc   : > { %v6639_v54 = vpop.eup %6638 }
 0x5cd   : > { %v6641_v62 = vpop.eup %6640  ;;  %v2356_v60 = vrot.slane %v6639_v54, 2  ;;  %v2362_v12 = vrot.slane %v6639_v54, 1 }
 0x5ce   : > { %v2357_v30 = vrot.slane %v6641_v62, 2  ;;  %v2363_v56 = vrot.slane %v6641_v62, 1 }
 0x5cf   : > { %v2366_v42 = vmul.f32 %v2362_v12, %v2113_v21  ;;  %v2360_v61 = vmul.f32 %v2356_v60, %v2113_v21 }
 0x5d0   : > { %v6643_v58 = vpop.eup %6642  ;;  %v2367_v23 = vmul.f32 %v2363_v56, %v2115_v33  ;;  %v2361_v19 = vmul.f32 %v2357_v30, %v2115_v33 }
 0x5d1   : > { %v6645_v39 = vpop.eup %6644  ;;  %v2368_v1 = vsub.f32 0.0, %v2366_v42  ;;  %v3424_v10 = vrot.slane %v6643_v58, 2  ;;  %v3430_v17 = vrot.slane %v6643_v58, 1 }
 0x5d2   : > { %v2369_v4 = vsub.f32 0.0, %v2367_v23  ;;  %v3425_v32 = vrot.slane %v6645_v39, 2  ;;  %v3431_v22 = vrot.slane %v6645_v39, 1 }
 0x5d3   : > { %v2370_v18 = vsel %vm1302_vm1, %v2360_v61, %v2368_v1  ;;  %v3434_v48 = vmul.f32 %v3430_v17, %v3181_v37  ;;  %v3428_v8 = vmul.f32 %v3424_v10, %v3181_v37 }
 0x5d4   : > { %v2371_v50 = vsel %vm1302_vm1, %v2361_v19, %v2369_v4  ;;  %v2372_v34 = vsel %vm1305_vm10, %v2370_v18, %v2113_v21  ;;  %v3435_v20 = vmul.f32 %v3431_v22, %v3183_v6  ;;  %v3429_v0 = vmul.f32 %v3425_v32, %v3183_v6 }
 0x5d5   : > { %v2373_v26 = vsel %vm1305_vm10, %v2371_v50, %v2115_v33  ;;  %v3436_v38 = vsub.f32 0.0, %v3434_v48 }
 0x5d6   : > { %v2376_v52 = vcombine.low %v2372_v34, %v2373_v26  ;;  %v3437_v13 = vsub.f32 0.0, %v3435_v20 }
 0x5d7   : > { %v3438_v47 = vsel %vm1302_vm1, %v3428_v8, %v3436_v38 }
 0x5d8   : > { %5980 = vst [vmem:[%s9698_s17 + $0x8] sm:$0x77] %v2376_v52  ;;  %v3439_v21 = vsel %vm1302_vm1, %v3429_v0, %v3437_v13  ;;  %v3440_v51 = vsel %vm1305_vm10, %v3438_v47, %v3181_v37 }
 0x5d9   : > { %v3441_v33 = vsel %vm1305_vm10, %v3439_v21, %v3183_v6 }
 0x5da   : > { %v3444_v36 = vcombine.low %v3440_v51, %v3441_v33 }
 0x5dc   : > { %6053 = vst [vmem:[%s9698_s17 + $0x10] sm:$0x77] %v3444_v36 }
 0x5f2   : > { %s6528_s21 = spop %6527 }
 0x5f3   : > { %s5234_s15 = smul.f32 0.00390625, %s6528_s21  ;;  %s6530_s25 = spop %6529 }
 0x5f4   : > { %v5566_v14 = vstv %s6530_s25 }
 0x5f5   : > { %v5235_v7 = vstv %s5234_s15  ;;  %5568 = vst [vmem:[%s8596_s18 + $0x4] sm:$0x1] %v5566_v14 }
 0x5f6   : > { %5237 = vst [vmem:[%s8596_s18 + $0x3] sm:$0x1] %v5235_v7  ;;  %s6532_s20 = spop %6531 }
 0x5f7   : > { %v5569_v40 = vstv %s6532_s20  ;;  %s6534_s29 = spop %6533 }
 0x5f8   : > { %5571 = vst [vmem:[%s8596_s18 + $0x5] sm:$0x1] %v5569_v40  ;;  %v5572_v63 = vstv %s6534_s29 }
 0x5f9   : > { %5574 = vst [vmem:[%s8596_s18 + $0x6] sm:$0x1] %v5572_v63 }
 0x5fa PF: > { %s10140_s28 = sld [smem:[#allocation26_spill]]  ;;  %s10143_s25 = smov %s6811_s26 }
 0x5fb   : > { %s10141_s12 = sld [smem:[#allocation25_spill]] }
 0x5fc   : > { %s10142_s27 = sld [smem:[#allocation27_spill]] }
 0x600   : > { %p31_p1 = scmp.ge.s32.totalorder %s10140_s28, 4  }
 0x601   : > { %s10144_s26 = smov %s10141_s12 }
 0x602   :  { %33 = sbr.rel (!%p31_p1) target bundleno = 13 (0xd), region = 221 }
 0x607   :  { %5613 = vsyncpa [#allocation3], 1 }
 0x608   :  { %5615 = vsyncpa [#allocation3 + $0x1], 1 }
 0x609   :  { %5616 = vsyncpa [#allocation5], 1 }
 0x60a   :  { %5618 = vsyncpa [#allocation5 + $0x1], 1 }
 0x60b   :  { %5619 = vsyncpa [#allocation8], 1 }
 0x60c   :  { %5621 = vsyncpa [#allocation8 + $0x1], 1 }
 0x60d   :  { %5622 = vsyncpa [#allocation11], 1 }
 0x60e   :  { %5624 = vsyncpa [#allocation11 + $0x1], 1 }

</bundles_post_ra>
